<compile_context>
chip_gen: v6e
topology: v6e:2x2x1
jax: 0.10.0
libtpu: 0.0.40
codegen_flags: <defaults>
</compile_context>

<pallas_src>
import numpy as np

import jax
import jax.numpy as jnp
from jax.experimental import pallas as pl
from jax.experimental.pallas import tpu as pltpu

# ----------------------------- model config --------------------------------
IMG_C, IMG_HW = 3, 8            # "img" slice      -> (B, 3, 8, 8)
FIMG_C, FIMG_HW = 3, 16         # "full_img" slice -> (B, 3, 16, 16)
HEALTH_DIM, PANTRY_DIM, SHELF_DIM = 1, 8, 8
SIZES = [IMG_C * IMG_HW * IMG_HW,
         FIMG_C * FIMG_HW * FIMG_HW,
         HEALTH_DIM, PANTRY_DIM, SHELF_DIM]
OBS_DIM = sum(SIZES)            # 192 + 768 + 1 + 8 + 8 = 977
ACTION_DIM = 5
HIDDEN = 32
CONV_OC, CONV_K = 8, 3
IMG_FLAT = IMG_C * IMG_HW * IMG_HW          # 192
FIMG_FLAT = FIMG_C * FIMG_HW * FIMG_HW      # 768
IMG_OHW = IMG_HW - CONV_K + 1               # 6
FIMG_OHW = FIMG_HW - CONV_K + 1             # 14
INV_DIM = PANTRY_DIM + SHELF_DIM + HEALTH_DIM   # 17
INV_PAD = 24                                # contraction padded to a multiple of 8


# --------------------------- fused Pallas kernel -----------------------------
def _fused_forward_kernel(
        obs_ref,
        img_cw_ref, img_cb_ref, img_fw_ref, img_fb_ref,
        fimg_cw_ref, fimg_cb_ref, fimg_fw_ref, fimg_fb_ref,
        inv1_w_ref, inv1_b_ref, inv2_w_ref, inv2_b_ref,
        fin1_wa_ref, fin1_wb_ref, fin1_wc_ref, fin1_b_ref,
        fin2_w_ref, fin2_b_ref,
        out_ref):
    """Entire FoodNetworkMedium forward on VMEM-resident tiles.

    Only the (B, ACTION_DIM) softmax probabilities leave the kernel.
    """
    obs = obs_ref[...]                                    # (B, 977) f32

    def dense_relu(x, w_ref, b_ref):
        y = jnp.dot(x, w_ref[...], preferred_element_type=jnp.float32) + b_ref[...]
        return jnp.maximum(y, 0.0)

    # img branch: 3x3 conv + relu folded into one dense matmul, then fc + relu.
    x = dense_relu(obs[:, :IMG_FLAT], img_cw_ref, img_cb_ref)          # (B, 288)
    x_img = dense_relu(x, img_fw_ref, img_fb_ref)                      # (B, 32)

    # full_img branch.
    x = dense_relu(obs[:, IMG_FLAT:IMG_FLAT + FIMG_FLAT],
                   fimg_cw_ref, fimg_cb_ref)                           # (B, 1568)
    x_full_img = dense_relu(x, fimg_fw_ref, fimg_fb_ref)               # (B, 32)

    # inventory branch: consumes the last 24 obs lanes directly (the first 7 rows of
    # the padded weight are zero), no in-kernel concat and K is a multiple of 8.
    h = dense_relu(obs[:, OBS_DIM - INV_PAD:], inv1_w_ref, inv1_b_ref)  # (B, 32)
    x_inventory = dense_relu(h, inv2_w_ref, inv2_b_ref)                 # (B, 32)

    # final_fc1 over concat(x_img, x_full_img, x_inventory) as a 3-way matmul sum.
    h = (jnp.dot(x_img, fin1_wa_ref[...], preferred_element_type=jnp.float32)
         + jnp.dot(x_full_img, fin1_wb_ref[...], preferred_element_type=jnp.float32)
         + jnp.dot(x_inventory, fin1_wc_ref[...], preferred_element_type=jnp.float32)
         + fin1_b_ref[...])
    h = jnp.maximum(h, 0.0)                                             # (B, 64)

    logits = jnp.dot(h, fin2_w_ref[...],
                     preferred_element_type=jnp.float32) + fin2_b_ref[...]  # (B, 5)
    m = jnp.max(logits, axis=-1, keepdims=True)
    e = jnp.exp(logits - m)
    out_ref[...] = (e / jnp.sum(e, axis=-1, keepdims=True)).astype(out_ref.dtype)


def food_network_forward(fused_params, obs):
    """Single pallas_call forward. obs: (B, 977) or (977,)."""
    if obs.ndim < 2:                     # mirrors torch_ify(obs).unsqueeze(0)
        obs = obs[None, :]
    obs = obs.astype(jnp.float32)
    B, D = obs.shape
    assert D == OBS_DIM, "not all of obs used"
    fp = fused_params
    args = (obs,
            fp["img_conv_w"], fp["img_conv_b"], fp["img_fc_w"], fp["img_fc_b"],
            fp["fimg_conv_w"], fp["fimg_conv_b"], fp["fimg_fc_w"], fp["fimg_fc_b"],
            fp["inv_fc1_w"], fp["inv_fc1_b"], fp["inv_fc2_w"], fp["inv_fc2_b"],
            fp["final_fc1_wa"], fp["final_fc1_wb"], fp["final_fc1_wc"], fp["final_fc1_b"],
            fp["final_fc2_w"], fp["final_fc2_b"])
    vmem_spec = pl.BlockSpec(memory_space=pltpu.MemorySpace.VMEM)
    return pl.pallas_call(
        _fused_forward_kernel,
        out_shape=jax.ShapeDtypeStruct((B, ACTION_DIM), jnp.float32),
        in_specs=[vmem_spec] * len(args),
        out_specs=vmem_spec,
        compiler_params=pltpu.CompilerParams(vmem_limit_bytes=32 * 1024 * 1024),
    )(*args)

# TODO(synk): get_action's Categorical sampling (host-side RNG .sample().item()) is not a kernel op.


# ------------------- init-time parameter repacking (host side) ---------------
def _conv_as_dense(w_oihw, b, H, W):
    """Fold im2col + conv into one dense (C*H*W, OH*OW*OC) matmul weight.

    dense[c*H*W + (oh+i)*W + (ow+j), (oh*OW+ow)*OC + oc] = w[oc, c, i, j]
    """
    w = np.asarray(w_oihw, np.float32)
    OC, C, KH, KW = w.shape
    OH, OW = H - KH + 1, W - KW + 1
    dense = np.zeros((C * H * W, OH * OW * OC), np.float32)
    for oh in range(OH):
        for ow in range(OW):
            col0 = (oh * OW + ow) * OC
            for c in range(C):
                for i in range(KH):
                    row0 = c * H * W + (oh + i) * W + ow
                    dense[row0:row0 + KW, col0:col0 + OC] = w[:, c, i, :].T
    bias = np.tile(np.asarray(b, np.float32), OH * OW)   # index (oh*OW+ow)*OC + oc -> b[oc]
    return dense, bias


def _permute_fc_for_nhwc(w_in_out, OC, P):
    """Re-order FC input rows from NCHW-flat (oc*P + p) to NHWC-flat (p*OC + oc)."""
    w = np.asarray(w_in_out, np.float32)
    idx = (np.arange(P)[:, None] + P * np.arange(OC)[None, :]).reshape(-1)
    return w[idx]


def _pad_inventory_fc(w_in_out):
    """Map inv_fc1 rows (pantry, shelf, health order) onto obs[:, -24:] columns.

    obs[:, -24:] = (7 trailing full_img lanes, health, pantry[8], shelf[8]); the
    7 extra lanes get zero weight rows so the result is unchanged.
    """
    w = np.asarray(w_in_out, np.float32)
    wp = np.zeros((INV_PAD, w.shape[1]), np.float32)
    wp[7, :] = w[PANTRY_DIM + SHELF_DIM, :]            # health
    wp[8:16, :] = w[0:PANTRY_DIM, :]                   # pantry
    wp[16:24, :] = w[PANTRY_DIM:PANTRY_DIM + SHELF_DIM, :]  # shelf
    return wp


def prepare_fused_params(params):
    """One-time repack of PyTorch-layout params into the fused kernel's layouts."""
    wd_i, bd_i = _conv_as_dense(*params["img_conv"], IMG_HW, IMG_HW)
    wd_f, bd_f = _conv_as_dense(*params["fimg_conv"], FIMG_HW, FIMG_HW)
    wfc_i = _permute_fc_for_nhwc(params["img_fc"][0], CONV_OC, IMG_OHW * IMG_OHW)
    wfc_f = _permute_fc_for_nhwc(params["fimg_fc"][0], CONV_OC, FIMG_OHW * FIMG_OHW)
    wi1p = _pad_inventory_fc(params["inv_fc1"][0])
    wfin1 = np.asarray(params["final_fc1"][0], np.float32)

    f = lambda a: jnp.asarray(a, jnp.float32)
    row = lambda a: jnp.asarray(a, jnp.float32).reshape(1, -1)
    return {
        "img_conv_w": f(wd_i),   "img_conv_b": row(bd_i),
        "img_fc_w":   f(wfc_i),  "img_fc_b":   row(params["img_fc"][1]),
        "fimg_conv_w": f(wd_f),  "fimg_conv_b": row(bd_f),
        "fimg_fc_w":  f(wfc_f),  "fimg_fc_b":  row(params["fimg_fc"][1]),
        "inv_fc1_w":  f(wi1p),   "inv_fc1_b":  row(params["inv_fc1"][1]),
        "inv_fc2_w":  f(params["inv_fc2"][0]), "inv_fc2_b": row(params["inv_fc2"][1]),
        "final_fc1_wa": f(wfin1[0 * HIDDEN:1 * HIDDEN]),
        "final_fc1_wb": f(wfin1[1 * HIDDEN:2 * HIDDEN]),
        "final_fc1_wc": f(wfin1[2 * HIDDEN:3 * HIDDEN]),
        "final_fc1_b":  row(params["final_fc1"][1]),
        "final_fc2_w":  f(params["final_fc2"][0]), "final_fc2_b": row(params["final_fc2"][1]),
    }


# ----------------------------- parameter init --------------------------------
def _init_linear(key, i, o):
    k1, k2 = jax.random.split(key)
    s = 1.0 / jnp.sqrt(i)
    return (jax.random.uniform(k1, (i, o), jnp.float32, -s, s),
            jax.random.uniform(k2, (o,), jnp.float32, -s, s))


def _init_conv(key, oc, c, kh, kw):
    k1, k2 = jax.random.split(key)
    s = 1.0 / jnp.sqrt(c * kh * kw)
    return (jax.random.uniform(k1, (oc, c, kh, kw), jnp.float32, -s, s),
            jax.random.uniform(k2, (oc,), jnp.float32, -s, s))


def init_params(key):
    ks = jax.random.split(key, 8)
    return {
        "img_conv":  _init_conv(ks[0], CONV_OC, IMG_C, CONV_K, CONV_K),
        "img_fc":    _init_linear(ks[1], CONV_OC * IMG_OHW ** 2, HIDDEN),
        "fimg_conv": _init_conv(ks[2], CONV_OC, FIMG_C, CONV_K, CONV_K),
        "fimg_fc":   _init_linear(ks[3], CONV_OC * FIMG_OHW ** 2, HIDDEN),
        "inv_fc1":   _init_linear(ks[4], INV_DIM, HIDDEN),
        "inv_fc2":   _init_linear(ks[5], HIDDEN, HIDDEN),
        "final_fc1": _init_linear(ks[6], 3 * HIDDEN, 64),
        "final_fc2": _init_linear(ks[7], 64, ACTION_DIM),
    }


# ------------------------- pure-JAX reference (original semantics) -----------
def _im2col(x_nchw, kh, kw):
    B, C, H, W = x_nchw.shape
    oh, ow = H - kh + 1, W - kw + 1
    cols = []
    for i in range(kh):
        for j in range(kw):
            cols.append(x_nchw[:, :, i:i + oh, j:j + ow])       # (B,C,OH,OW)
    p = jnp.stack(cols, axis=2)                                 # (B,C,KH*KW,OH,OW)
    p = p.transpose(0, 3, 4, 1, 2).reshape(B * oh * ow, C * kh * kw)
    return p, oh, ow


def _ref_linear(x, w, b, activation=None):
    y = x @ w + b.reshape(1, -1)
    if activation == "relu":
        y = jnp.maximum(y, 0.0)
    elif activation == "softmax":
        m = jnp.max(y, axis=-1, keepdims=True)
        e = jnp.exp(y - m)
        y = e / jnp.sum(e, axis=-1, keepdims=True)
    return y


def _ref_conv_relu(x_nchw, w_oihw, b):
    OC, C, KH, KW = w_oihw.shape
    B = x_nchw.shape[0]
    patches, oh, ow = _im2col(x_nchw, KH, KW)
    y = _ref_linear(patches, w_oihw.reshape(OC, -1).T, b, "relu")
    return y.reshape(B, oh, ow, OC).transpose(0, 3, 1, 2)


def reference_forward(params, obs):
    if obs.ndim < 2:
        obs = obs[None, :]
    B = obs.shape[0]
    splits, c = [], 0
    for s in SIZES:
        splits.append(obs[:, c:c + s])
        c += s
    img, full_img, health, pantry, shelf = splits
    w, b = params["img_conv"]
    x = _ref_conv_relu(img.reshape(B, IMG_C, IMG_HW, IMG_HW), w, b).reshape(B, -1)
    x_img = _ref_linear(x, *params["img_fc"], "relu")
    w, b = params["fimg_conv"]
    x = _ref_conv_relu(full_img.reshape(B, FIMG_C, FIMG_HW, FIMG_HW), w, b).reshape(B, -1)
    x_full_img = _ref_linear(x, *params["fimg_fc"], "relu")
    inv = jnp.concatenate([pantry, shelf, health], axis=1)
    h = _ref_linear(inv, *params["inv_fc1"], "relu")
    x_inventory = _ref_linear(h, *params["inv_fc2"], "relu")
    cat = jnp.concatenate([x_img, x_full_img, x_inventory], axis=1)
    h = _ref_linear(cat, *params["final_fc1"], "relu")
    return _ref_linear(h, *params["final_fc2"], "softmax")


# --------------------------------- main --------------------------------------
if __name__ == "__main__":
    key = jax.random.PRNGKey(0)
    pkey, okey = jax.random.split(key)
    params = init_params(pkey)
    fused_params = prepare_fused_params(params)   # one-time, outside the hot path

    batch = 2
    obs = jax.random.normal(okey, (batch, OBS_DIM), dtype=jnp.float32)

    fwd = jax.jit(food_network_forward)
    out = jax.block_until_ready(fwd(fused_params, obs))

    ref = reference_forward(params, obs)
    assert out.shape == (batch, ACTION_DIM)
    assert jnp.allclose(jnp.sum(out, axis=-1), 1.0, atol=1e-5)
    assert jnp.allclose(out, ref, atol=1e-5, rtol=1e-4), (out, ref)

    print("KERNEL_OK")
</pallas_src>

<mosaic_0001>
module attributes {stable_mosaic.version = 11 : i64} {
  func.func @_fused_forward_kernel(%arg0: memref<2x977xf32, #tpu.memory_space<vmem>>, %arg1: memref<192x288xf32, #tpu.memory_space<vmem>>, %arg2: memref<1x288xf32, #tpu.memory_space<vmem>>, %arg3: memref<288x32xf32, #tpu.memory_space<vmem>>, %arg4: memref<1x32xf32, #tpu.memory_space<vmem>>, %arg5: memref<768x1568xf32, #tpu.memory_space<vmem>>, %arg6: memref<1x1568xf32, #tpu.memory_space<vmem>>, %arg7: memref<1568x32xf32, #tpu.memory_space<vmem>>, %arg8: memref<1x32xf32, #tpu.memory_space<vmem>>, %arg9: memref<24x32xf32, #tpu.memory_space<vmem>>, %arg10: memref<1x32xf32, #tpu.memory_space<vmem>>, %arg11: memref<32x32xf32, #tpu.memory_space<vmem>>, %arg12: memref<1x32xf32, #tpu.memory_space<vmem>>, %arg13: memref<32x64xf32, #tpu.memory_space<vmem>>, %arg14: memref<32x64xf32, #tpu.memory_space<vmem>>, %arg15: memref<32x64xf32, #tpu.memory_space<vmem>>, %arg16: memref<1x64xf32, #tpu.memory_space<vmem>>, %arg17: memref<64x5xf32, #tpu.memory_space<vmem>>, %arg18: memref<1x5xf32, #tpu.memory_space<vmem>>, %arg19: memref<2x5xf32, #tpu.memory_space<vmem>>) attributes {dimension_semantics = [], scalar_prefetch = 0 : i64, scratch_operands = 0 : i64, tpu.core_type = #tpu.core_type<tc>} {
    %c0 = arith.constant 0 : index
    %c0_0 = arith.constant 0 : index
    %0 = vector.load %arg0[%c0, %c0_0] : memref<2x977xf32, #tpu.memory_space<vmem>>, vector<2x977xf32>
    %1 = vector.extract_strided_slice %0 {offsets = [0, 0], sizes = [2, 192], strides = [1, 1]} : vector<2x977xf32> to vector<2x192xf32>
    %c0_1 = arith.constant 0 : index
    %c0_2 = arith.constant 0 : index
    %2 = vector.load %arg1[%c0_1, %c0_2] : memref<192x288xf32, #tpu.memory_space<vmem>>, vector<192x288xf32>
    %cst = arith.constant dense<0.000000e+00> : vector<2x288xf32>
    %3 = tpu.matmul %1, %2, %cst {dimension_numbers = #tpu.dot_dimension_numbers<[1], [0], [0], [1], [0, 0, 1, 1], [], []>} : vector<2x192xf32>, vector<192x288xf32>, vector<2x288xf32> -> vector<2x288xf32>
    %c0_3 = arith.constant 0 : index
    %c0_4 = arith.constant 0 : index
    %4 = vector.load %arg2[%c0_3, %c0_4] : memref<1x288xf32, #tpu.memory_space<vmem>>, vector<1x288xf32>
    %5 = vector.broadcast %4 : vector<1x288xf32> to vector<2x288xf32>
    %6 = arith.addf %3, %5 : vector<2x288xf32>
    %cst_5 = arith.constant 0.000000e+00 : f32
    %7 = vector.broadcast %cst_5 : f32 to vector<2x288xf32>
    %8 = arith.maximumf %6, %7 : vector<2x288xf32>
    %c0_6 = arith.constant 0 : index
    %c0_7 = arith.constant 0 : index
    %9 = vector.load %arg3[%c0_6, %c0_7] : memref<288x32xf32, #tpu.memory_space<vmem>>, vector<288x32xf32>
    %cst_8 = arith.constant dense<0.000000e+00> : vector<2x32xf32>
    %10 = tpu.matmul %8, %9, %cst_8 {dimension_numbers = #tpu.dot_dimension_numbers<[1], [0], [0], [1], [0, 0, 1, 1], [], []>} : vector<2x288xf32>, vector<288x32xf32>, vector<2x32xf32> -> vector<2x32xf32>
    %c0_9 = arith.constant 0 : index
    %c0_10 = arith.constant 0 : index
    %11 = vector.load %arg4[%c0_9, %c0_10] : memref<1x32xf32, #tpu.memory_space<vmem>>, vector<1x32xf32>
    %12 = vector.broadcast %11 : vector<1x32xf32> to vector<2x32xf32>
    %13 = arith.addf %10, %12 : vector<2x32xf32>
    %cst_11 = arith.constant 0.000000e+00 : f32
    %14 = vector.broadcast %cst_11 : f32 to vector<2x32xf32>
    %15 = arith.maximumf %13, %14 : vector<2x32xf32>
    %16 = vector.extract_strided_slice %0 {offsets = [0, 192], sizes = [2, 768], strides = [1, 1]} : vector<2x977xf32> to vector<2x768xf32>
    %c0_12 = arith.constant 0 : index
    %c0_13 = arith.constant 0 : index
    %17 = vector.load %arg5[%c0_12, %c0_13] : memref<768x1568xf32, #tpu.memory_space<vmem>>, vector<768x1568xf32>
    %cst_14 = arith.constant dense<0.000000e+00> : vector<2x1568xf32>
    %18 = tpu.matmul %16, %17, %cst_14 {dimension_numbers = #tpu.dot_dimension_numbers<[1], [0], [0], [1], [0, 0, 1, 1], [], []>} : vector<2x768xf32>, vector<768x1568xf32>, vector<2x1568xf32> -> vector<2x1568xf32>
    %c0_15 = arith.constant 0 : index
    %c0_16 = arith.constant 0 : index
    %19 = vector.load %arg6[%c0_15, %c0_16] : memref<1x1568xf32, #tpu.memory_space<vmem>>, vector<1x1568xf32>
    %20 = vector.broadcast %19 : vector<1x1568xf32> to vector<2x1568xf32>
    %21 = arith.addf %18, %20 : vector<2x1568xf32>
    %cst_17 = arith.constant 0.000000e+00 : f32
    %22 = vector.broadcast %cst_17 : f32 to vector<2x1568xf32>
    %23 = arith.maximumf %21, %22 : vector<2x1568xf32>
    %c0_18 = arith.constant 0 : index
    %c0_19 = arith.constant 0 : index
    %24 = vector.load %arg7[%c0_18, %c0_19] : memref<1568x32xf32, #tpu.memory_space<vmem>>, vector<1568x32xf32>
    %cst_20 = arith.constant dense<0.000000e+00> : vector<2x32xf32>
    %25 = tpu.matmul %23, %24, %cst_20 {dimension_numbers = #tpu.dot_dimension_numbers<[1], [0], [0], [1], [0, 0, 1, 1], [], []>} : vector<2x1568xf32>, vector<1568x32xf32>, vector<2x32xf32> -> vector<2x32xf32>
    %c0_21 = arith.constant 0 : index
    %c0_22 = arith.constant 0 : index
    %26 = vector.load %arg8[%c0_21, %c0_22] : memref<1x32xf32, #tpu.memory_space<vmem>>, vector<1x32xf32>
    %27 = vector.broadcast %26 : vector<1x32xf32> to vector<2x32xf32>
    %28 = arith.addf %25, %27 : vector<2x32xf32>
    %cst_23 = arith.constant 0.000000e+00 : f32
    %29 = vector.broadcast %cst_23 : f32 to vector<2x32xf32>
    %30 = arith.maximumf %28, %29 : vector<2x32xf32>
    %31 = vector.extract_strided_slice %0 {offsets = [0, 953], sizes = [2, 24], strides = [1, 1]} : vector<2x977xf32> to vector<2x24xf32>
    %c0_24 = arith.constant 0 : index
    %c0_25 = arith.constant 0 : index
    %32 = vector.load %arg9[%c0_24, %c0_25] : memref<24x32xf32, #tpu.memory_space<vmem>>, vector<24x32xf32>
    %cst_26 = arith.constant dense<0.000000e+00> : vector<2x32xf32>
    %33 = tpu.matmul %31, %32, %cst_26 {dimension_numbers = #tpu.dot_dimension_numbers<[1], [0], [0], [1], [0, 0, 1, 1], [], []>} : vector<2x24xf32>, vector<24x32xf32>, vector<2x32xf32> -> vector<2x32xf32>
    %c0_27 = arith.constant 0 : index
    %c0_28 = arith.constant 0 : index
    %34 = vector.load %arg10[%c0_27, %c0_28] : memref<1x32xf32, #tpu.memory_space<vmem>>, vector<1x32xf32>
    %35 = vector.broadcast %34 : vector<1x32xf32> to vector<2x32xf32>
    %36 = arith.addf %33, %35 : vector<2x32xf32>
    %cst_29 = arith.constant 0.000000e+00 : f32
    %37 = vector.broadcast %cst_29 : f32 to vector<2x32xf32>
    %38 = arith.maximumf %36, %37 : vector<2x32xf32>
    %c0_30 = arith.constant 0 : index
    %c0_31 = arith.constant 0 : index
    %39 = vector.load %arg11[%c0_30, %c0_31] : memref<32x32xf32, #tpu.memory_space<vmem>>, vector<32x32xf32>
    %cst_32 = arith.constant dense<0.000000e+00> : vector<2x32xf32>
    %40 = tpu.matmul %38, %39, %cst_32 {dimension_numbers = #tpu.dot_dimension_numbers<[1], [0], [0], [1], [0, 0, 1, 1], [], []>} : vector<2x32xf32>, vector<32x32xf32>, vector<2x32xf32> -> vector<2x32xf32>
    %c0_33 = arith.constant 0 : index
    %c0_34 = arith.constant 0 : index
    %41 = vector.load %arg12[%c0_33, %c0_34] : memref<1x32xf32, #tpu.memory_space<vmem>>, vector<1x32xf32>
    %42 = vector.broadcast %41 : vector<1x32xf32> to vector<2x32xf32>
    %43 = arith.addf %40, %42 : vector<2x32xf32>
    %cst_35 = arith.constant 0.000000e+00 : f32
    %44 = vector.broadcast %cst_35 : f32 to vector<2x32xf32>
    %45 = arith.maximumf %43, %44 : vector<2x32xf32>
    %c0_36 = arith.constant 0 : index
    %c0_37 = arith.constant 0 : index
    %46 = vector.load %arg13[%c0_36, %c0_37] : memref<32x64xf32, #tpu.memory_space<vmem>>, vector<32x64xf32>
    %cst_38 = arith.constant dense<0.000000e+00> : vector<2x64xf32>
    %47 = tpu.matmul %15, %46, %cst_38 {dimension_numbers = #tpu.dot_dimension_numbers<[1], [0], [0], [1], [0, 0, 1, 1], [], []>} : vector<2x32xf32>, vector<32x64xf32>, vector<2x64xf32> -> vector<2x64xf32>
    %c0_39 = arith.constant 0 : index
    %c0_40 = arith.constant 0 : index
    %48 = vector.load %arg14[%c0_39, %c0_40] : memref<32x64xf32, #tpu.memory_space<vmem>>, vector<32x64xf32>
    %cst_41 = arith.constant dense<0.000000e+00> : vector<2x64xf32>
    %49 = tpu.matmul %30, %48, %cst_41 {dimension_numbers = #tpu.dot_dimension_numbers<[1], [0], [0], [1], [0, 0, 1, 1], [], []>} : vector<2x32xf32>, vector<32x64xf32>, vector<2x64xf32> -> vector<2x64xf32>
    %50 = arith.addf %47, %49 : vector<2x64xf32>
    %c0_42 = arith.constant 0 : index
    %c0_43 = arith.constant 0 : index
    %51 = vector.load %arg15[%c0_42, %c0_43] : memref<32x64xf32, #tpu.memory_space<vmem>>, vector<32x64xf32>
    %cst_44 = arith.constant dense<0.000000e+00> : vector<2x64xf32>
    %52 = tpu.matmul %45, %51, %cst_44 {dimension_numbers = #tpu.dot_dimension_numbers<[1], [0], [0], [1], [0, 0, 1, 1], [], []>} : vector<2x32xf32>, vector<32x64xf32>, vector<2x64xf32> -> vector<2x64xf32>
    %53 = arith.addf %50, %52 : vector<2x64xf32>
    %c0_45 = arith.constant 0 : index
    %c0_46 = arith.constant 0 : index
    %54 = vector.load %arg16[%c0_45, %c0_46] : memref<1x64xf32, #tpu.memory_space<vmem>>, vector<1x64xf32>
    %55 = vector.broadcast %54 : vector<1x64xf32> to vector<2x64xf32>
    %56 = arith.addf %53, %55 : vector<2x64xf32>
    %cst_47 = arith.constant 0.000000e+00 : f32
    %57 = vector.broadcast %cst_47 : f32 to vector<2x64xf32>
    %58 = arith.maximumf %56, %57 : vector<2x64xf32>
    %c0_48 = arith.constant 0 : index
    %c0_49 = arith.constant 0 : index
    %59 = vector.load %arg17[%c0_48, %c0_49] : memref<64x5xf32, #tpu.memory_space<vmem>>, vector<64x5xf32>
    %cst_50 = arith.constant dense<0.000000e+00> : vector<2x5xf32>
    %60 = tpu.matmul %58, %59, %cst_50 {dimension_numbers = #tpu.dot_dimension_numbers<[1], [0], [0], [1], [0, 0, 1, 1], [], []>} : vector<2x64xf32>, vector<64x5xf32>, vector<2x5xf32> -> vector<2x5xf32>
    %c0_51 = arith.constant 0 : index
    %c0_52 = arith.constant 0 : index
    %61 = vector.load %arg18[%c0_51, %c0_52] : memref<1x5xf32, #tpu.memory_space<vmem>>, vector<1x5xf32>
    %62 = vector.broadcast %61 : vector<1x5xf32> to vector<2x5xf32>
    %63 = arith.addf %60, %62 : vector<2x5xf32>
    %cst_53 = arith.constant dense<0xFF800000> : vector<2xf32>
    %64 = vector.multi_reduction <maximumf>, %63, %cst_53 [1] : vector<2x5xf32> to vector<2xf32>
    %65 = vector.shape_cast %64 : vector<2xf32> to vector<2x1xf32>
    %66 = vector.broadcast %65 : vector<2x1xf32> to vector<2x5xf32>
    %67 = arith.subf %63, %66 : vector<2x5xf32>
    %68 = math.exp %67 : vector<2x5xf32>
    %cst_54 = arith.constant dense<0.000000e+00> : vector<2xf32>
    %69 = vector.multi_reduction <add>, %68, %cst_54 [1] : vector<2x5xf32> to vector<2xf32>
    %70 = vector.shape_cast %69 : vector<2xf32> to vector<2x1xf32>
    %71 = vector.broadcast %70 : vector<2x1xf32> to vector<2x5xf32>
    %72 = arith.divf %68, %71 : vector<2x5xf32>
    %c0_55 = arith.constant 0 : index
    %c0_56 = arith.constant 0 : index
    %73 = vector.load %arg19[%c0_55, %c0_56] : memref<2x5xf32, #tpu.memory_space<vmem>>, vector<2x5xf32>
    tpu.vector_store %arg19[%c0_55, %c0_56], %72 {strides = array<i32>} : memref<2x5xf32, #tpu.memory_space<vmem>>, vector<2x5xf32>,
    return
  }
}

</mosaic_0001>

<bundles_post_ra>
// kernel: food_network_forward.1
= control target key start
LH: loop header
LB: loop body
LE: loop exit
PB: predicated region body
PF: predicated region fallthrough
CT: control target
= control target key end

     0   :  { %s10314_s0 = inlined_call_operand.vmem [shape: f32[2,977], index: 0, kind: input, shape index: {}]   ;;  %s10315_s1 = inlined_call_operand.vmem [shape: f32[192,288], index: 1, kind: input, shape index: {}]   ;;  %s10316_s2 = inlined_call_operand.vmem [shape: f32[1,288], index: 2, kind: input, shape index: {}]   ;;  %s10317_s3 = inlined_call_operand.vmem [shape: f32[288,32], index: 3, kind: input, shape index: {}]   ;;  %s10318_s4 = inlined_call_operand.vmem [shape: f32[1,32], index: 4, kind: input, shape index: {}]   ;;  %s10319_s5 = inlined_call_operand.vmem [shape: f32[768,1568], index: 5, kind: input, shape index: {}]   ;;  %s10320_s6 = inlined_call_operand.vmem [shape: f32[1,1568], index: 6, kind: input, shape index: {}]   ;;  %s10321_s7 = inlined_call_operand.vmem [shape: f32[1568,32], index: 7, kind: input, shape index: {}]   ;;  %s10322_s8 = inlined_call_operand.vmem [shape: f32[1,32], index: 8, kind: input, shape index: {}]   ;;  %s10323_s9 = inlined_call_operand.vmem [shape: f32[24,32], index: 9, kind: input, shape index: {}]   ;;  %s10324_s10 = inlined_call_operand.vmem [shape: f32[1,32], index: 10, kind: input, shape index: {}]   ;;  %s10325_s11 = inlined_call_operand.vmem [shape: f32[32,32], index: 11, kind: input, shape index: {}]   ;;  %s10326_s12 = inlined_call_operand.vmem [shape: f32[1,32], index: 12, kind: input, shape index: {}]   ;;  %s10327_s13 = inlined_call_operand.vmem [shape: f32[32,64], index: 13, kind: input, shape index: {}]   ;;  %s10328_s14 = inlined_call_operand.vmem [shape: f32[32,64], index: 14, kind: input, shape index: {}]   ;;  %s10329_s15 = inlined_call_operand.vmem [shape: f32[32,64], index: 15, kind: input, shape index: {}]   ;;  %s10330_s16 = inlined_call_operand.vmem [shape: f32[1,64], index: 16, kind: input, shape index: {}]   ;;  %s10331_s17 = inlined_call_operand.vmem [shape: f32[64,5], index: 17, kind: input, shape index: {}]   ;;  %s10332_s18 = inlined_call_operand.vmem [shape: f32[1,5], index: 18, kind: input, shape index: {}]   ;;  %s10333_s19 = inlined_call_operand.hbm [shape: f32[2,5], index: 19, kind: output, shape index: {}]  }
   0x1   :  { %10337 = sst [smem:[#allocation5_spill]] %s10314_s0 }
   0x2   :  { %10338 = sst [smem:[#allocation6_spill]] %s10315_s1 }
   0x3   :  { %10339 = sst [smem:[#allocation7_spill]] %s10316_s2 }
   0x4   :  { %10340 = sst [smem:[#allocation8_spill]] %s10317_s3 }
   0x5   :  { %s10341_s20 = sld [smem:[#allocation6_spill]]  ;;  %v139_v3 = vlaneseq  ;;  %v5147_v5 = vmov 0.0   ;;  %v5148_v6 = vmov 1983009808   ;;  %s5149_s23 = smov 64   ;;  %vm164_vm0 = vcmask 523264  }
   0x6   :  { %238 = vmatprep.subr.mxu1 %v5147_v5  ;;  %v156_v7 = vunpack.c.l.s4 %v5148_v6  ;;  %s10342_s25 = sld [smem:[#allocation5_spill]] }
   0x7   :  { %v5269_v9 = vshrl.u32 %v139_v3, 7 }
   0x8   :  { %v157_v12 = vunpack.c.0.s8 %v156_v7 }
   0xa   :  { %v5291_v17 = vsub.s32 %v157_v12, %v5269_v9 }
   0xb   :  { %v111_v0 = vld [vmem:[%s10341_s20 + $0x170] sm:$0xff]  ;;  %v110_v1 = vld [vmem:[%s10341_s20 + $0x168] sm:$0xff]  ;;  %v108_v2 = vld [vmem:[%s10341_s20 + $0x158] sm:$0xff] }
   0xc   :  { %167 = vmatprep.subr.mxu0 %v111_v0  ;;  %v107_v4 = vld [vmem:[%s10341_s20 + $0x150] sm:$0xff]  ;;  %v105_v8 = vld [vmem:[%s10341_s20 + $0x140] sm:$0xff]  ;;  %v104_v10 = vld [vmem:[%s10341_s20 + $0x138] sm:$0xff] }
   0xd   :  { %168 = vmatpush1.msra.mxu0 %v110_v1  ;;  %v112_v11 = vld [vmem:[%s10341_s20 + $0x178] sm:$0xff]  ;;  %v102_v13 = vld [vmem:[%s10341_s20 + $0x128] sm:$0xff]  ;;  %v109_v14 = vld [vmem:[%s10341_s20 + $0x160] sm:$0xff] }
   0xe   :  { %169 = vmatprep.subr.mxu0 %v108_v2  ;;  %239 = vmatpush1.msra.mxu1 %v112_v11  ;;  %v101_v15 = vld [vmem:[%s10341_s20 + $0x120] sm:$0xff]  ;;  %v99_v18 = vld [vmem:[%s10341_s20 + $0x110] sm:$0xff]  ;;  %v106_v20 = vld [vmem:[%s10341_s20 + $0x148] sm:$0xff] }
   0xf   :  { %170 = vmatpush1.msra.mxu0 %v107_v4  ;;  %240 = vmatprep.subr.mxu1 %v5147_v5  ;;  %v63_v16 = vld [vmem:[%s10342_s25] sm:$0xff]  ;;  %v98_v21 = vld [vmem:[%s10341_s20 + $0x108] sm:$0xff]  ;;  %v103_v22 = vld [vmem:[%s10341_s20 + $0x130] sm:$0xff] }
  0x10   :  { %171 = vmatprep.subr.mxu0 %v105_v8  ;;  %241 = vmatpush1.msra.mxu1 %v109_v14  ;;  %v1817_v19 = vcombine.high %v63_v16, %v63_v16  ;;  %v96_v23 = vld [vmem:[%s10341_s20 + $0xf8] sm:$0xff]  ;;  %v95_v25 = vld [vmem:[%s10341_s20 + $0xf0] sm:$0xff]  ;;  %v93_v27 = vld [vmem:[%s10341_s20 + $0xe0] sm:$0xff]  ;;  %v5321_v29 = vrot.slane %v63_v16, %v5291_v17 }
  0x11   :  { %172 = vmatpush1.msra.mxu0 %v104_v10  ;;  %242 = vmatprep.subr.mxu1 %v5147_v5  ;;  %v100_v26 = vld [vmem:[%s10341_s20 + $0x118] sm:$0xff]  ;;  %v90_v32 = vld [vmem:[%s10341_s20 + $0xc8] sm:$0xff]  ;;  %v97_v33 = vld [vmem:[%s10341_s20 + $0x100] sm:$0xff] }
  0x12   :  { %173 = vmatprep.subr.mxu0 %v102_v13  ;;  %v1824_v24 = vrot.slane %v1817_v19, %v5291_v17  ;;  %243 = vmatpush1.msra.mxu1 %v106_v20  ;;  %v92_v30 = vld [vmem:[%s10341_s20 + $0xd8] sm:$0xff]  ;;  %v89_v34 = vld [vmem:[%s10341_s20 + $0xc0] sm:$0xff]  ;;  %v87_v35 = vld [vmem:[%s10341_s20 + $0xb0] sm:$0xff]  ;;  %v5343_v36 = vcombine.high %v5321_v29, %v5321_v29 }
  0x13   :  { %174 = vmatpush1.msra.mxu0 %v101_v15  ;;  %244 = vmatprep.subr.mxu1 %v5147_v5  ;;  %v94_v37 = vld [vmem:[%s10341_s20 + $0xe8] sm:$0xff]  ;;  %v84_v39 = vld [vmem:[%s10341_s20 + $0x98] sm:$0xff]  ;;  %v83_v40 = vld [vmem:[%s10341_s20 + $0x90] sm:$0xff] }
  0x14   :  { %175 = vmatprep.subr.mxu0 %v99_v18  ;;  %v1825_v28 = vcombine.high %v1824_v24, %v1824_v24  ;;  %245 = vmatpush1.msra.mxu1 %v103_v22  ;;  %v86_v38 = vld [vmem:[%s10341_s20 + $0xa8] sm:$0xff]  ;;  %v91_v41 = vld [vmem:[%s10341_s20 + $0xd0] sm:$0xff]  ;;  %v81_v42 = vld [vmem:[%s10341_s20 + $0x80] sm:$0xff] }
  0x15   :  { %176 = vmatpush1.msra.mxu0 %v98_v21  ;;  %246 = vmatprep.subr.mxu1 %v5147_v5  ;;  %v80_v43 = vld [vmem:[%s10341_s20 + $0x78] sm:$0xff]  ;;  %v78_v45 = vld [vmem:[%s10341_s20 + $0x68] sm:$0xff]  ;;  %v77_v46 = vld [vmem:[%s10341_s20 + $0x60] sm:$0xff] }
  0x16   :  { %177 = vmatprep.subr.mxu0 %v96_v23  ;;  %v5103_v31 = vpack.i.bf16 %v1825_v28, %v1824_v24  ;;  %247 = vmatpush1.msra.mxu1 %v100_v26  ;;  %v88_v44 = vld [vmem:[%s10341_s20 + $0xb8] sm:$0xff]  ;;  %v85_v47 = vld [vmem:[%s10341_s20 + $0xa0] sm:$0xff]  ;;  %v75_v48 = vld [vmem:[%s10341_s20 + $0x50] sm:$0xff] }
  0x17   :  { %178 = vmatpush1.msra.mxu0 %v95_v25  ;;  %248 = vmatprep.subr.mxu1 %v5147_v5  ;;  %v74_v49 = vld [vmem:[%s10341_s20 + $0x48] sm:$0xff]  ;;  %v72_v51 = vld [vmem:[%s10341_s20 + $0x38] sm:$0xff]  ;;  %v71_v52 = vld [vmem:[%s10341_s20 + $0x30] sm:$0xff] }
  0x18   :  { %179 = vmatprep.subr.mxu0 %v93_v27  ;;  %5104 = vrot.lane.b32.xlu0 %v5103_v31, %s5149_s23  ;;  %v82_v50 = vld [vmem:[%s10341_s20 + $0x88] sm:$0xff]  ;;  %v79_v53 = vld [vmem:[%s10341_s20 + $0x70] sm:$0xff]  ;;  %v69_v54 = vld [vmem:[%s10341_s20 + $0x20] sm:$0xff] }
  0x19   :  { %180 = vmatpush1.msra.mxu0 %v92_v30  ;;  %249 = vmatpush1.msra.mxu1 %v97_v33  ;;  %v68_v55 = vld [vmem:[%s10341_s20 + $0x18] sm:$0xff]  ;;  %v66_v57 = vld [vmem:[%s10341_s20 + $0x8] sm:$0xff]  ;;  %v65_v58 = vld [vmem:[%s10341_s20] sm:$0xff] }
  0x1a   :  { %181 = vmatprep.subr.mxu0 %v90_v32  ;;  %250 = vmatprep.subr.mxu1 %v5147_v5  ;;  %v76_v56 = vld [vmem:[%s10341_s20 + $0x58] sm:$0xff]  ;;  %v73_v59 = vld [vmem:[%s10341_s20 + $0x40] sm:$0xff]  ;;  %v135_v60 = vld [vmem:[%s10341_s20 + $0x230] sm:$0xff] }
  0x1b   :  { %182 = vmatpush1.msra.mxu0 %v89_v34  ;;  %251 = vmatpush1.msra.mxu1 %v94_v37  ;;  %v134_v61 = vld [vmem:[%s10341_s20 + $0x228] sm:$0xff]  ;;  %v132_v63 = vld [vmem:[%s10341_s20 + $0x218] sm:$0xff]  ;;  %v131_v0 = vld [vmem:[%s10341_s20 + $0x210] sm:$0xff] }
  0x1c   :  { %183 = vmatprep.subr.mxu0 %v87_v35  ;;  %1843 = vrot.lane.b32.xlu0 %v5343_v36, %s5149_s23  ;;  %v70_v62 = vld [vmem:[%s10341_s20 + $0x28] sm:$0xff]  ;;  %v67_v1 = vld [vmem:[%s10341_s20 + $0x10] sm:$0xff]  ;;  %v129_v2 = vld [vmem:[%s10341_s20 + $0x200] sm:$0xff] }
  0x1d   :  { %184 = vmatpush1.msra.mxu0 %v86_v38  ;;  %252 = vmatprep.subr.mxu1 %v5147_v5  ;;  %v128_v3 = vld [vmem:[%s10341_s20 + $0x1f8] sm:$0xff]  ;;  %v126_v6 = vld [vmem:[%s10341_s20 + $0x1e8] sm:$0xff]  ;;  %v125_v8 = vld [vmem:[%s10341_s20 + $0x1e0] sm:$0xff] }
  0x1e   :  { %185 = vmatprep.subr.mxu0 %v84_v39  ;;  %253 = vmatpush1.msra.mxu1 %v91_v41  ;;  %v136_v4 = vld [vmem:[%s10341_s20 + $0x238] sm:$0xff]  ;;  %v64_v7 = vld [vmem:[%s10342_s25 + $0x8] sm:$0xff]  ;;  %v133_v10 = vld [vmem:[%s10341_s20 + $0x220] sm:$0xff] }
  0x1f   :  { %186 = vmatpush1.msra.mxu0 %v83_v40  ;;  %254 = vmatprep.subr.mxu1 %v5147_v5  ;;  %v123_v11 = vld [vmem:[%s10341_s20 + $0x1d0] sm:$0xff]  ;;  %v122_v12 = vld [vmem:[%s10341_s20 + $0x1c8] sm:$0xff]  ;;  %v1833_v14 = vrot.slane %v64_v7, %v5291_v17  ;;  %v1826_v15 = vcombine.high %v64_v7, %v64_v7  ;;  %v120_v16 = vld [vmem:[%s10341_s20 + $0x1b8] sm:$0xff] }
  0x20   :  { %187 = vmatprep.subr.mxu0 %v81_v42  ;;  %255 = vmatpush1.msra.mxu1 %v88_v44  ;;  %v130_v13 = vld [vmem:[%s10341_s20 + $0x208] sm:$0xff]  ;;  %v119_v18 = vld [vmem:[%s10341_s20 + $0x1b0] sm:$0xff]  ;;  %v117_v19 = vld [vmem:[%s10341_s20 + $0x1a0] sm:$0xff] }
  0x21   :  { %188 = vmatpush1.msra.mxu0 %v80_v43  ;;  %256 = vmatprep.subr.mxu1 %v5147_v5  ;;  %v127_v20 = vld [vmem:[%s10341_s20 + $0x1f0] sm:$0xff]  ;;  %v116_v21 = vld [vmem:[%s10341_s20 + $0x198] sm:$0xff]  ;;  %v1841_v22 = vcombine.high %v1833_v14, %v1833_v14  ;;  %v1840_v23 = vrot.slane %v1826_v15, %v5291_v17  ;;  %v114_v24 = vld [vmem:[%s10341_s20 + $0x188] sm:$0xff] }
  0x22   :  { %189 = vmatprep.subr.mxu0 %v78_v45  ;;  %257 = vmatpush1.msra.mxu1 %v85_v47  ;;  %v124_v25 = vld [vmem:[%s10341_s20 + $0x1d8] sm:$0xff]  ;;  %v113_v26 = vld [vmem:[%s10341_s20 + $0x180] sm:$0xff]  ;;  %v118_v30 = vld [vmem:[%s10341_s20 + $0x1a8] sm:$0xff] }
  0x23   :  { %190 = vmatpush1.msra.mxu0 %v77_v46  ;;  %258 = vmatprep.subr.mxu1 %v5147_v5  ;;  %v121_v17 = vld [vmem:[%s10341_s20 + $0x1c0] sm:$0xff]  ;;  %v5108_v27 = vpack.i.bf16 %v1841_v22, %v1833_v14  ;;  %v5510_v28 = vcombine.high %v1840_v23, %v1840_v23  ;;  %v115_v31 = vld [vmem:[%s10341_s20 + $0x190] sm:$0xff]  ;;  %v694_v34 = vld [vmem:[%s10319_s5 + $0x618] sm:$0xff] }
  0x24   :  { %191 = vmatprep.subr.mxu0 %v75_v48  ;;  %259 = vmatpush1.msra.mxu1 %v82_v50  ;;  %v695_v32 = vld [vmem:[%s10319_s5 + $0x620] sm:$0xff]  ;;  %v682_v35 = vld [vmem:[%s10319_s5 + $0x5b8] sm:$0xff]  ;;  %v669_v37 = vld [vmem:[%s10319_s5 + $0x550] sm:$0xff] }
  0x25   :  { %192 = vmatpush1.msra.mxu0 %v74_v49  ;;  %260 = vmatprep.subr.mxu1 %v5147_v5  ;;  %v5113_v33 = vpack.i.bf16 %v5510_v28, %v1840_v23  ;;  %v668_v38 = vld [vmem:[%s10319_s5 + $0x548] sm:$0xff]  ;;  %v655_v39 = vld [vmem:[%s10319_s5 + $0x4e0] sm:$0xff]  ;;  %v642_v41 = vld [vmem:[%s10319_s5 + $0x478] sm:$0xff] }
  0x26   :  { %193 = vmatprep.subr.mxu0 %v72_v51  ;;  %261 = vmatpush1.msra.mxu1 %v79_v53  ;;  %v643_v40 = vld [vmem:[%s10319_s5 + $0x480] sm:$0xff]  ;;  %v630_v42 = vld [vmem:[%s10319_s5 + $0x418] sm:$0xff]  ;;  %v629_v43 = vld [vmem:[%s10319_s5 + $0x410] sm:$0xff] }
  0x27   :  { %194 = vmatpush1.msra.mxu0 %v71_v52  ;;  %262 = vmatprep.subr.mxu1 %v5147_v5  ;;  %v617_v44 = vld [vmem:[%s10319_s5 + $0x3b0] sm:$0xff]  ;;  %v616_v45 = vld [vmem:[%s10319_s5 + $0x3a8] sm:$0xff]  ;;  %v603_v47 = vld [vmem:[%s10319_s5 + $0x340] sm:$0xff] }
  0x28   :  { %195 = vmatprep.subr.mxu0 %v69_v54  ;;  %263 = vmatpush1.msra.mxu1 %v76_v56  ;;  %v604_v46 = vld [vmem:[%s10319_s5 + $0x348] sm:$0xff] }
  0x29   :  { %196 = vmatpush1.msra.mxu0 %v68_v55  ;;  %264 = vmatprep.subr.mxu1 %v5147_v5 }
  0x2a   :  { %197 = vmatprep.subr.mxu0 %v66_v57  ;;  %265 = vmatpush1.msra.mxu1 %v73_v59 }
  0x2b   :  { %198 = vmatpush1.msra.mxu0 %v65_v58  ;;  %266 = vmatprep.subr.mxu1 %v5147_v5 }
  0x2c   :  { %215 = vmatprep.subr.mxu0 %v135_v60  ;;  %267 = vmatpush1.msra.mxu1 %v70_v62 }
  0x2d   :  { %216 = vmatpush2.msra.mxu0 %v134_v61  ;;  %268 = vmatprep.subr.mxu1 %v5147_v5 }
  0x2e   :  { %217 = vmatprep.subr.mxu0 %v132_v63  ;;  %269 = vmatpush1.msra.mxu1 %v67_v1 }
  0x2f   :  { %218 = vmatpush2.msra.mxu0 %v131_v0  ;;  %286 = vmatprep.subr.mxu1 %v5147_v5 }
  0x30   :  { %219 = vmatprep.subr.mxu0 %v129_v2  ;;  %287 = vmatpush2.msra.mxu1 %v136_v4 }
  0x31   :  { %220 = vmatpush2.msra.mxu0 %v128_v3  ;;  %288 = vmatprep.subr.mxu1 %v5147_v5 }
  0x32   :  { %221 = vmatprep.subr.mxu0 %v126_v6  ;;  %289 = vmatpush2.msra.mxu1 %v133_v10 }
  0x33   :  { %222 = vmatpush2.msra.mxu0 %v125_v8  ;;  %290 = vmatprep.subr.mxu1 %v5147_v5 }
  0x34   :  { %223 = vmatprep.subr.mxu0 %v123_v11  ;;  %291 = vmatpush2.msra.mxu1 %v130_v13 }
  0x35   :  { %224 = vmatpush2.msra.mxu0 %v122_v12  ;;  %4594 = vmatprep.mubr.msk.f32.mxu0 %vm164_vm0, %v5343_v36 }
  0x36   :  { %225 = vmatprep.subr.mxu0 %v120_v16  ;;  %292 = vmatprep.subr.mxu1 %v5147_v5 }
  0x37   :  { %226 = vmatpush2.msra.mxu0 %v119_v18  ;;  %293 = vmatpush2.msra.mxu1 %v127_v20 }
  0x38   :  { %227 = vmatprep.subr.mxu0 %v117_v19  ;;  %294 = vmatprep.subr.mxu1 %v5147_v5 }
  0x39   :  { %228 = vmatpush2.msra.mxu0 %v116_v21  ;;  %295 = vmatpush2.msra.mxu1 %v124_v25 }
  0x3a   :  { %229 = vmatprep.subr.mxu0 %v114_v24  ;;  %296 = vmatprep.subr.mxu1 %v5147_v5 }
  0x3b   :  { %230 = vmatpush2.msra.mxu0 %v113_v26  ;;  %297 = vmatpush2.msra.mxu1 %v121_v17 }
  0x3c   :  { %232 = vmatmul.mubr.f32.vlgmr.msra.gmra.mxu0 %v5321_v29  ;;  %298 = vmatprep.subr.mxu1 %v5147_v5 }
  0x3d   :  { %4595 = vmatprep.mubr.msk.f32.mxu1 %vm164_vm0, %v5343_v36  ;;  %299 = vmatpush2.msra.mxu1 %v118_v30  ;;  %v681_v36 = vld [vmem:[%s10319_s5 + $0x5b0] sm:$0xff] }
  0x3e   :  { %5109 = vrot.lane.b32.xlu1 %v5108_v27, %s5149_s23  ;;  %300 = vmatprep.subr.mxu1 %v5147_v5 }
  0x3f   :  { %301 = vmatpush2.msra.mxu1 %v115_v31 }
  0x40   :  { %303 = vmatmul.mubr.f32.vlgmr.msra.gmra.mxu1 %v5321_v29  ;;  %1869 = vmatprep.subr.mxu1 %v695_v32  ;;  %v656_v29 = vld [vmem:[%s10319_s5 + $0x4e8] sm:$0xff] }
  0x41   :  { %1870 = vmatpush1.msra.mxu1 %v694_v34 }
  0x42   :  { %5114 = vrot.lane.b32.xlu1 %v5113_v33, %s5149_s23  ;;  %1871 = vmatprep.subr.mxu1 %v682_v35 }
  0x43   :  { %1872 = vmatpush1.msra.mxu1 %v681_v36 }
  0x44   :  { %1873 = vmatprep.subr.mxu1 %v669_v37 }
  0x45   :  { %1874 = vmatpush1.msra.mxu1 %v668_v38 }
  0x46   :  { %1875 = vmatprep.subr.mxu1 %v656_v29 }
  0x47   :  { %1876 = vmatpush1.msra.mxu1 %v655_v39 }
  0x48   :  { %1877 = vmatprep.subr.mxu1 %v643_v40 }
  0x49   :  { %1878 = vmatpush1.msra.mxu1 %v642_v41 }
  0x4a   :  { %1879 = vmatprep.subr.mxu1 %v630_v42 }
  0x4b   :  { %1880 = vmatpush1.msra.mxu1 %v629_v43 }
  0x4c   :  { %1881 = vmatprep.subr.mxu1 %v617_v44 }
  0x4d   :  { %24 = vsyncpa [#allocation3], 0  ;;  %1882 = vmatpush1.msra.mxu1 %v616_v45  ;;  %v591_v48 = vld [vmem:[%s10319_s5 + $0x2e0] sm:$0xff]  ;;  %v590_v49 = vld [vmem:[%s10319_s5 + $0x2d8] sm:$0xff]  ;;  %s10343_s30 = sld [smem:[#allocation8_spill]]  ;;  %vm354_vm1 = vcmask 261120  }
  0x4e   :  { %1883 = vmatprep.subr.mxu1 %v604_v46  ;;  %v578_v50 = vld [vmem:[%s10319_s5 + $0x278] sm:$0xff]  ;;  %v577_v51 = vld [vmem:[%s10319_s5 + $0x270] sm:$0xff]  ;;  %v564_v53 = vld [vmem:[%s10319_s5 + $0x208] sm:$0xff]  ;;  %s10344_s24 = sld [smem:[#allocation7_spill]]  ;;  %vm5150_vm2 = vmmov 0   ;;  %s5151_s28 = smov 71  }
  0x4f   :  { %1884 = vmatpush1.msra.mxu1 %v603_v47  ;;  %v565_v52 = vld [vmem:[%s10319_s5 + $0x210] sm:$0xff]  ;;  %v552_v54 = vld [vmem:[%s10319_s5 + $0x1a8] sm:$0xff]  ;;  %v551_v55 = vld [vmem:[%s10319_s5 + $0x1a0] sm:$0xff]  ;;  %4077 = vrot.lane.b32.xlu0 %v5510_v28, %s5151_s28  ;;  %vm4079_vm3 = vcmask 195584   ;;  %vm4567_vm4 = vcmask 33792  }
  0x50   :  { %1885 = vmatprep.subr.mxu1 %v591_v48  ;;  %v539_v56 = vld [vmem:[%s10319_s5 + $0x140] sm:$0xff]  ;;  %v538_v57 = vld [vmem:[%s10319_s5 + $0x138] sm:$0xff]  ;;  %v525_v59 = vld [vmem:[%s10319_s5 + $0xd0] sm:$0xff] }
  0x51   :  { %1886 = vmatpush1.msra.mxu1 %v590_v49  ;;  %v526_v58 = vld [vmem:[%s10319_s5 + $0xd8] sm:$0xff]  ;;  %v513_v60 = vld [vmem:[%s10319_s5 + $0x70] sm:$0xff]  ;;  %v512_v61 = vld [vmem:[%s10319_s5 + $0x68] sm:$0xff] }
  0x52   :  { %1887 = vmatprep.subr.mxu1 %v578_v50  ;;  %v500_v62 = vld [vmem:[%s10319_s5 + $0x8] sm:$0xff]  ;;  %v499_v63 = vld [vmem:[%s10319_s5] sm:$0xff]  ;;  %v902_v1 = vld [vmem:[%s10319_s5 + $0xc98] sm:$0xff] }
  0x53   :  { %1888 = vmatpush1.msra.mxu1 %v577_v51  ;;  %v903_v0 = vld [vmem:[%s10319_s5 + $0xca0] sm:$0xff]  ;;  %v890_v2 = vld [vmem:[%s10319_s5 + $0xc38] sm:$0xff]  ;;  %v889_v3 = vld [vmem:[%s10319_s5 + $0xc30] sm:$0xff] }
  0x54   :  { %1889 = vmatprep.subr.mxu1 %v565_v52  ;;  %v877_v4 = vld [vmem:[%s10319_s5 + $0xbd0] sm:$0xff]  ;;  %v876_v6 = vld [vmem:[%s10319_s5 + $0xbc8] sm:$0xff]  ;;  %v342_v8 = vld [vmem:[%s10343_s30 + $0xf8] sm:$0xff] }
  0x55   :  { %1890 = vmatpush1.msra.mxu1 %v564_v53  ;;  %v864_v7 = vld [vmem:[%s10319_s5 + $0xb68] sm:$0xff]  ;;  %v863_v10 = vld [vmem:[%s10319_s5 + $0xb60] sm:$0xff]  ;;  %4610 = vmatprep.subr.mxu0 %v342_v8  ;;  %v326_v11 = vld [vmem:[%s10343_s30 + $0x78] sm:$0xff] }
  0x56   :  { %1891 = vmatprep.subr.mxu1 %v552_v54  ;;  %v851_v12 = vld [vmem:[%s10319_s5 + $0xb00] sm:$0xff]  ;;  %4611 = vmatpush3.msra.mxu0 %v326_v11  ;;  %v341_v13 = vld [vmem:[%s10343_s30 + $0xf0] sm:$0xff]  ;;  %v850_v14 = vld [vmem:[%s10319_s5 + $0xaf8] sm:$0xff] }
  0x57   :  { %1892 = vmatpush1.msra.mxu1 %v551_v55  ;;  %4612 = vmatprep.subr.mxu0 %v341_v13  ;;  %v325_v15 = vld [vmem:[%s10343_s30 + $0x70] sm:$0xff]  ;;  %v838_v16 = vld [vmem:[%s10319_s5 + $0xa98] sm:$0xff]  ;;  %v340_v18 = vld [vmem:[%s10343_s30 + $0xe8] sm:$0xff] }
  0x58   :  { %1893 = vmatprep.subr.mxu1 %v539_v56  ;;  %4613 = vmatpush3.msra.mxu0 %v325_v15  ;;  %v837_v19 = vld [vmem:[%s10319_s5 + $0xa90] sm:$0xff]  ;;  %v324_v20 = vld [vmem:[%s10343_s30 + $0x68] sm:$0xff]  ;;  %v339_v22 = vld [vmem:[%s10343_s30 + $0xe0] sm:$0xff] }
  0x59   :  { %1894 = vmatpush1.msra.mxu1 %v538_v57  ;;  %4614 = vmatprep.subr.mxu0 %v340_v18  ;;  %v825_v21 = vld [vmem:[%s10319_s5 + $0xa30] sm:$0xff]  ;;  %v824_v23 = vld [vmem:[%s10319_s5 + $0xa28] sm:$0xff]  ;;  %v323_v24 = vld [vmem:[%s10343_s30 + $0x60] sm:$0xff] }
  0x5a   :  { %1895 = vmatprep.subr.mxu1 %v526_v58  ;;  %4615 = vmatpush3.msra.mxu0 %v324_v20  ;;  %v812_v25 = vld [vmem:[%s10319_s5 + $0x9c8] sm:$0xff]  ;;  %v338_v26 = vld [vmem:[%s10343_s30 + $0xd8] sm:$0xff]  ;;  %v811_v17 = vld [vmem:[%s10319_s5 + $0x9c0] sm:$0xff] }
  0x5b   :  { %1896 = vmatpush1.msra.mxu1 %v525_v59  ;;  %4616 = vmatprep.subr.mxu0 %v339_v22  ;;  %v322_v27 = vld [vmem:[%s10343_s30 + $0x58] sm:$0xff]  ;;  %v799_v30 = vld [vmem:[%s10319_s5 + $0x960] sm:$0xff]  ;;  %v337_v31 = vld [vmem:[%s10343_s30 + $0xd0] sm:$0xff] }
  0x5c   :  { %1897 = vmatprep.subr.mxu1 %v513_v60  ;;  %4617 = vmatpush3.msra.mxu0 %v323_v24  ;;  %v798_v32 = vld [vmem:[%s10319_s5 + $0x958] sm:$0xff]  ;;  %v321_v33 = vld [vmem:[%s10343_s30 + $0x50] sm:$0xff]  ;;  %v336_v35 = vld [vmem:[%s10343_s30 + $0xc8] sm:$0xff] }
  0x5d   :  { %1898 = vmatpush1.msra.mxu1 %v512_v61  ;;  %4618 = vmatprep.subr.mxu0 %v338_v26  ;;  %v786_v34 = vld [vmem:[%s10319_s5 + $0x8f8] sm:$0xff]  ;;  %v785_v36 = vld [vmem:[%s10319_s5 + $0x8f0] sm:$0xff]  ;;  %v320_v37 = vld [vmem:[%s10343_s30 + $0x48] sm:$0xff] }
  0x5e   :  { %1899 = vmatprep.subr.mxu1 %v500_v62  ;;  %4619 = vmatpush3.msra.mxu0 %v322_v27  ;;  %v773_v38 = vld [vmem:[%s10319_s5 + $0x890] sm:$0xff]  ;;  %v335_v29 = vld [vmem:[%s10343_s30 + $0xc0] sm:$0xff]  ;;  %v772_v39 = vld [vmem:[%s10319_s5 + $0x888] sm:$0xff] }
  0x5f   :  { %1900 = vmatpush1.msra.mxu1 %v499_v63  ;;  %4620 = vmatprep.subr.mxu0 %v337_v31  ;;  %v319_v40 = vld [vmem:[%s10343_s30 + $0x40] sm:$0xff]  ;;  %v760_v41 = vld [vmem:[%s10319_s5 + $0x828] sm:$0xff]  ;;  %v334_v42 = vld [vmem:[%s10343_s30 + $0xb8] sm:$0xff] }
  0x60   :  { %1901 = vmatprep.subr.mxu1 %v903_v0  ;;  %4621 = vmatpush3.msra.mxu0 %v321_v33  ;;  %v759_v43 = vld [vmem:[%s10319_s5 + $0x820] sm:$0xff]  ;;  %v318_v44 = vld [vmem:[%s10343_s30 + $0x38] sm:$0xff]  ;;  %v333_v46 = vld [vmem:[%s10343_s30 + $0xb0] sm:$0xff] }
  0x61   :  { %1902 = vmatpush2.msra.mxu1 %v902_v1  ;;  %4622 = vmatprep.subr.mxu0 %v336_v35  ;;  %v747_v45 = vld [vmem:[%s10319_s5 + $0x7c0] sm:$0xff]  ;;  %v746_v47 = vld [vmem:[%s10319_s5 + $0x7b8] sm:$0xff]  ;;  %v317_v48 = vld [vmem:[%s10343_s30 + $0x30] sm:$0xff] }
  0x62   :  { %1903 = vmatprep.subr.mxu1 %v890_v2  ;;  %4623 = vmatpush3.msra.mxu0 %v320_v37  ;;  %v734_v49 = vld [vmem:[%s10319_s5 + $0x758] sm:$0xff]  ;;  %v332_v50 = vld [vmem:[%s10343_s30 + $0xa8] sm:$0xff]  ;;  %v733_v51 = vld [vmem:[%s10319_s5 + $0x750] sm:$0xff] }
  0x63   :  { %1904 = vmatpush2.msra.mxu1 %v889_v3  ;;  %4624 = vmatprep.subr.mxu0 %v335_v29  ;;  %v316_v52 = vld [vmem:[%s10343_s30 + $0x28] sm:$0xff]  ;;  %v721_v53 = vld [vmem:[%s10319_s5 + $0x6f0] sm:$0xff]  ;;  %v331_v54 = vld [vmem:[%s10343_s30 + $0xa0] sm:$0xff] }
  0x64   :  { %1905 = vmatprep.subr.mxu1 %v877_v4  ;;  %4625 = vmatpush3.msra.mxu0 %v319_v40  ;;  %v720_v55 = vld [vmem:[%s10319_s5 + $0x6e8] sm:$0xff]  ;;  %v315_v56 = vld [vmem:[%s10343_s30 + $0x20] sm:$0xff]  ;;  %v330_v58 = vld [vmem:[%s10343_s30 + $0x98] sm:$0xff] }
  0x65   :  { %1906 = vmatpush2.msra.mxu1 %v876_v6  ;;  %4626 = vmatprep.subr.mxu0 %v334_v42  ;;  %v708_v57 = vld [vmem:[%s10319_s5 + $0x688] sm:$0xff]  ;;  %v707_v59 = vld [vmem:[%s10319_s5 + $0x680] sm:$0xff]  ;;  %v314_v60 = vld [vmem:[%s10343_s30 + $0x18] sm:$0xff] }
  0x66   :  { %1907 = vmatprep.subr.mxu1 %v864_v7  ;;  %4627 = vmatpush3.msra.mxu0 %v318_v44  ;;  %v1527_v61 = vld [vmem:[%s10319_s5 + $0x2020] sm:$0xff]  ;;  %v329_v62 = vld [vmem:[%s10343_s30 + $0x90] sm:$0xff]  ;;  %v328_v0 = vld [vmem:[%s10343_s30 + $0x88] sm:$0xff] }
  0x67   :  { %1908 = vmatpush2.msra.mxu1 %v863_v10  ;;  %4628 = vmatprep.subr.mxu0 %v333_v46  ;;  %v313_v63 = vld [vmem:[%s10343_s30 + $0x10] sm:$0xff]  ;;  %v312_v1 = vld [vmem:[%s10343_s30 + $0x8] sm:$0xff]  ;;  %v327_v2 = vld [vmem:[%s10343_s30 + $0x80] sm:$0xff] }
  0x68   :  { %1909 = vmatprep.subr.mxu1 %v851_v12  ;;  %4629 = vmatpush3.msra.mxu0 %v317_v48  ;;  %v311_v3 = vld [vmem:[%s10343_s30] sm:$0xff]  ;;  %v1526_v11 = vld [vmem:[%s10319_s5 + $0x2018] sm:$0xff]  ;;  %v1501_v15 = vld [vmem:[%s10319_s5 + $0x1f50] sm:$0xff] }
  0x69   :  { %1910 = vmatpush2.msra.mxu1 %v850_v14  ;;  %4630 = vmatprep.subr.mxu0 %v332_v50  ;;  %v1514_v13 = vld [vmem:[%s10319_s5 + $0x1fb8] sm:$0xff]  ;;  %v1513_v14 = vld [vmem:[%s10319_s5 + $0x1fb0] sm:$0xff]  ;;  %v1488_v18 = vld [vmem:[%s10319_s5 + $0x1ee8] sm:$0xff] }
  0x6a   :  { %1911 = vmatprep.subr.mxu1 %v838_v16  ;;  %4631 = vmatpush3.msra.mxu0 %v316_v52  ;;  %v1500_v16 = vld [vmem:[%s10319_s5 + $0x1f48] sm:$0xff]  ;;  %v1475_v20 = vld [vmem:[%s10319_s5 + $0x1e80] sm:$0xff]  ;;  %v1462_v22 = vld [vmem:[%s10319_s5 + $0x1e18] sm:$0xff] }
  0x6b   :  { %1912 = vmatpush2.msra.mxu1 %v837_v19  ;;  %4632 = vmatprep.subr.mxu0 %v331_v54  ;;  %v1487_v19 = vld [vmem:[%s10319_s5 + $0x1ee0] sm:$0xff]  ;;  %v1449_v24 = vld [vmem:[%s10319_s5 + $0x1db0] sm:$0xff]  ;;  %v1436_v26 = vld [vmem:[%s10319_s5 + $0x1d48] sm:$0xff] }
  0x6c   :  { %1913 = vmatprep.subr.mxu1 %v825_v21  ;;  %4633 = vmatpush3.msra.mxu0 %v315_v56  ;;  %v1474_v21 = vld [vmem:[%s10319_s5 + $0x1e78] sm:$0xff]  ;;  %v1423_v27 = vld [vmem:[%s10319_s5 + $0x1ce0] sm:$0xff]  ;;  %v1397_v33 = vld [vmem:[%s10319_s5 + $0x1c10] sm:$0xff] }
  0x6d   :  { %1914 = vmatpush2.msra.mxu1 %v824_v23  ;;  %4634 = vmatprep.subr.mxu0 %v330_v58  ;;  %v1461_v23 = vld [vmem:[%s10319_s5 + $0x1e10] sm:$0xff]  ;;  %v1410_v31 = vld [vmem:[%s10319_s5 + $0x1c78] sm:$0xff]  ;;  %v1384_v35 = vld [vmem:[%s10319_s5 + $0x1ba8] sm:$0xff] }
  0x6e   :  { %1915 = vmatprep.subr.mxu1 %v812_v25  ;;  %4635 = vmatpush3.msra.mxu0 %v314_v60  ;;  %v1448_v25 = vld [vmem:[%s10319_s5 + $0x1da8] sm:$0xff]  ;;  %v1371_v37 = vld [vmem:[%s10319_s5 + $0x1b40] sm:$0xff]  ;;  %v1358_v29 = vld [vmem:[%s10319_s5 + $0x1ad8] sm:$0xff] }
  0x6f   :  { %1916 = vmatpush2.msra.mxu1 %v811_v17  ;;  %4636 = vmatprep.subr.mxu0 %v329_v62  ;;  %v1435_v17 = vld [vmem:[%s10319_s5 + $0x1d40] sm:$0xff]  ;;  %v1345_v40 = vld [vmem:[%s10319_s5 + $0x1a70] sm:$0xff]  ;;  %v1332_v42 = vld [vmem:[%s10319_s5 + $0x1a08] sm:$0xff] }
  0x70   :  { %1917 = vmatprep.subr.mxu1 %v799_v30  ;;  %4637 = vmatpush3.msra.mxu0 %v313_v63  ;;  %v1422_v30 = vld [vmem:[%s10319_s5 + $0x1cd8] sm:$0xff]  ;;  %v1735_v44 = vld [vmem:[%s10319_s5 + $0x26a0] sm:$0xff]  ;;  %v1721_v48 = vld [vmem:[%s10319_s5 + $0x2630] sm:$0xff] }
  0x71   :  { %1918 = vmatpush2.msra.mxu1 %v798_v32  ;;  %4638 = vmatprep.subr.mxu0 %v328_v0  ;;  %v1409_v32 = vld [vmem:[%s10319_s5 + $0x1c70] sm:$0xff]  ;;  %v1722_v46 = vld [vmem:[%s10319_s5 + $0x2638] sm:$0xff]  ;;  %v1683_v58 = vld [vmem:[%s10319_s5 + $0x2500] sm:$0xff] }
  0x72   :  { %1919 = vmatprep.subr.mxu1 %v786_v34  ;;  %4639 = vmatpush3.msra.mxu0 %v312_v1  ;;  %v1396_v34 = vld [vmem:[%s10319_s5 + $0x1c08] sm:$0xff]  ;;  %v1709_v50 = vld [vmem:[%s10319_s5 + $0x25d0] sm:$0xff] }
  0x73   :  { %1920 = vmatpush2.msra.mxu1 %v785_v36  ;;  %4640 = vmatprep.subr.mxu0 %v327_v2  ;;  %v1383_v36 = vld [vmem:[%s10319_s5 + $0x1ba0] sm:$0xff]  ;;  %v1669_v62 = vld [vmem:[%s10319_s5 + $0x2490] sm:$0xff]  ;;  %v1656_v0 = vld [vmem:[%s10319_s5 + $0x2428] sm:$0xff] }
  0x74   :  { %1921 = vmatprep.subr.mxu1 %v773_v38  ;;  %4641 = vmatpush3.msra.mxu0 %v311_v3  ;;  %v1370_v38 = vld [vmem:[%s10319_s5 + $0x1b38] sm:$0xff]  ;;  %v1657_v63 = vld [vmem:[%s10319_s5 + $0x2430] sm:$0xff]  ;;  %v1644_v1 = vld [vmem:[%s10319_s5 + $0x23c8] sm:$0xff] }
  0x75   :  { %1922 = vmatpush2.msra.mxu1 %v772_v39  ;;  %5003 = vmatprep.subr.mxu0 %v5147_v5  ;;  %v1357_v39 = vld [vmem:[%s10319_s5 + $0x1ad0] sm:$0xff]  ;;  %v1643_v2 = vld [vmem:[%s10319_s5 + $0x23c0] sm:$0xff] }
  0x76   :  { %1923 = vmatprep.subr.mxu1 %v760_v41  ;;  %v1344_v41 = vld [vmem:[%s10319_s5 + $0x1a68] sm:$0xff]  ;;  %v1631_v3 = vld [vmem:[%s10319_s5 + $0x2360] sm:$0xff] }
  0x77   :  { %1924 = vmatpush2.msra.mxu1 %v759_v43  ;;  %v1331_v43 = vld [vmem:[%s10319_s5 + $0x1a00] sm:$0xff] }
  0x78   :  { %1925 = vmatprep.subr.mxu1 %v747_v45  ;;  %v1734_v45 = vld [vmem:[%s10319_s5 + $0x2698] sm:$0xff] }
  0x79   :  { %1926 = vmatpush2.msra.mxu1 %v746_v47 }
  0x7a   :  { %1927 = vmatprep.subr.mxu1 %v734_v49 }
  0x7b   :  { %1928 = vmatpush2.msra.mxu1 %v733_v51  ;;  %v1708_v51 = vld [vmem:[%s10319_s5 + $0x25c8] sm:$0xff] }
  0x7c   :  { %1929 = vmatprep.subr.mxu1 %v721_v53  ;;  %v1696_v53 = vld [vmem:[%s10319_s5 + $0x2568] sm:$0xff] }
  0x7d   :  { %1930 = vmatpush2.msra.mxu1 %v720_v55  ;;  %v1695_v55 = vld [vmem:[%s10319_s5 + $0x2560] sm:$0xff] }
  0x7e   :  { %1931 = vmatprep.subr.mxu1 %v708_v57 }
  0x7f   :  { %1932 = vmatpush2.msra.mxu1 %v707_v59  ;;  %v1682_v59 = vld [vmem:[%s10319_s5 + $0x24f8] sm:$0xff] }
  0x80   :  { %2011 = vmatprep.subr.mxu1 %v1527_v61  ;;  %v1670_v61 = vld [vmem:[%s10319_s5 + $0x2498] sm:$0xff] }
  0x8a   :  { %v5820_v4 = vpop.permute.xlu0 %5104 }
  0x8b   :  { %v5107_v6 = vunpack.i.h.bf16 %v5820_v4  ;;  %v5106_v7 = vunpack.i.l.bf16 %v5820_v4  ;;  %v1630_v4 = vld [vmem:[%s10319_s5 + $0x2358] sm:$0xff] }
  0x8d   :  { %v5827_v8 = vsel %vm164_vm0, %v5106_v7, %v5107_v6 }
  0x8e   :  { %v1844_v10 = vpop.permute.xlu0 %1843  ;;  %1933 = vmatprep.mubr.f32.mxu1 %v5827_v8 }
  0x8f   :  { %v5834_v12 = vsel %vm164_vm0, %v1844_v10, %v5106_v7  ;;  %v1617_v7 = vld [vmem:[%s10319_s5 + $0x22f0] sm:$0xff] }
  0x90   :  { %1934 = vmatmul.mubr.f32.vlgmr.msra.gmra.mxu1 %v5834_v12  ;;  %v1605_v10 = vld [vmem:[%s10319_s5 + $0x2290] sm:$0xff] }
  0x91   :  { %2012 = vmatpush1.msra.mxu1 %v1526_v11  ;;  %v1604_v11 = vld [vmem:[%s10319_s5 + $0x2288] sm:$0xff] }
  0x92   :  { %2013 = vmatprep.subr.mxu1 %v1514_v13  ;;  %v1592_v13 = vld [vmem:[%s10319_s5 + $0x2228] sm:$0xff] }
  0x93   :  { %2014 = vmatpush1.msra.mxu1 %v1513_v14  ;;  %v1591_v14 = vld [vmem:[%s10319_s5 + $0x2220] sm:$0xff] }
  0x94   :  { %2015 = vmatprep.subr.mxu1 %v1501_v15  ;;  %v1579_v15 = vld [vmem:[%s10319_s5 + $0x21c0] sm:$0xff] }
  0x95   :  { %2016 = vmatpush1.msra.mxu1 %v1500_v16  ;;  %v1578_v16 = vld [vmem:[%s10319_s5 + $0x21b8] sm:$0xff] }
  0x96   :  { %2017 = vmatprep.subr.mxu1 %v1488_v18  ;;  %v1566_v18 = vld [vmem:[%s10319_s5 + $0x2158] sm:$0xff] }
  0x97   :  { %2018 = vmatpush1.msra.mxu1 %v1487_v19  ;;  %v1565_v19 = vld [vmem:[%s10319_s5 + $0x2150] sm:$0xff] }
  0x98   :  { %2019 = vmatprep.subr.mxu1 %v1475_v20 }
  0x99   :  { %2020 = vmatpush1.msra.mxu1 %v1474_v21  ;;  %v1553_v21 = vld [vmem:[%s10319_s5 + $0x20f0] sm:$0xff] }
  0x9a   :  { %2021 = vmatprep.subr.mxu1 %v1462_v22  ;;  %v1552_v22 = vld [vmem:[%s10319_s5 + $0x20e8] sm:$0xff] }
  0x9b   :  { %2022 = vmatpush1.msra.mxu1 %v1461_v23  ;;  %v1540_v23 = vld [vmem:[%s10319_s5 + $0x2088] sm:$0xff] }
  0x9c   :  { %2023 = vmatprep.subr.mxu1 %v1449_v24  ;;  %v1539_v24 = vld [vmem:[%s10319_s5 + $0x2080] sm:$0xff] }
  0x9d   :  { %2024 = vmatpush1.msra.mxu1 %v1448_v25 }
  0x9e   :  { %2025 = vmatprep.subr.mxu1 %v1436_v26  ;;  %v1113_v26 = vld [vmem:[%s10319_s5 + $0x1330] sm:$0xff] }
  0x9f   :  { %2026 = vmatpush1.msra.mxu1 %v1435_v17 }
  0xa0   :  { %2027 = vmatprep.subr.mxu1 %v1423_v27  ;;  %v1112_v27 = vld [vmem:[%s10319_s5 + $0x1328] sm:$0xff] }
  0xa1   :  { %2028 = vmatpush1.msra.mxu1 %v1422_v30  ;;  %v1100_v30 = vld [vmem:[%s10319_s5 + $0x12c8] sm:$0xff] }
  0xa2   :  { %2029 = vmatprep.subr.mxu1 %v1410_v31  ;;  %v1099_v31 = vld [vmem:[%s10319_s5 + $0x12c0] sm:$0xff] }
  0xa3   :  { %2030 = vmatpush1.msra.mxu1 %v1409_v32  ;;  %v1087_v32 = vld [vmem:[%s10319_s5 + $0x1260] sm:$0xff] }
  0xa4   :  { %2031 = vmatprep.subr.mxu1 %v1397_v33  ;;  %v1086_v33 = vld [vmem:[%s10319_s5 + $0x1258] sm:$0xff] }
  0xa5   :  { %2032 = vmatpush1.msra.mxu1 %v1396_v34  ;;  %v1074_v34 = vld [vmem:[%s10319_s5 + $0x11f8] sm:$0xff] }
  0xa6   :  { %2033 = vmatprep.subr.mxu1 %v1384_v35  ;;  %v1073_v35 = vld [vmem:[%s10319_s5 + $0x11f0] sm:$0xff] }
  0xa7   :  { %2034 = vmatpush1.msra.mxu1 %v1383_v36  ;;  %v1061_v36 = vld [vmem:[%s10319_s5 + $0x1190] sm:$0xff] }
  0xa8   :  { %2035 = vmatprep.subr.mxu1 %v1371_v37  ;;  %v1060_v37 = vld [vmem:[%s10319_s5 + $0x1188] sm:$0xff] }
  0xa9   :  { %2036 = vmatpush1.msra.mxu1 %v1370_v38  ;;  %v1048_v38 = vld [vmem:[%s10319_s5 + $0x1128] sm:$0xff] }
  0xaa   :  { %2037 = vmatprep.subr.mxu1 %v1358_v29  ;;  %v1047_v29 = vld [vmem:[%s10319_s5 + $0x1120] sm:$0xff] }
  0xab   :  { %2038 = vmatpush1.msra.mxu1 %v1357_v39  ;;  %v1035_v39 = vld [vmem:[%s10319_s5 + $0x10c0] sm:$0xff] }
  0xac   :  { %2039 = vmatprep.subr.mxu1 %v1345_v40  ;;  %v1034_v40 = vld [vmem:[%s10319_s5 + $0x10b8] sm:$0xff] }
  0xad   :  { %2040 = vmatpush1.msra.mxu1 %v1344_v41  ;;  %v1022_v41 = vld [vmem:[%s10319_s5 + $0x1058] sm:$0xff] }
  0xae   :  { %2041 = vmatprep.subr.mxu1 %v1332_v42  ;;  %v1021_v42 = vld [vmem:[%s10319_s5 + $0x1050] sm:$0xff] }
  0xaf   :  { %2042 = vmatpush1.msra.mxu1 %v1331_v43  ;;  %v1009_v43 = vld [vmem:[%s10319_s5 + $0xff0] sm:$0xff] }
  0xb0   :  { %v5936_v47 = vpop.permute.xlu1 %5109  ;;  %2043 = vmatprep.subr.mxu1 %v1735_v44  ;;  %v1008_v44 = vld [vmem:[%s10319_s5 + $0xfe8] sm:$0xff] }
  0xb1   :  { %v5111_v49 = vunpack.i.l.bf16 %v5936_v47  ;;  %2044 = vmatpush2.msra.mxu1 %v1734_v45  ;;  %v5112_v20 = vunpack.i.h.bf16 %v5936_v47  ;;  %v996_v45 = vld [vmem:[%s10319_s5 + $0xf88] sm:$0xff]  ;;  %v983_v47 = vld [vmem:[%s10319_s5 + $0xf20] sm:$0xff] }
  0xb2   :  { %2045 = vmatprep.subr.mxu1 %v1722_v46  ;;  %v995_v46 = vld [vmem:[%s10319_s5 + $0xf80] sm:$0xff] }
  0xb3   :  { %v5953_v52 = vsel %vm164_vm0, %v5107_v6, %v5111_v49  ;;  %2046 = vmatpush2.msra.mxu1 %v1721_v48  ;;  %v1618_v6 = vld [vmem:[%s10319_s5 + $0x22f8] sm:$0xff]  ;;  %v6047_v17 = vsel %vm164_vm0, %v5111_v49, %v5112_v20 }
  0xb4   :  { %v5115_v54 = vpop.permute.xlu1 %5114  ;;  %2047 = vmatprep.subr.mxu1 %v1709_v50  ;;  %v982_v48 = vld [vmem:[%s10319_s5 + $0xf18] sm:$0xff]  ;;  %v969_v50 = vld [vmem:[%s10319_s5 + $0xeb0] sm:$0xff] }
  0xb5   :  { %v5117_v56 = vunpack.i.h.bf16 %v5115_v54  ;;  %v5116_v57 = vunpack.i.l.bf16 %v5115_v54  ;;  %2048 = vmatpush2.msra.mxu1 %v1708_v51  ;;  %v970_v49 = vld [vmem:[%s10319_s5 + $0xeb8] sm:$0xff]  ;;  %v957_v51 = vld [vmem:[%s10319_s5 + $0xe50] sm:$0xff]  ;;  %v944_v54 = vld [vmem:[%s10319_s5 + $0xde8] sm:$0xff] }
  0xb6   :  { %2049 = vmatprep.subr.mxu1 %v1696_v53  ;;  %v956_v53 = vld [vmem:[%s10319_s5 + $0xe48] sm:$0xff] }
  0xb7   :  { %v5968_v60 = vsel %vm164_vm0, %v5116_v57, %v5117_v56  ;;  %2050 = vmatpush2.msra.mxu1 %v1695_v55  ;;  %v6039_v25 = vsel %vm164_vm0, %v5112_v20, %v5116_v57  ;;  %v943_v55 = vld [vmem:[%s10319_s5 + $0xde0] sm:$0xff]  ;;  %v930_v57 = vld [vmem:[%s10319_s5 + $0xd78] sm:$0xff] }
  0xb8   :  { %2075 = vmatprep.mubr.f32.mxu1 %v5968_v60  ;;  %2051 = vmatprep.subr.mxu1 %v1683_v58  ;;  %v931_v56 = vld [vmem:[%s10319_s5 + $0xd80] sm:$0xff]  ;;  %v918_v58 = vld [vmem:[%s10319_s5 + $0xd18] sm:$0xff] }
  0xb9   :  { %2052 = vmatpush2.msra.mxu1 %v1682_v59  ;;  %v917_v59 = vld [vmem:[%s10319_s5 + $0xd10] sm:$0xff] }
  0xba   :  { %2053 = vmatprep.subr.mxu1 %v1670_v61  ;;  %v1321_v61 = vld [vmem:[%s10319_s5 + $0x19b0] sm:$0xff] }
  0xbb   :  { %2054 = vmatpush2.msra.mxu1 %v1669_v62  ;;  %v1320_v62 = vld [vmem:[%s10319_s5 + $0x19a8] sm:$0xff] }
  0xbc   :  { %2055 = vmatprep.subr.mxu1 %v1657_v63  ;;  %v1308_v63 = vld [vmem:[%s10319_s5 + $0x1948] sm:$0xff] }
  0xbd   :  { %2056 = vmatpush2.msra.mxu1 %v1656_v0  ;;  %v1307_v0 = vld [vmem:[%s10319_s5 + $0x1940] sm:$0xff] }
  0xbe   :  { %2057 = vmatprep.subr.mxu1 %v1644_v1  ;;  %v1295_v1 = vld [vmem:[%s10319_s5 + $0x18e0] sm:$0xff] }
  0xbf   :  { %2058 = vmatpush2.msra.mxu1 %v1643_v2  ;;  %v1294_v2 = vld [vmem:[%s10319_s5 + $0x18d8] sm:$0xff] }
  0xc0   :  { %2059 = vmatprep.subr.mxu1 %v1631_v3  ;;  %v1282_v3 = vld [vmem:[%s10319_s5 + $0x1878] sm:$0xff] }
  0xc1   :  { %2060 = vmatpush2.msra.mxu1 %v1630_v4  ;;  %v1281_v4 = vld [vmem:[%s10319_s5 + $0x1870] sm:$0xff] }
  0xc2   :  { %2061 = vmatprep.subr.mxu1 %v1618_v6  ;;  %v1269_v6 = vld [vmem:[%s10319_s5 + $0x1810] sm:$0xff] }
  0xc3   :  { %2062 = vmatpush2.msra.mxu1 %v1617_v7  ;;  %v6172_v7 = vsub.s32 0, %v5269_v9 }
  0xc4   :  { %2063 = vmatprep.subr.mxu1 %v1605_v10  ;;  %v1268_v10 = vld [vmem:[%s10319_s5 + $0x1808] sm:$0xff] }
  0xc5   :  { %2064 = vmatpush2.msra.mxu1 %v1604_v11  ;;  %v137_v11 = vld [vmem:[%s10344_s24] sm:$0x7] }
  0xc6   :  { %2065 = vmatprep.subr.mxu1 %v1592_v13  ;;  %v6181_v13 = vsub.s32 1, %v5269_v9 }
  0xc7   :  { %2066 = vmatpush2.msra.mxu1 %v1591_v14  ;;  %v1256_v14 = vld [vmem:[%s10319_s5 + $0x17a8] sm:$0xff] }
  0xc8   :  { %2067 = vmatprep.subr.mxu1 %v1579_v15  ;;  %v1255_v15 = vld [vmem:[%s10319_s5 + $0x17a0] sm:$0xff]  ;;  %v146_v20 = vrot.slane %v137_v11, %v6181_v13 }
  0xc9   :  { %2068 = vmatpush2.msra.mxu1 %v1578_v16  ;;  %v1243_v16 = vld [vmem:[%s10319_s5 + $0x1740] sm:$0xff] }
  0xca   :  { %2069 = vmatprep.subr.mxu1 %v1566_v18  ;;  %v142_v18 = vrot.slane %v137_v11, %v6172_v7 }
  0xcb   :  { %2070 = vmatpush2.msra.mxu1 %v1565_v19  ;;  %v1242_v19 = vld [vmem:[%s10319_s5 + $0x1738] sm:$0xff] }
  0xcc   :  { %2071 = vmatprep.subr.mxu1 %v1553_v21 }
  0xcd   :  { %2072 = vmatpush2.msra.mxu1 %v1552_v22  ;;  %v1230_v22 = vld [vmem:[%s10319_s5 + $0x16d8] sm:$0xff] }
  0xce   :  { %2073 = vmatprep.subr.mxu1 %v1540_v23  ;;  %v1229_v23 = vld [vmem:[%s10319_s5 + $0x16d0] sm:$0xff] }
  0xcf   :  { %2074 = vmatpush2.msra.mxu1 %v1539_v24  ;;  %v6204_v24 = vsub.s32 2, %v5269_v9 }
  0xd0   :  { %2153 = vmatprep.subr.mxu1 %v1113_v26  ;;  %2076 = vmatmul.mubr.f32.vlgmr.msra.gmra.mxu1 %v6039_v25 }
  0xd1   :  { %2154 = vmatpush1.msra.mxu1 %v1112_v27  ;;  %2217 = vmatprep.mubr.f32.mxu1 %v6047_v17 }
  0xd2   :  { %2155 = vmatprep.subr.mxu1 %v1100_v30  ;;  %v1217_v30 = vld [vmem:[%s10319_s5 + $0x1670] sm:$0xff] }
  0xd3   :  { %2156 = vmatpush1.msra.mxu1 %v1099_v31 }
  0xd4   :  { %2157 = vmatprep.subr.mxu1 %v1087_v32  ;;  %v1216_v32 = vld [vmem:[%s10319_s5 + $0x1668] sm:$0xff] }
  0xd5   :  { %2158 = vmatpush1.msra.mxu1 %v1086_v33  ;;  %v1204_v33 = vld [vmem:[%s10319_s5 + $0x1608] sm:$0xff] }
  0xd6   :  { %2159 = vmatprep.subr.mxu1 %v1074_v34 }
  0xd7   :  { %2160 = vmatpush1.msra.mxu1 %v1073_v35  ;;  %v1203_v35 = vld [vmem:[%s10319_s5 + $0x1600] sm:$0xff] }
  0xd8   :  { %2161 = vmatprep.subr.mxu1 %v1061_v36  ;;  %v150_v36 = vrot.slane %v137_v11, %v6204_v24  ;;  %v685_v11 = vld [vmem:[%s10319_s5 + $0x5d0] sm:$0xff] }
  0xd9   :  { %2162 = vmatpush1.msra.mxu1 %v1060_v37 }
  0xda   :  { %2163 = vmatprep.subr.mxu1 %v1048_v38 }
  0xdb   :  { %2164 = vmatpush1.msra.mxu1 %v1047_v29  ;;  %v1191_v29 = vld [vmem:[%s10319_s5 + $0x15a0] sm:$0xff] }
  0xdc   :  { %2165 = vmatprep.subr.mxu1 %v1035_v39  ;;  %v346_v39 = vld [vmem:[%s10343_s30 + $0x118] sm:$0xff] }
  0xdd   :  { %2166 = vmatpush1.msra.mxu1 %v1034_v40  ;;  %v1190_v40 = vld [vmem:[%s10319_s5 + $0x1598] sm:$0xff] }
  0xde   :  { %2167 = vmatprep.subr.mxu1 %v1022_v41 }
  0xdf   :  { %2168 = vmatpush1.msra.mxu1 %v1021_v42  ;;  %v1178_v42 = vld [vmem:[%s10319_s5 + $0x1538] sm:$0xff] }
  0xe0   :  { %2169 = vmatprep.subr.mxu1 %v1009_v43  ;;  %v345_v43 = vld [vmem:[%s10343_s30 + $0x110] sm:$0xff] }
  0xe1   :  { %2170 = vmatpush1.msra.mxu1 %v1008_v44 }
  0xe2   :  { %2171 = vmatprep.subr.mxu1 %v996_v45  ;;  %v1177_v45 = vld [vmem:[%s10319_s5 + $0x1530] sm:$0xff] }
  0xe3   :  { %2172 = vmatpush1.msra.mxu1 %v995_v46  ;;  %v1165_v46 = vld [vmem:[%s10319_s5 + $0x14d0] sm:$0xff] }
  0xe4   :  { %2173 = vmatprep.subr.mxu1 %v983_v47  ;;  %v344_v47 = vld [vmem:[%s10343_s30 + $0x108] sm:$0xff] }
  0xe5   :  { %2174 = vmatpush1.msra.mxu1 %v982_v48  ;;  %v1164_v48 = vld [vmem:[%s10319_s5 + $0x14c8] sm:$0xff] }
  0xe6   :  { %2175 = vmatprep.subr.mxu1 %v970_v49  ;;  %v1152_v49 = vld [vmem:[%s10319_s5 + $0x1468] sm:$0xff] }
  0xe7   :  { %2176 = vmatpush1.msra.mxu1 %v969_v50  ;;  %v343_v50 = vld [vmem:[%s10343_s30 + $0x100] sm:$0xff] }
  0xe8   :  { %2177 = vmatprep.subr.mxu1 %v957_v51 }
  0xe9   :  { %2178 = vmatpush1.msra.mxu1 %v956_v53  ;;  %v1151_v53 = vld [vmem:[%s10319_s5 + $0x1460] sm:$0xff] }
  0xea   :  { %2179 = vmatprep.subr.mxu1 %v944_v54  ;;  %v1111_v54 = vld [vmem:[%s10319_s5 + $0x1320] sm:$0xff] }
  0xeb   :  { %2180 = vmatpush1.msra.mxu1 %v943_v55  ;;  %v1139_v55 = vld [vmem:[%s10319_s5 + $0x1400] sm:$0xff] }
  0xec   :  { %2181 = vmatprep.subr.mxu1 %v931_v56  ;;  %v1110_v56 = vld [vmem:[%s10319_s5 + $0x1318] sm:$0xff] }
  0xed   :  { %2182 = vmatpush1.msra.mxu1 %v930_v57  ;;  %v1138_v57 = vld [vmem:[%s10319_s5 + $0x13f8] sm:$0xff] }
  0xee   :  { %2183 = vmatprep.subr.mxu1 %v918_v58  ;;  %v1098_v58 = vld [vmem:[%s10319_s5 + $0x12b8] sm:$0xff] }
  0xef   :  { %2184 = vmatpush1.msra.mxu1 %v917_v59  ;;  %v1126_v59 = vld [vmem:[%s10319_s5 + $0x1398] sm:$0xff] }
  0xf0   :  { %2185 = vmatprep.subr.mxu1 %v1321_v61  ;;  %v1097_v61 = vld [vmem:[%s10319_s5 + $0x12b0] sm:$0xff] }
  0xf1   :  { %2186 = vmatpush2.msra.mxu1 %v1320_v62  ;;  %v1125_v62 = vld [vmem:[%s10319_s5 + $0x1390] sm:$0xff] }
  0xf2   :  { %2187 = vmatprep.subr.mxu1 %v1308_v63  ;;  %v1085_v63 = vld [vmem:[%s10319_s5 + $0x1250] sm:$0xff] }
  0xf3   :  { %2188 = vmatpush2.msra.mxu1 %v1307_v0  ;;  %v699_v0 = vld [vmem:[%s10319_s5 + $0x640] sm:$0xff] }
  0xf4   :  { %2189 = vmatprep.subr.mxu1 %v1295_v1  ;;  %v1084_v1 = vld [vmem:[%s10319_s5 + $0x1248] sm:$0xff] }
  0xf5   :  { %2190 = vmatpush2.msra.mxu1 %v1294_v2  ;;  %v1072_v2 = vld [vmem:[%s10319_s5 + $0x11e8] sm:$0xff] }
  0xf6   :  { %2191 = vmatprep.subr.mxu1 %v1282_v3  ;;  %v698_v3 = vld [vmem:[%s10319_s5 + $0x638] sm:$0xff] }
  0xf7   :  { %2192 = vmatpush2.msra.mxu1 %v1281_v4  ;;  %v1071_v4 = vld [vmem:[%s10319_s5 + $0x11e0] sm:$0xff] }
  0xf8   :  { %2193 = vmatprep.subr.mxu1 %v1269_v6  ;;  %v686_v6 = vld [vmem:[%s10319_s5 + $0x5d8] sm:$0xff] }
  0xf9   :  { %2194 = vmatpush2.msra.mxu1 %v1268_v10  ;;  %v1059_v10 = vld [vmem:[%s10319_s5 + $0x1180] sm:$0xff] }
  0xfa   :  { %2195 = vmatprep.subr.mxu1 %v1256_v14  ;;  %v1058_v14 = vld [vmem:[%s10319_s5 + $0x1178] sm:$0xff] }
  0xfb   :  { %2196 = vmatpush2.msra.mxu1 %v1255_v15  ;;  %v673_v15 = vld [vmem:[%s10319_s5 + $0x570] sm:$0xff] }
  0xfc   :  { %v233_v21 = vpop.f32.mrf.mxu0  ;;  %2197 = vmatprep.subr.mxu1 %v1243_v16  ;;  %v1046_v16 = vld [vmem:[%s10319_s5 + $0x1118] sm:$0xff] }
  0xfd   :  { %v234_v26 = vadd.f32 %v233_v21, %v142_v18  ;;  %2198 = vmatpush2.msra.mxu1 %v1242_v19  ;;  %v672_v18 = vld [vmem:[%s10319_s5 + $0x568] sm:$0xff]  ;;  %v1045_v19 = vld [vmem:[%s10319_s5 + $0x1110] sm:$0xff] }
  0xfe   :  { %v235_v27 = vpop.f32.mrf.mxu0  ;;  %2199 = vmatprep.subr.mxu1 %v1230_v22  ;;  %v1033_v21 = vld [vmem:[%s10319_s5 + $0x10b0] sm:$0xff]  ;;  %v659_v22 = vld [vmem:[%s10319_s5 + $0x500] sm:$0xff] }
  0xff   :  { %v236_v31 = vadd.f32 %v235_v27, %v146_v20  ;;  %2200 = vmatpush2.msra.mxu1 %v1229_v23  ;;  %v308_v38 = vmax.f32 %v234_v26, 0.0  ;;  %v660_v20 = vld [vmem:[%s10319_s5 + $0x508] sm:$0xff]  ;;  %v647_v26 = vld [vmem:[%s10319_s5 + $0x4a0] sm:$0xff] }
 0x100   :  { %2201 = vmatprep.subr.mxu1 %v1217_v30  ;;  %v304_v37 = vpop.f32.mrf.mxu1  ;;  %v1032_v23 = vld [vmem:[%s10319_s5 + $0x10a8] sm:$0xff]  ;;  %v646_v30 = vld [vmem:[%s10319_s5 + $0x498] sm:$0xff] }
 0x101   :  { %v309_v34 = vmax.f32 %v236_v31, 0.0  ;;  %2202 = vmatpush2.msra.mxu1 %v1216_v32  ;;  %v305_v44 = vadd.f32 %v304_v37, %v150_v36  ;;  %v1020_v27 = vld [vmem:[%s10319_s5 + $0x1048] sm:$0xff]  ;;  %v1019_v31 = vld [vmem:[%s10319_s5 + $0x1040] sm:$0xff]  ;;  %v634_v32 = vld [vmem:[%s10319_s5 + $0x438] sm:$0xff] }
 0x102   :  { %2203 = vmatprep.subr.mxu1 %v1204_v33  ;;  %v306_v41 = vpop.f32.mrf.mxu1  ;;  %v1007_v33 = vld [vmem:[%s10319_s5 + $0xfe0] sm:$0xff]  ;;  %v621_v36 = vld [vmem:[%s10319_s5 + $0x3d0] sm:$0xff]  ;;  %v994_v37 = vld [vmem:[%s10319_s5 + $0xf78] sm:$0xff] }
 0x103   :  { %422 = vmatprep.mubr.f32.mxu0 %v309_v34  ;;  %2204 = vmatpush2.msra.mxu1 %v1203_v35  ;;  %v310_v51 = vmax.f32 %v305_v44, 0.0  ;;  %v633_v34 = vld [vmem:[%s10319_s5 + $0x430] sm:$0xff]  ;;  %v1006_v35 = vld [vmem:[%s10319_s5 + $0xfd8] sm:$0xff]  ;;  %v607_v41 = vld [vmem:[%s10319_s5 + $0x360] sm:$0xff] }
 0x104   :  { %423 = vmatmul.mubr.f32.vlgmr.msra.gmra.mxu0 %v308_v38  ;;  %2205 = vmatprep.subr.mxu1 %v1191_v29  ;;  %v620_v38 = vld [vmem:[%s10319_s5 + $0x3c8] sm:$0xff]  ;;  %v993_v29 = vld [vmem:[%s10319_s5 + $0xf70] sm:$0xff] }
 0x105   :  { %5004 = vmatpush3.msra.mxu0 %v346_v39  ;;  %2206 = vmatpush2.msra.mxu1 %v1190_v40  ;;  %v608_v39 = vld [vmem:[%s10319_s5 + $0x368] sm:$0xff]  ;;  %v981_v40 = vld [vmem:[%s10319_s5 + $0xf10] sm:$0xff] }
 0x106   :  { %5005 = vmatprep.subr.mxu0 %v5147_v5  ;;  %2207 = vmatprep.subr.mxu1 %v1178_v42  ;;  %v980_v42 = vld [vmem:[%s10319_s5 + $0xf08] sm:$0xff] }
 0x107   :  { %5006 = vmatpush3.msra.mxu0 %v345_v43  ;;  %2208 = vmatpush2.msra.mxu1 %v1177_v45  ;;  %v595_v43 = vld [vmem:[%s10319_s5 + $0x300] sm:$0xff]  ;;  %v968_v44 = vld [vmem:[%s10319_s5 + $0xea8] sm:$0xff]  ;;  %v594_v45 = vld [vmem:[%s10319_s5 + $0x2f8] sm:$0xff] }
 0x108   :  { %5007 = vmatprep.subr.mxu0 %v5147_v5  ;;  %2209 = vmatprep.subr.mxu1 %v1165_v46  ;;  %v967_v46 = vld [vmem:[%s10319_s5 + $0xea0] sm:$0xff] }
 0x109   :  { %5008 = vmatpush3.msra.mxu0 %v344_v47  ;;  %2210 = vmatpush2.msra.mxu1 %v1164_v48  ;;  %v582_v47 = vld [vmem:[%s10319_s5 + $0x298] sm:$0xff]  ;;  %v955_v48 = vld [vmem:[%s10319_s5 + $0xe40] sm:$0xff] }
 0x10a   :  { %5009 = vmatprep.subr.mxu0 %v5147_v5  ;;  %2211 = vmatprep.subr.mxu1 %v1152_v49  ;;  %v581_v49 = vld [vmem:[%s10319_s5 + $0x290] sm:$0xff] }
 0x10b   :  { %5010 = vmatpush3.msra.mxu0 %v343_v50  ;;  %5011 = vmatprep.mubr.msk.f32.mxu0 %vm5150_vm2, %v5147_v5  ;;  %v954_v50 = vld [vmem:[%s10319_s5 + $0xe38] sm:$0xff] }
 0x10c   :  { %2212 = vmatpush2.msra.mxu1 %v1151_v53  ;;  %5012 = vmatmul.mubr.msk.f32.vlgmr.msra.gmra.mxu0 %vm354_vm1, %v310_v51  ;;  %v569_v51 = vld [vmem:[%s10319_s5 + $0x230] sm:$0xff]  ;;  %v942_v53 = vld [vmem:[%s10319_s5 + $0xdd8] sm:$0xff] }
 0x10d   :  { %1940 = vmatprep.subr.mxu0 %v1111_v54  ;;  %2213 = vmatprep.subr.mxu1 %v1139_v55  ;;  %v568_v54 = vld [vmem:[%s10319_s5 + $0x228] sm:$0xff]  ;;  %v941_v55 = vld [vmem:[%s10319_s5 + $0xdd0] sm:$0xff] }
 0x10e   :  { %1941 = vmatpush1.msra.mxu0 %v1110_v56  ;;  %2214 = vmatpush2.msra.mxu1 %v1138_v57  ;;  %v556_v56 = vld [vmem:[%s10319_s5 + $0x1c8] sm:$0xff]  ;;  %v929_v57 = vld [vmem:[%s10319_s5 + $0xd70] sm:$0xff] }
 0x10f   :  { %1942 = vmatprep.subr.mxu0 %v1098_v58  ;;  %2215 = vmatprep.subr.mxu1 %v1126_v59  ;;  %v555_v58 = vld [vmem:[%s10319_s5 + $0x1c0] sm:$0xff]  ;;  %v928_v59 = vld [vmem:[%s10319_s5 + $0xd68] sm:$0xff] }
 0x110   :  { %1943 = vmatpush1.msra.mxu0 %v1097_v61  ;;  %2216 = vmatpush2.msra.mxu1 %v1125_v62  ;;  %v543_v61 = vld [vmem:[%s10319_s5 + $0x160] sm:$0xff]  ;;  %v916_v62 = vld [vmem:[%s10319_s5 + $0xd08] sm:$0xff] }
 0x111   :  { %1944 = vmatprep.subr.mxu0 %v1085_v63  ;;  %2295 = vmatprep.subr.mxu1 %v699_v0  ;;  %v542_v63 = vld [vmem:[%s10319_s5 + $0x158] sm:$0xff]  ;;  %v915_v0 = vld [vmem:[%s10319_s5 + $0xd00] sm:$0xff] }
 0x112   :  { %1945 = vmatpush1.msra.mxu0 %v1084_v1  ;;  %2218 = vmatmul.mubr.f32.vlgmr.msra.gmra.mxu1 %v5953_v52  ;;  %v530_v1 = vld [vmem:[%s10319_s5 + $0xf8] sm:$0xff] }
 0x113   :  { %1946 = vmatprep.subr.mxu0 %v1072_v2  ;;  %2296 = vmatpush1.msra.mxu1 %v698_v3  ;;  %v1319_v2 = vld [vmem:[%s10319_s5 + $0x19a0] sm:$0xff]  ;;  %v529_v3 = vld [vmem:[%s10319_s5 + $0xf0] sm:$0xff] }
 0x114   :  { %1947 = vmatpush1.msra.mxu0 %v1071_v4  ;;  %2297 = vmatprep.subr.mxu1 %v686_v6  ;;  %v1318_v4 = vld [vmem:[%s10319_s5 + $0x1998] sm:$0xff]  ;;  %v517_v6 = vld [vmem:[%s10319_s5 + $0x90] sm:$0xff] }
 0x115   :  { %1948 = vmatprep.subr.mxu0 %v1059_v10  ;;  %2298 = vmatpush1.msra.mxu1 %v685_v11  ;;  %v516_v10 = vld [vmem:[%s10319_s5 + $0x88] sm:$0xff]  ;;  %v1306_v11 = vld [vmem:[%s10319_s5 + $0x1938] sm:$0xff] }
 0x116   :  { %1949 = vmatpush1.msra.mxu0 %v1058_v14  ;;  %2299 = vmatprep.subr.mxu1 %v673_v15  ;;  %v504_v14 = vld [vmem:[%s10319_s5 + $0x28] sm:$0xff]  ;;  %v1305_v15 = vld [vmem:[%s10319_s5 + $0x1930] sm:$0xff] }
 0x117   :  { %1950 = vmatprep.subr.mxu0 %v1046_v16  ;;  %2300 = vmatpush1.msra.mxu1 %v672_v18  ;;  %v503_v16 = vld [vmem:[%s10319_s5 + $0x20] sm:$0xff]  ;;  %v1293_v18 = vld [vmem:[%s10319_s5 + $0x18d0] sm:$0xff] }
 0x118   :  { %1951 = vmatpush1.msra.mxu0 %v1045_v19  ;;  %2301 = vmatprep.subr.mxu1 %v660_v20  ;;  %v907_v19 = vld [vmem:[%s10319_s5 + $0xcc0] sm:$0xff]  ;;  %v1292_v20 = vld [vmem:[%s10319_s5 + $0x18c8] sm:$0xff] }
 0x119   :  { %1952 = vmatprep.subr.mxu0 %v1033_v21  ;;  %2302 = vmatpush1.msra.mxu1 %v659_v22  ;;  %v906_v21 = vld [vmem:[%s10319_s5 + $0xcb8] sm:$0xff]  ;;  %v1280_v22 = vld [vmem:[%s10319_s5 + $0x1868] sm:$0xff] }
 0x11a   :  { %1953 = vmatpush1.msra.mxu0 %v1032_v23  ;;  %2303 = vmatprep.subr.mxu1 %v647_v26  ;;  %v894_v23 = vld [vmem:[%s10319_s5 + $0xc58] sm:$0xff]  ;;  %v1279_v26 = vld [vmem:[%s10319_s5 + $0x1860] sm:$0xff] }
 0x11b   :  { %1954 = vmatprep.subr.mxu0 %v1020_v27  ;;  %2304 = vmatpush1.msra.mxu1 %v646_v30  ;;  %v893_v27 = vld [vmem:[%s10319_s5 + $0xc50] sm:$0xff]  ;;  %v1267_v30 = vld [vmem:[%s10319_s5 + $0x1800] sm:$0xff] }
 0x11c   :  { %1955 = vmatpush1.msra.mxu0 %v1019_v31  ;;  %2305 = vmatprep.subr.mxu1 %v634_v32  ;;  %v881_v31 = vld [vmem:[%s10319_s5 + $0xbf0] sm:$0xff]  ;;  %v1266_v32 = vld [vmem:[%s10319_s5 + $0x17f8] sm:$0xff] }
 0x11d   :  { %1956 = vmatprep.subr.mxu0 %v1007_v33  ;;  %2306 = vmatpush1.msra.mxu1 %v633_v34  ;;  %v880_v33 = vld [vmem:[%s10319_s5 + $0xbe8] sm:$0xff]  ;;  %v1254_v34 = vld [vmem:[%s10319_s5 + $0x1798] sm:$0xff] }
 0x11e   :  { %1957 = vmatpush1.msra.mxu0 %v1006_v35  ;;  %2307 = vmatprep.subr.mxu1 %v621_v36  ;;  %v868_v35 = vld [vmem:[%s10319_s5 + $0xb88] sm:$0xff]  ;;  %v1253_v36 = vld [vmem:[%s10319_s5 + $0x1790] sm:$0xff] }
 0x11f   :  { %1958 = vmatprep.subr.mxu0 %v994_v37  ;;  %2308 = vmatpush1.msra.mxu1 %v620_v38  ;;  %v867_v37 = vld [vmem:[%s10319_s5 + $0xb80] sm:$0xff]  ;;  %v1241_v38 = vld [vmem:[%s10319_s5 + $0x1730] sm:$0xff] }
 0x120   :  { %1959 = vmatpush1.msra.mxu0 %v993_v29  ;;  %2309 = vmatprep.subr.mxu1 %v608_v39  ;;  %v855_v29 = vld [vmem:[%s10319_s5 + $0xb20] sm:$0xff]  ;;  %v1240_v39 = vld [vmem:[%s10319_s5 + $0x1728] sm:$0xff] }
 0x121   :  { %1960 = vmatprep.subr.mxu0 %v981_v40  ;;  %2310 = vmatpush1.msra.mxu1 %v607_v41  ;;  %v854_v40 = vld [vmem:[%s10319_s5 + $0xb18] sm:$0xff]  ;;  %v1228_v41 = vld [vmem:[%s10319_s5 + $0x16c8] sm:$0xff] }
 0x122   :  { %1961 = vmatpush1.msra.mxu0 %v980_v42  ;;  %2311 = vmatprep.subr.mxu1 %v595_v43  ;;  %v842_v42 = vld [vmem:[%s10319_s5 + $0xab8] sm:$0xff]  ;;  %v1227_v43 = vld [vmem:[%s10319_s5 + $0x16c0] sm:$0xff] }
 0x123   :  { %1962 = vmatprep.subr.mxu0 %v968_v44  ;;  %2312 = vmatpush1.msra.mxu1 %v594_v45  ;;  %v841_v44 = vld [vmem:[%s10319_s5 + $0xab0] sm:$0xff]  ;;  %v1215_v45 = vld [vmem:[%s10319_s5 + $0x1660] sm:$0xff] }
 0x124   :  { %1963 = vmatpush1.msra.mxu0 %v967_v46  ;;  %2313 = vmatprep.subr.mxu1 %v582_v47  ;;  %v829_v46 = vld [vmem:[%s10319_s5 + $0xa50] sm:$0xff]  ;;  %v1214_v47 = vld [vmem:[%s10319_s5 + $0x1658] sm:$0xff] }
 0x125   :  { %1964 = vmatprep.subr.mxu0 %v955_v48  ;;  %2314 = vmatpush1.msra.mxu1 %v581_v49  ;;  %v828_v48 = vld [vmem:[%s10319_s5 + $0xa48] sm:$0xff]  ;;  %v1202_v49 = vld [vmem:[%s10319_s5 + $0x15f8] sm:$0xff] }
 0x126   :  { %1965 = vmatpush1.msra.mxu0 %v954_v50  ;;  %2315 = vmatprep.subr.mxu1 %v569_v51  ;;  %v816_v50 = vld [vmem:[%s10319_s5 + $0x9e8] sm:$0xff]  ;;  %v1201_v51 = vld [vmem:[%s10319_s5 + $0x15f0] sm:$0xff] }
 0x127   :  { %1966 = vmatprep.subr.mxu0 %v942_v53  ;;  %2316 = vmatpush1.msra.mxu1 %v568_v54  ;;  %v815_v53 = vld [vmem:[%s10319_s5 + $0x9e0] sm:$0xff]  ;;  %v1189_v54 = vld [vmem:[%s10319_s5 + $0x1590] sm:$0xff] }
 0x128   :  { %1967 = vmatpush1.msra.mxu0 %v941_v55  ;;  %2317 = vmatprep.subr.mxu1 %v556_v56  ;;  %v803_v55 = vld [vmem:[%s10319_s5 + $0x980] sm:$0xff]  ;;  %v1188_v56 = vld [vmem:[%s10319_s5 + $0x1588] sm:$0xff] }
 0x129   :  { %1968 = vmatprep.subr.mxu0 %v929_v57  ;;  %2318 = vmatpush1.msra.mxu1 %v555_v58  ;;  %v802_v57 = vld [vmem:[%s10319_s5 + $0x978] sm:$0xff]  ;;  %v1176_v58 = vld [vmem:[%s10319_s5 + $0x1528] sm:$0xff] }
 0x12a   :  { %1969 = vmatpush1.msra.mxu0 %v928_v59  ;;  %2319 = vmatprep.subr.mxu1 %v543_v61  ;;  %v790_v59 = vld [vmem:[%s10319_s5 + $0x918] sm:$0xff]  ;;  %v1175_v61 = vld [vmem:[%s10319_s5 + $0x1520] sm:$0xff] }
 0x12b   :  { %1970 = vmatprep.subr.mxu0 %v916_v62  ;;  %2320 = vmatpush1.msra.mxu1 %v542_v63  ;;  %v789_v62 = vld [vmem:[%s10319_s5 + $0x910] sm:$0xff]  ;;  %v1163_v63 = vld [vmem:[%s10319_s5 + $0x14c0] sm:$0xff] }
 0x12c   :  { %1971 = vmatpush1.msra.mxu0 %v915_v0  ;;  %2321 = vmatprep.subr.mxu1 %v530_v1  ;;  %v777_v0 = vld [vmem:[%s10319_s5 + $0x8b0] sm:$0xff]  ;;  %v1162_v1 = vld [vmem:[%s10319_s5 + $0x14b8] sm:$0xff] }
 0x12d   :  { %1972 = vmatprep.subr.mxu0 %v1319_v2  ;;  %2322 = vmatpush1.msra.mxu1 %v529_v3  ;;  %v776_v2 = vld [vmem:[%s10319_s5 + $0x8a8] sm:$0xff]  ;;  %v1150_v3 = vld [vmem:[%s10319_s5 + $0x1458] sm:$0xff] }
 0x12e   :  { %1973 = vmatpush2.msra.mxu0 %v1318_v4  ;;  %2323 = vmatprep.subr.mxu1 %v517_v6  ;;  %v764_v4 = vld [vmem:[%s10319_s5 + $0x848] sm:$0xff]  ;;  %v1149_v6 = vld [vmem:[%s10319_s5 + $0x1450] sm:$0xff] }
 0x12f   :  { %2359 = vmatprep.mubr.f32.mxu1 %v5827_v8  ;;  %2324 = vmatpush1.msra.mxu1 %v516_v10  ;;  %v763_v10 = vld [vmem:[%s10319_s5 + $0x840] sm:$0xff] }
 0x130   :  { %1974 = vmatprep.subr.mxu0 %v1306_v11  ;;  %2325 = vmatprep.subr.mxu1 %v504_v14  ;;  %v1137_v11 = vld [vmem:[%s10319_s5 + $0x13f0] sm:$0xff]  ;;  %v751_v14 = vld [vmem:[%s10319_s5 + $0x7e0] sm:$0xff] }
 0x131   :  { %1975 = vmatpush2.msra.mxu0 %v1305_v15  ;;  %2326 = vmatpush1.msra.mxu1 %v503_v16  ;;  %v1136_v15 = vld [vmem:[%s10319_s5 + $0x13e8] sm:$0xff]  ;;  %v750_v16 = vld [vmem:[%s10319_s5 + $0x7d8] sm:$0xff] }
 0x132   :  { %1976 = vmatprep.subr.mxu0 %v1293_v18  ;;  %2327 = vmatprep.subr.mxu1 %v907_v19  ;;  %v1124_v18 = vld [vmem:[%s10319_s5 + $0x1388] sm:$0xff]  ;;  %v738_v19 = vld [vmem:[%s10319_s5 + $0x778] sm:$0xff] }
 0x133   :  { %1977 = vmatpush2.msra.mxu0 %v1292_v20  ;;  %2328 = vmatpush2.msra.mxu1 %v906_v21  ;;  %v1123_v20 = vld [vmem:[%s10319_s5 + $0x1380] sm:$0xff]  ;;  %v737_v21 = vld [vmem:[%s10319_s5 + $0x770] sm:$0xff] }
 0x134   :  { %1978 = vmatprep.subr.mxu0 %v1280_v22  ;;  %2329 = vmatprep.subr.mxu1 %v894_v23  ;;  %v697_v22 = vld [vmem:[%s10319_s5 + $0x630] sm:$0xff] }
 0x135   :  { %1979 = vmatpush2.msra.mxu0 %v1279_v26  ;;  %2330 = vmatpush2.msra.mxu1 %v893_v27  ;;  %v725_v23 = vld [vmem:[%s10319_s5 + $0x710] sm:$0xff]  ;;  %v696_v26 = vld [vmem:[%s10319_s5 + $0x628] sm:$0xff] }
 0x136   :  { %1980 = vmatprep.subr.mxu0 %v1267_v30  ;;  %2331 = vmatprep.subr.mxu1 %v881_v31  ;;  %v724_v27 = vld [vmem:[%s10319_s5 + $0x708] sm:$0xff] }
 0x137   :  { %1981 = vmatpush2.msra.mxu0 %v1266_v32  ;;  %2332 = vmatpush2.msra.mxu1 %v880_v33  ;;  %v684_v30 = vld [vmem:[%s10319_s5 + $0x5c8] sm:$0xff]  ;;  %v683_v32 = vld [vmem:[%s10319_s5 + $0x5c0] sm:$0xff] }
 0x138   :  { %1982 = vmatprep.subr.mxu0 %v1254_v34  ;;  %2333 = vmatprep.subr.mxu1 %v868_v35  ;;  %v712_v31 = vld [vmem:[%s10319_s5 + $0x6a8] sm:$0xff]  ;;  %v711_v33 = vld [vmem:[%s10319_s5 + $0x6a0] sm:$0xff] }
 0x139   :  { %1983 = vmatpush2.msra.mxu0 %v1253_v36  ;;  %2334 = vmatpush2.msra.mxu1 %v867_v37  ;;  %v671_v34 = vld [vmem:[%s10319_s5 + $0x560] sm:$0xff]  ;;  %v670_v36 = vld [vmem:[%s10319_s5 + $0x558] sm:$0xff] }
 0x13a   :  { %1984 = vmatprep.subr.mxu0 %v1241_v38  ;;  %2335 = vmatprep.subr.mxu1 %v855_v29  ;;  %v1531_v35 = vld [vmem:[%s10319_s5 + $0x2040] sm:$0xff]  ;;  %v1530_v37 = vld [vmem:[%s10319_s5 + $0x2038] sm:$0xff] }
 0x13b   :  { %1985 = vmatpush2.msra.mxu0 %v1240_v39  ;;  %2336 = vmatpush2.msra.mxu1 %v854_v40  ;;  %v658_v38 = vld [vmem:[%s10319_s5 + $0x4f8] sm:$0xff]  ;;  %v657_v39 = vld [vmem:[%s10319_s5 + $0x4f0] sm:$0xff] }
 0x13c   :  { %1986 = vmatprep.subr.mxu0 %v1228_v41  ;;  %2337 = vmatprep.subr.mxu1 %v842_v42  ;;  %v1518_v29 = vld [vmem:[%s10319_s5 + $0x1fd8] sm:$0xff]  ;;  %v1517_v40 = vld [vmem:[%s10319_s5 + $0x1fd0] sm:$0xff] }
 0x13d   :  { %1987 = vmatpush2.msra.mxu0 %v1227_v43  ;;  %2338 = vmatpush2.msra.mxu1 %v841_v44  ;;  %v645_v41 = vld [vmem:[%s10319_s5 + $0x490] sm:$0xff]  ;;  %v644_v43 = vld [vmem:[%s10319_s5 + $0x488] sm:$0xff] }
 0x13e   :  { %1988 = vmatprep.subr.mxu0 %v1215_v45  ;;  %2339 = vmatprep.subr.mxu1 %v829_v46  ;;  %v1505_v42 = vld [vmem:[%s10319_s5 + $0x1f70] sm:$0xff]  ;;  %v1504_v44 = vld [vmem:[%s10319_s5 + $0x1f68] sm:$0xff] }
 0x13f   :  { %1989 = vmatpush2.msra.mxu0 %v1214_v47  ;;  %2340 = vmatpush2.msra.mxu1 %v828_v48  ;;  %v632_v45 = vld [vmem:[%s10319_s5 + $0x428] sm:$0xff]  ;;  %v631_v47 = vld [vmem:[%s10319_s5 + $0x420] sm:$0xff] }
 0x140   :  { %1990 = vmatprep.subr.mxu0 %v1202_v49  ;;  %2341 = vmatprep.subr.mxu1 %v816_v50  ;;  %v1492_v46 = vld [vmem:[%s10319_s5 + $0x1f08] sm:$0xff]  ;;  %v1491_v48 = vld [vmem:[%s10319_s5 + $0x1f00] sm:$0xff] }
 0x141   :  { %1991 = vmatpush2.msra.mxu0 %v1201_v51  ;;  %2342 = vmatpush2.msra.mxu1 %v815_v53  ;;  %v619_v49 = vld [vmem:[%s10319_s5 + $0x3c0] sm:$0xff]  ;;  %v618_v51 = vld [vmem:[%s10319_s5 + $0x3b8] sm:$0xff] }
 0x142   :  { %1992 = vmatprep.subr.mxu0 %v1189_v54  ;;  %2343 = vmatprep.subr.mxu1 %v803_v55  ;;  %v1479_v50 = vld [vmem:[%s10319_s5 + $0x1ea0] sm:$0xff]  ;;  %v1478_v53 = vld [vmem:[%s10319_s5 + $0x1e98] sm:$0xff] }
 0x143   :  { %1993 = vmatpush2.msra.mxu0 %v1188_v56  ;;  %2344 = vmatpush2.msra.mxu1 %v802_v57  ;;  %v606_v54 = vld [vmem:[%s10319_s5 + $0x358] sm:$0xff]  ;;  %v605_v56 = vld [vmem:[%s10319_s5 + $0x350] sm:$0xff] }
 0x144   :  { %1994 = vmatprep.subr.mxu0 %v1176_v58  ;;  %2345 = vmatprep.subr.mxu1 %v790_v59  ;;  %v1466_v55 = vld [vmem:[%s10319_s5 + $0x1e38] sm:$0xff]  ;;  %v1465_v57 = vld [vmem:[%s10319_s5 + $0x1e30] sm:$0xff] }
 0x145   :  { %1995 = vmatpush2.msra.mxu0 %v1175_v61  ;;  %2346 = vmatpush2.msra.mxu1 %v789_v62  ;;  %v593_v58 = vld [vmem:[%s10319_s5 + $0x2f0] sm:$0xff]  ;;  %v592_v61 = vld [vmem:[%s10319_s5 + $0x2e8] sm:$0xff] }
 0x146   :  { %1996 = vmatprep.subr.mxu0 %v1163_v63  ;;  %2347 = vmatprep.subr.mxu1 %v777_v0  ;;  %v1453_v59 = vld [vmem:[%s10319_s5 + $0x1dd0] sm:$0xff]  ;;  %v1452_v62 = vld [vmem:[%s10319_s5 + $0x1dc8] sm:$0xff] }
 0x147   :  { %1997 = vmatpush2.msra.mxu0 %v1162_v1  ;;  %2348 = vmatpush2.msra.mxu1 %v776_v2  ;;  %v580_v63 = vld [vmem:[%s10319_s5 + $0x288] sm:$0xff]  ;;  %v579_v1 = vld [vmem:[%s10319_s5 + $0x280] sm:$0xff] }
 0x148   :  { %1998 = vmatprep.subr.mxu0 %v1150_v3  ;;  %2349 = vmatprep.subr.mxu1 %v764_v4  ;;  %v1440_v0 = vld [vmem:[%s10319_s5 + $0x1d68] sm:$0xff]  ;;  %v1439_v2 = vld [vmem:[%s10319_s5 + $0x1d60] sm:$0xff] }
 0x149   :  { %1999 = vmatpush2.msra.mxu0 %v1149_v6  ;;  %2350 = vmatpush2.msra.mxu1 %v763_v10  ;;  %v567_v3 = vld [vmem:[%s10319_s5 + $0x220] sm:$0xff]  ;;  %v566_v6 = vld [vmem:[%s10319_s5 + $0x218] sm:$0xff] }
 0x14a   :  { %2000 = vmatprep.subr.mxu0 %v1137_v11  ;;  %2351 = vmatprep.subr.mxu1 %v751_v14  ;;  %v1427_v4 = vld [vmem:[%s10319_s5 + $0x1d00] sm:$0xff]  ;;  %v1426_v10 = vld [vmem:[%s10319_s5 + $0x1cf8] sm:$0xff] }
 0x14b   :  { %2001 = vmatpush2.msra.mxu0 %v1136_v15  ;;  %2352 = vmatpush2.msra.mxu1 %v750_v16  ;;  %v554_v11 = vld [vmem:[%s10319_s5 + $0x1b8] sm:$0xff]  ;;  %v553_v15 = vld [vmem:[%s10319_s5 + $0x1b0] sm:$0xff] }
 0x14c   :  { %2002 = vmatprep.subr.mxu0 %v1124_v18  ;;  %2353 = vmatprep.subr.mxu1 %v738_v19  ;;  %v1414_v14 = vld [vmem:[%s10319_s5 + $0x1c98] sm:$0xff]  ;;  %v1413_v16 = vld [vmem:[%s10319_s5 + $0x1c90] sm:$0xff] }
 0x14d   :  { %2003 = vmatpush2.msra.mxu0 %v1123_v20  ;;  %2004 = vmatprep.mubr.f32.mxu0 %v6047_v17  ;;  %v541_v18 = vld [vmem:[%s10319_s5 + $0x150] sm:$0xff]  ;;  %v540_v20 = vld [vmem:[%s10319_s5 + $0x148] sm:$0xff] }
 0x14e   :  { %2354 = vmatpush2.msra.mxu1 %v737_v21  ;;  %2005 = vmatmul.mubr.f32.vlgmr.msra.gmra.mxu0 %v5953_v52  ;;  %v1401_v19 = vld [vmem:[%s10319_s5 + $0x1c30] sm:$0xff]  ;;  %v1400_v21 = vld [vmem:[%s10319_s5 + $0x1c28] sm:$0xff] }
 0x14f   :  { %2082 = vmatprep.subr.mxu0 %v697_v22  ;;  %2355 = vmatprep.subr.mxu1 %v725_v23  ;;  %v528_v22 = vld [vmem:[%s10319_s5 + $0xe8] sm:$0xff] }
 0x150   :  { %2083 = vmatpush1.msra.mxu0 %v696_v26  ;;  %2146 = vmatprep.mubr.f32.mxu0 %v5827_v8  ;;  %v1388_v23 = vld [vmem:[%s10319_s5 + $0x1bc8] sm:$0xff]  ;;  %v527_v26 = vld [vmem:[%s10319_s5 + $0xe0] sm:$0xff] }
 0x151   :  { %2356 = vmatpush2.msra.mxu1 %v724_v27  ;;  %2084 = vmatprep.subr.mxu0 %v684_v30  ;;  %v1387_v27 = vld [vmem:[%s10319_s5 + $0x1bc0] sm:$0xff] }
 0x152   :  { %2357 = vmatprep.subr.mxu1 %v712_v31  ;;  %2085 = vmatpush1.msra.mxu0 %v683_v32  ;;  %v515_v30 = vld [vmem:[%s10319_s5 + $0x80] sm:$0xff]  ;;  %v514_v32 = vld [vmem:[%s10319_s5 + $0x78] sm:$0xff] }
 0x153   :  { %2358 = vmatpush2.msra.mxu1 %v711_v33  ;;  %2086 = vmatprep.subr.mxu0 %v671_v34  ;;  %v1375_v31 = vld [vmem:[%s10319_s5 + $0x1b60] sm:$0xff]  ;;  %v1374_v33 = vld [vmem:[%s10319_s5 + $0x1b58] sm:$0xff] }
 0x154   :  { %2360 = vmatmul.mubr.f32.vlgmr.msra.gmra.mxu1 %v5834_v12  ;;  %2437 = vmatprep.subr.mxu1 %v1531_v35  ;;  %v502_v34 = vld [vmem:[%s10319_s5 + $0x18] sm:$0xff] }
 0x155   :  { %2087 = vmatpush1.msra.mxu0 %v670_v36  ;;  %2438 = vmatpush1.msra.mxu1 %v1530_v37  ;;  %v1362_v35 = vld [vmem:[%s10319_s5 + $0x1af8] sm:$0xff]  ;;  %v501_v36 = vld [vmem:[%s10319_s5 + $0x10] sm:$0xff] }
 0x156   :  { %2088 = vmatprep.subr.mxu0 %v658_v38  ;;  %2439 = vmatprep.subr.mxu1 %v1518_v29  ;;  %v1361_v37 = vld [vmem:[%s10319_s5 + $0x1af0] sm:$0xff] }
 0x157   :  { %2089 = vmatpush1.msra.mxu0 %v657_v39  ;;  %2440 = vmatpush1.msra.mxu1 %v1517_v40  ;;  %v905_v38 = vld [vmem:[%s10319_s5 + $0xcb0] sm:$0xff]  ;;  %v904_v39 = vld [vmem:[%s10319_s5 + $0xca8] sm:$0xff] }
 0x158   :  { %2090 = vmatprep.subr.mxu0 %v645_v41  ;;  %2441 = vmatprep.subr.mxu1 %v1505_v42  ;;  %v1349_v29 = vld [vmem:[%s10319_s5 + $0x1a90] sm:$0xff]  ;;  %v1348_v40 = vld [vmem:[%s10319_s5 + $0x1a88] sm:$0xff] }
 0x159   :  { %2091 = vmatpush1.msra.mxu0 %v644_v43  ;;  %2442 = vmatpush1.msra.mxu1 %v1504_v44  ;;  %v892_v41 = vld [vmem:[%s10319_s5 + $0xc48] sm:$0xff]  ;;  %v891_v43 = vld [vmem:[%s10319_s5 + $0xc40] sm:$0xff] }
 0x15a   :  { %2092 = vmatprep.subr.mxu0 %v632_v45  ;;  %2443 = vmatprep.subr.mxu1 %v1492_v46  ;;  %v1336_v42 = vld [vmem:[%s10319_s5 + $0x1a28] sm:$0xff]  ;;  %v1335_v44 = vld [vmem:[%s10319_s5 + $0x1a20] sm:$0xff] }
 0x15b   :  { %2093 = vmatpush1.msra.mxu0 %v631_v47  ;;  %2444 = vmatpush1.msra.mxu1 %v1491_v48  ;;  %v879_v45 = vld [vmem:[%s10319_s5 + $0xbe0] sm:$0xff]  ;;  %v878_v47 = vld [vmem:[%s10319_s5 + $0xbd8] sm:$0xff] }
 0x15c   :  { %2094 = vmatprep.subr.mxu0 %v619_v49  ;;  %2445 = vmatprep.subr.mxu1 %v1479_v50  ;;  %v1739_v46 = vld [vmem:[%s10319_s5 + $0x26c0] sm:$0xff]  ;;  %v1738_v48 = vld [vmem:[%s10319_s5 + $0x26b8] sm:$0xff] }
 0x15d   :  { %2095 = vmatpush1.msra.mxu0 %v618_v51  ;;  %2446 = vmatpush1.msra.mxu1 %v1478_v53  ;;  %v866_v49 = vld [vmem:[%s10319_s5 + $0xb78] sm:$0xff]  ;;  %v865_v51 = vld [vmem:[%s10319_s5 + $0xb70] sm:$0xff] }
 0x15e   :  { %2096 = vmatprep.subr.mxu0 %v606_v54  ;;  %2447 = vmatprep.subr.mxu1 %v1466_v55  ;;  %v1726_v50 = vld [vmem:[%s10319_s5 + $0x2658] sm:$0xff]  ;;  %v1725_v53 = vld [vmem:[%s10319_s5 + $0x2650] sm:$0xff] }
 0x15f   :  { %2097 = vmatpush1.msra.mxu0 %v605_v56  ;;  %2448 = vmatpush1.msra.mxu1 %v1465_v57  ;;  %v853_v54 = vld [vmem:[%s10319_s5 + $0xb10] sm:$0xff]  ;;  %v852_v56 = vld [vmem:[%s10319_s5 + $0xb08] sm:$0xff] }
 0x160   :  { %2098 = vmatprep.subr.mxu0 %v593_v58  ;;  %2449 = vmatprep.subr.mxu1 %v1453_v59  ;;  %v1713_v55 = vld [vmem:[%s10319_s5 + $0x25f0] sm:$0xff]  ;;  %v1712_v57 = vld [vmem:[%s10319_s5 + $0x25e8] sm:$0xff] }
 0x161   :  { %2099 = vmatpush1.msra.mxu0 %v592_v61  ;;  %2450 = vmatpush1.msra.mxu1 %v1452_v62  ;;  %v840_v58 = vld [vmem:[%s10319_s5 + $0xaa8] sm:$0xff]  ;;  %v839_v61 = vld [vmem:[%s10319_s5 + $0xaa0] sm:$0xff] }
 0x162   :  { %2100 = vmatprep.subr.mxu0 %v580_v63  ;;  %2451 = vmatprep.subr.mxu1 %v1440_v0  ;;  %v1700_v59 = vld [vmem:[%s10319_s5 + $0x2588] sm:$0xff]  ;;  %v1699_v62 = vld [vmem:[%s10319_s5 + $0x2580] sm:$0xff] }
 0x163   :  { %2101 = vmatpush1.msra.mxu0 %v579_v1  ;;  %2452 = vmatpush1.msra.mxu1 %v1439_v2  ;;  %v827_v63 = vld [vmem:[%s10319_s5 + $0xa40] sm:$0xff]  ;;  %v826_v1 = vld [vmem:[%s10319_s5 + $0xa38] sm:$0xff] }
 0x164   :  { %2102 = vmatprep.subr.mxu0 %v567_v3  ;;  %2453 = vmatprep.subr.mxu1 %v1427_v4  ;;  %v1687_v0 = vld [vmem:[%s10319_s5 + $0x2520] sm:$0xff]  ;;  %v1686_v2 = vld [vmem:[%s10319_s5 + $0x2518] sm:$0xff] }
 0x165   :  { %2103 = vmatpush1.msra.mxu0 %v566_v6  ;;  %2454 = vmatpush1.msra.mxu1 %v1426_v10  ;;  %v814_v3 = vld [vmem:[%s10319_s5 + $0x9d8] sm:$0xff]  ;;  %v813_v6 = vld [vmem:[%s10319_s5 + $0x9d0] sm:$0xff] }
 0x166   :  { %2104 = vmatprep.subr.mxu0 %v554_v11  ;;  %2455 = vmatprep.subr.mxu1 %v1414_v14  ;;  %v1674_v4 = vld [vmem:[%s10319_s5 + $0x24b8] sm:$0xff]  ;;  %v1673_v10 = vld [vmem:[%s10319_s5 + $0x24b0] sm:$0xff] }
 0x167   :  { %2105 = vmatpush1.msra.mxu0 %v553_v15  ;;  %2456 = vmatpush1.msra.mxu1 %v1413_v16  ;;  %v801_v11 = vld [vmem:[%s10319_s5 + $0x970] sm:$0xff]  ;;  %v800_v15 = vld [vmem:[%s10319_s5 + $0x968] sm:$0xff] }
 0x168   :  { %2106 = vmatprep.subr.mxu0 %v541_v18  ;;  %2457 = vmatprep.subr.mxu1 %v1401_v19  ;;  %v1661_v14 = vld [vmem:[%s10319_s5 + $0x2450] sm:$0xff]  ;;  %v1660_v16 = vld [vmem:[%s10319_s5 + $0x2448] sm:$0xff] }
 0x169   :  { %2107 = vmatpush1.msra.mxu0 %v540_v20  ;;  %2458 = vmatpush1.msra.mxu1 %v1400_v21  ;;  %v788_v18 = vld [vmem:[%s10319_s5 + $0x908] sm:$0xff]  ;;  %v787_v20 = vld [vmem:[%s10319_s5 + $0x900] sm:$0xff] }
 0x16a   :  { %2108 = vmatprep.subr.mxu0 %v528_v22  ;;  %2459 = vmatprep.subr.mxu1 %v1388_v23  ;;  %v1648_v19 = vld [vmem:[%s10319_s5 + $0x23e8] sm:$0xff]  ;;  %v1647_v21 = vld [vmem:[%s10319_s5 + $0x23e0] sm:$0xff] }
 0x16b   :  { %2109 = vmatpush1.msra.mxu0 %v527_v26  ;;  %2460 = vmatpush1.msra.mxu1 %v1387_v27  ;;  %v775_v22 = vld [vmem:[%s10319_s5 + $0x8a0] sm:$0xff]  ;;  %v774_v26 = vld [vmem:[%s10319_s5 + $0x898] sm:$0xff] }
 0x16c   :  { %2110 = vmatprep.subr.mxu0 %v515_v30  ;;  %2461 = vmatprep.subr.mxu1 %v1375_v31  ;;  %v1635_v23 = vld [vmem:[%s10319_s5 + $0x2380] sm:$0xff]  ;;  %v1634_v27 = vld [vmem:[%s10319_s5 + $0x2378] sm:$0xff] }
 0x16d   :  { %2111 = vmatpush1.msra.mxu0 %v514_v32  ;;  %2462 = vmatpush1.msra.mxu1 %v1374_v33  ;;  %v762_v30 = vld [vmem:[%s10319_s5 + $0x838] sm:$0xff]  ;;  %v761_v32 = vld [vmem:[%s10319_s5 + $0x830] sm:$0xff] }
 0x16e   :  { %2112 = vmatprep.subr.mxu0 %v502_v34  ;;  %2463 = vmatprep.subr.mxu1 %v1362_v35  ;;  %v1622_v31 = vld [vmem:[%s10319_s5 + $0x2318] sm:$0xff]  ;;  %v1621_v33 = vld [vmem:[%s10319_s5 + $0x2310] sm:$0xff] }
 0x16f   :  { %2113 = vmatpush1.msra.mxu0 %v501_v36  ;;  %2464 = vmatpush1.msra.mxu1 %v1361_v37  ;;  %v749_v34 = vld [vmem:[%s10319_s5 + $0x7d0] sm:$0xff]  ;;  %v748_v36 = vld [vmem:[%s10319_s5 + $0x7c8] sm:$0xff] }
 0x170   :  { %2114 = vmatprep.subr.mxu0 %v905_v38  ;;  %2465 = vmatprep.subr.mxu1 %v1349_v29  ;;  %v1609_v35 = vld [vmem:[%s10319_s5 + $0x22b0] sm:$0xff]  ;;  %v1608_v37 = vld [vmem:[%s10319_s5 + $0x22a8] sm:$0xff] }
 0x171   :  { %2115 = vmatpush2.msra.mxu0 %v904_v39  ;;  %2466 = vmatpush1.msra.mxu1 %v1348_v40  ;;  %v736_v38 = vld [vmem:[%s10319_s5 + $0x768] sm:$0xff]  ;;  %v735_v39 = vld [vmem:[%s10319_s5 + $0x760] sm:$0xff] }
 0x172   :  { %2116 = vmatprep.subr.mxu0 %v892_v41  ;;  %2467 = vmatprep.subr.mxu1 %v1336_v42  ;;  %v1596_v29 = vld [vmem:[%s10319_s5 + $0x2248] sm:$0xff]  ;;  %v1595_v40 = vld [vmem:[%s10319_s5 + $0x2240] sm:$0xff] }
 0x173   :  { %2501 = vmatprep.mubr.f32.mxu1 %v5968_v60  ;;  %2117 = vmatpush2.msra.mxu0 %v891_v43  ;;  %v723_v41 = vld [vmem:[%s10319_s5 + $0x700] sm:$0xff]  ;;  %v722_v43 = vld [vmem:[%s10319_s5 + $0x6f8] sm:$0xff] }
 0x174   :  { %2468 = vmatpush1.msra.mxu1 %v1335_v44  ;;  %2118 = vmatprep.subr.mxu0 %v879_v45  ;;  %v1583_v42 = vld [vmem:[%s10319_s5 + $0x21e0] sm:$0xff]  ;;  %v1582_v44 = vld [vmem:[%s10319_s5 + $0x21d8] sm:$0xff] }
 0x175   :  { %2469 = vmatprep.subr.mxu1 %v1739_v46  ;;  %2119 = vmatpush2.msra.mxu0 %v878_v47  ;;  %v710_v45 = vld [vmem:[%s10319_s5 + $0x698] sm:$0xff]  ;;  %v709_v47 = vld [vmem:[%s10319_s5 + $0x690] sm:$0xff] }
 0x176   :  { %2470 = vmatpush2.msra.mxu1 %v1738_v48  ;;  %2120 = vmatprep.subr.mxu0 %v866_v49  ;;  %v1570_v46 = vld [vmem:[%s10319_s5 + $0x2178] sm:$0xff]  ;;  %v1569_v48 = vld [vmem:[%s10319_s5 + $0x2170] sm:$0xff] }
 0x177   :  { %2471 = vmatprep.subr.mxu1 %v1726_v50  ;;  %2121 = vmatpush2.msra.mxu0 %v865_v51  ;;  %v1529_v49 = vld [vmem:[%s10319_s5 + $0x2030] sm:$0xff]  ;;  %v1528_v51 = vld [vmem:[%s10319_s5 + $0x2028] sm:$0xff] }
 0x178   :  { %2472 = vmatpush2.msra.mxu1 %v1725_v53  ;;  %2122 = vmatprep.subr.mxu0 %v853_v54  ;;  %v1557_v50 = vld [vmem:[%s10319_s5 + $0x2110] sm:$0xff]  ;;  %v1556_v53 = vld [vmem:[%s10319_s5 + $0x2108] sm:$0xff] }
 0x179   :  { %2473 = vmatprep.subr.mxu1 %v1713_v55  ;;  %2123 = vmatpush2.msra.mxu0 %v852_v56  ;;  %v1516_v54 = vld [vmem:[%s10319_s5 + $0x1fc8] sm:$0xff]  ;;  %v1515_v56 = vld [vmem:[%s10319_s5 + $0x1fc0] sm:$0xff] }
 0x17a   :  { %2474 = vmatpush2.msra.mxu1 %v1712_v57  ;;  %2124 = vmatprep.subr.mxu0 %v840_v58  ;;  %v1544_v55 = vld [vmem:[%s10319_s5 + $0x20a8] sm:$0xff]  ;;  %v1543_v57 = vld [vmem:[%s10319_s5 + $0x20a0] sm:$0xff] }
 0x17b   :  { %2475 = vmatprep.subr.mxu1 %v1700_v59  ;;  %2125 = vmatpush2.msra.mxu0 %v839_v61  ;;  %v1503_v58 = vld [vmem:[%s10319_s5 + $0x1f60] sm:$0xff]  ;;  %v1117_v59 = vld [vmem:[%s10319_s5 + $0x1350] sm:$0xff]  ;;  %v1502_v61 = vld [vmem:[%s10319_s5 + $0x1f58] sm:$0xff] }
 0x17c   :  { %2476 = vmatpush2.msra.mxu1 %v1699_v62  ;;  %2126 = vmatprep.subr.mxu0 %v827_v63  ;;  %v1116_v62 = vld [vmem:[%s10319_s5 + $0x1348] sm:$0xff]  ;;  %v1490_v63 = vld [vmem:[%s10319_s5 + $0x1ef8] sm:$0xff] }
 0x17d   :  { %2477 = vmatprep.subr.mxu1 %v1687_v0  ;;  %2127 = vmatpush2.msra.mxu0 %v826_v1  ;;  %v1104_v0 = vld [vmem:[%s10319_s5 + $0x12e8] sm:$0xff]  ;;  %v1489_v1 = vld [vmem:[%s10319_s5 + $0x1ef0] sm:$0xff] }
 0x17e   :  { %2478 = vmatpush2.msra.mxu1 %v1686_v2  ;;  %2128 = vmatprep.subr.mxu0 %v814_v3  ;;  %v1103_v2 = vld [vmem:[%s10319_s5 + $0x12e0] sm:$0xff]  ;;  %v1477_v3 = vld [vmem:[%s10319_s5 + $0x1e90] sm:$0xff] }
 0x17f   :  { %2479 = vmatprep.subr.mxu1 %v1674_v4  ;;  %2129 = vmatpush2.msra.mxu0 %v813_v6  ;;  %v1091_v4 = vld [vmem:[%s10319_s5 + $0x1280] sm:$0xff]  ;;  %v1476_v6 = vld [vmem:[%s10319_s5 + $0x1e88] sm:$0xff] }
 0x180   :  { %2480 = vmatpush2.msra.mxu1 %v1673_v10  ;;  %2130 = vmatprep.subr.mxu0 %v801_v11  ;;  %v1090_v10 = vld [vmem:[%s10319_s5 + $0x1278] sm:$0xff]  ;;  %v1464_v11 = vld [vmem:[%s10319_s5 + $0x1e28] sm:$0xff] }
 0x181   :  { %2481 = vmatprep.subr.mxu1 %v1661_v14  ;;  %2131 = vmatpush2.msra.mxu0 %v800_v15  ;;  %v1078_v14 = vld [vmem:[%s10319_s5 + $0x1218] sm:$0xff]  ;;  %v1463_v15 = vld [vmem:[%s10319_s5 + $0x1e20] sm:$0xff] }
 0x182   :  { %2482 = vmatpush2.msra.mxu1 %v1660_v16  ;;  %2132 = vmatprep.subr.mxu0 %v788_v18  ;;  %v1077_v16 = vld [vmem:[%s10319_s5 + $0x1210] sm:$0xff]  ;;  %v1451_v18 = vld [vmem:[%s10319_s5 + $0x1dc0] sm:$0xff] }
 0x183   :  { %2483 = vmatprep.subr.mxu1 %v1648_v19  ;;  %2133 = vmatpush2.msra.mxu0 %v787_v20  ;;  %v1065_v19 = vld [vmem:[%s10319_s5 + $0x11b0] sm:$0xff]  ;;  %v1450_v20 = vld [vmem:[%s10319_s5 + $0x1db8] sm:$0xff] }
 0x184   :  { %2484 = vmatpush2.msra.mxu1 %v1647_v21  ;;  %2134 = vmatprep.subr.mxu0 %v775_v22  ;;  %v1064_v21 = vld [vmem:[%s10319_s5 + $0x11a8] sm:$0xff]  ;;  %v1438_v22 = vld [vmem:[%s10319_s5 + $0x1d58] sm:$0xff] }
 0x185   :  { %2485 = vmatprep.subr.mxu1 %v1635_v23  ;;  %2135 = vmatpush2.msra.mxu0 %v774_v26  ;;  %v1052_v23 = vld [vmem:[%s10319_s5 + $0x1148] sm:$0xff]  ;;  %v1437_v26 = vld [vmem:[%s10319_s5 + $0x1d50] sm:$0xff] }
 0x186   :  { %2486 = vmatpush2.msra.mxu1 %v1634_v27  ;;  %2136 = vmatprep.subr.mxu0 %v762_v30  ;;  %v1051_v27 = vld [vmem:[%s10319_s5 + $0x1140] sm:$0xff]  ;;  %v1425_v30 = vld [vmem:[%s10319_s5 + $0x1cf0] sm:$0xff] }
 0x187   :  { %2487 = vmatprep.subr.mxu1 %v1622_v31  ;;  %2137 = vmatpush2.msra.mxu0 %v761_v32  ;;  %v1039_v31 = vld [vmem:[%s10319_s5 + $0x10e0] sm:$0xff]  ;;  %v1424_v32 = vld [vmem:[%s10319_s5 + $0x1ce8] sm:$0xff] }
 0x188   :  { %2488 = vmatpush2.msra.mxu1 %v1621_v33  ;;  %2138 = vmatprep.subr.mxu0 %v749_v34  ;;  %v1038_v33 = vld [vmem:[%s10319_s5 + $0x10d8] sm:$0xff]  ;;  %v1412_v34 = vld [vmem:[%s10319_s5 + $0x1c88] sm:$0xff] }
 0x189   :  { %2489 = vmatprep.subr.mxu1 %v1609_v35  ;;  %2139 = vmatpush2.msra.mxu0 %v748_v36  ;;  %v1026_v35 = vld [vmem:[%s10319_s5 + $0x1078] sm:$0xff]  ;;  %v1411_v36 = vld [vmem:[%s10319_s5 + $0x1c80] sm:$0xff] }
 0x18a   :  { %2490 = vmatpush2.msra.mxu1 %v1608_v37  ;;  %2140 = vmatprep.subr.mxu0 %v736_v38  ;;  %v1025_v37 = vld [vmem:[%s10319_s5 + $0x1070] sm:$0xff]  ;;  %v1399_v38 = vld [vmem:[%s10319_s5 + $0x1c20] sm:$0xff] }
 0x18b   :  { %2491 = vmatprep.subr.mxu1 %v1596_v29  ;;  %2141 = vmatpush2.msra.mxu0 %v735_v39  ;;  %v1013_v29 = vld [vmem:[%s10319_s5 + $0x1010] sm:$0xff]  ;;  %v1398_v39 = vld [vmem:[%s10319_s5 + $0x1c18] sm:$0xff] }
 0x18c   :  { %2492 = vmatpush2.msra.mxu1 %v1595_v40  ;;  %2142 = vmatprep.subr.mxu0 %v723_v41  ;;  %v1012_v40 = vld [vmem:[%s10319_s5 + $0x1008] sm:$0xff]  ;;  %v1386_v41 = vld [vmem:[%s10319_s5 + $0x1bb8] sm:$0xff] }
 0x18d   :  { %2493 = vmatprep.subr.mxu1 %v1583_v42  ;;  %2143 = vmatpush2.msra.mxu0 %v722_v43  ;;  %v1000_v42 = vld [vmem:[%s10319_s5 + $0xfa8] sm:$0xff]  ;;  %v1385_v43 = vld [vmem:[%s10319_s5 + $0x1bb0] sm:$0xff] }
 0x18e   :  { %2494 = vmatpush2.msra.mxu1 %v1582_v44  ;;  %2144 = vmatprep.subr.mxu0 %v710_v45  ;;  %v999_v44 = vld [vmem:[%s10319_s5 + $0xfa0] sm:$0xff]  ;;  %v1373_v45 = vld [vmem:[%s10319_s5 + $0x1b50] sm:$0xff] }
 0x18f   :  { %2495 = vmatprep.subr.mxu1 %v1570_v46  ;;  %2145 = vmatpush2.msra.mxu0 %v709_v47  ;;  %v987_v46 = vld [vmem:[%s10319_s5 + $0xf40] sm:$0xff]  ;;  %v1372_v47 = vld [vmem:[%s10319_s5 + $0x1b48] sm:$0xff] }
 0x190   :  { %2496 = vmatpush2.msra.mxu1 %v1569_v48  ;;  %2147 = vmatmul.mubr.f32.vlgmr.msra.gmra.mxu0 %v5834_v12  ;;  %v986_v48 = vld [vmem:[%s10319_s5 + $0xf38] sm:$0xff] }
 0x191   :  { %2224 = vmatprep.subr.mxu0 %v1529_v49  ;;  %2497 = vmatprep.subr.mxu1 %v1557_v50  ;;  %v1360_v49 = vld [vmem:[%s10319_s5 + $0x1ae8] sm:$0xff]  ;;  %v974_v50 = vld [vmem:[%s10319_s5 + $0xed8] sm:$0xff] }
 0x192   :  { %2225 = vmatpush1.msra.mxu0 %v1528_v51  ;;  %2288 = vmatprep.mubr.f32.mxu0 %v5968_v60  ;;  %v1359_v51 = vld [vmem:[%s10319_s5 + $0x1ae0] sm:$0xff] }
 0x193   :  { %2498 = vmatpush2.msra.mxu1 %v1556_v53  ;;  %2226 = vmatprep.subr.mxu0 %v1516_v54  ;;  %v973_v53 = vld [vmem:[%s10319_s5 + $0xed0] sm:$0xff]  ;;  %v1347_v54 = vld [vmem:[%s10319_s5 + $0x1a80] sm:$0xff] }
 0x194   :  { %2499 = vmatprep.subr.mxu1 %v1544_v55  ;;  %2227 = vmatpush1.msra.mxu0 %v1515_v56  ;;  %v961_v55 = vld [vmem:[%s10319_s5 + $0xe70] sm:$0xff]  ;;  %v1346_v56 = vld [vmem:[%s10319_s5 + $0x1a78] sm:$0xff] }
 0x195   :  { %2500 = vmatpush2.msra.mxu1 %v1543_v57  ;;  %2228 = vmatprep.subr.mxu0 %v1503_v58  ;;  %v960_v57 = vld [vmem:[%s10319_s5 + $0xe68] sm:$0xff]  ;;  %v1334_v58 = vld [vmem:[%s10319_s5 + $0x1a18] sm:$0xff] }
 0x196   :  { %2502 = vmatmul.mubr.f32.vlgmr.msra.gmra.mxu1 %v6039_v25  ;;  %2579 = vmatprep.subr.mxu1 %v1117_v59  ;;  %v948_v59 = vld [vmem:[%s10319_s5 + $0xe08] sm:$0xff] }
 0x197   :  { %2229 = vmatpush1.msra.mxu0 %v1502_v61  ;;  %2580 = vmatpush1.msra.mxu1 %v1116_v62  ;;  %v1333_v61 = vld [vmem:[%s10319_s5 + $0x1a10] sm:$0xff]  ;;  %v947_v62 = vld [vmem:[%s10319_s5 + $0xe00] sm:$0xff] }
 0x198   :  { %2643 = vmatprep.mubr.f32.mxu1 %v6047_v17  ;;  %2230 = vmatprep.subr.mxu0 %v1490_v63  ;;  %v1737_v63 = vld [vmem:[%s10319_s5 + $0x26b0] sm:$0xff] }
 0x199   :  { %2581 = vmatprep.subr.mxu1 %v1104_v0  ;;  %2231 = vmatpush1.msra.mxu0 %v1489_v1  ;;  %v935_v0 = vld [vmem:[%s10319_s5 + $0xda0] sm:$0xff]  ;;  %v1736_v1 = vld [vmem:[%s10319_s5 + $0x26a8] sm:$0xff] }
 0x19a   :  { %2582 = vmatpush1.msra.mxu1 %v1103_v2  ;;  %2232 = vmatprep.subr.mxu0 %v1477_v3  ;;  %v934_v2 = vld [vmem:[%s10319_s5 + $0xd98] sm:$0xff]  ;;  %v1724_v3 = vld [vmem:[%s10319_s5 + $0x2648] sm:$0xff] }
 0x19b   :  { %2583 = vmatprep.subr.mxu1 %v1091_v4  ;;  %2233 = vmatpush1.msra.mxu0 %v1476_v6  ;;  %v922_v4 = vld [vmem:[%s10319_s5 + $0xd38] sm:$0xff]  ;;  %v1723_v6 = vld [vmem:[%s10319_s5 + $0x2640] sm:$0xff] }
 0x19c   :  { %2584 = vmatpush1.msra.mxu1 %v1090_v10  ;;  %2234 = vmatprep.subr.mxu0 %v1464_v11  ;;  %v921_v10 = vld [vmem:[%s10319_s5 + $0xd30] sm:$0xff]  ;;  %v1711_v11 = vld [vmem:[%s10319_s5 + $0x25e0] sm:$0xff] }
 0x19d   :  { %2585 = vmatprep.subr.mxu1 %v1078_v14  ;;  %2235 = vmatpush1.msra.mxu0 %v1463_v15  ;;  %v1325_v14 = vld [vmem:[%s10319_s5 + $0x19d0] sm:$0xff]  ;;  %v1710_v15 = vld [vmem:[%s10319_s5 + $0x25d8] sm:$0xff] }
 0x19e   :  { %2586 = vmatpush1.msra.mxu1 %v1077_v16  ;;  %2236 = vmatprep.subr.mxu0 %v1451_v18  ;;  %v1324_v16 = vld [vmem:[%s10319_s5 + $0x19c8] sm:$0xff]  ;;  %v1698_v18 = vld [vmem:[%s10319_s5 + $0x2578] sm:$0xff] }
 0x19f   :  { %2587 = vmatprep.subr.mxu1 %v1065_v19  ;;  %2237 = vmatpush1.msra.mxu0 %v1450_v20  ;;  %v1312_v19 = vld [vmem:[%s10319_s5 + $0x1968] sm:$0xff]  ;;  %v1697_v20 = vld [vmem:[%s10319_s5 + $0x2570] sm:$0xff] }
 0x1a0   :  { %2588 = vmatpush1.msra.mxu1 %v1064_v21  ;;  %2238 = vmatprep.subr.mxu0 %v1438_v22  ;;  %v1311_v21 = vld [vmem:[%s10319_s5 + $0x1960] sm:$0xff]  ;;  %v1685_v22 = vld [vmem:[%s10319_s5 + $0x2510] sm:$0xff] }
 0x1a1   :  { %2589 = vmatprep.subr.mxu1 %v1052_v23  ;;  %2239 = vmatpush1.msra.mxu0 %v1437_v26  ;;  %v1299_v23 = vld [vmem:[%s10319_s5 + $0x1900] sm:$0xff]  ;;  %v1684_v26 = vld [vmem:[%s10319_s5 + $0x2508] sm:$0xff] }
 0x1a2   :  { %2590 = vmatpush1.msra.mxu1 %v1051_v27  ;;  %2240 = vmatprep.subr.mxu0 %v1425_v30  ;;  %v1298_v27 = vld [vmem:[%s10319_s5 + $0x18f8] sm:$0xff]  ;;  %v1672_v30 = vld [vmem:[%s10319_s5 + $0x24a8] sm:$0xff] }
 0x1a3   :  { %2591 = vmatprep.subr.mxu1 %v1039_v31  ;;  %2241 = vmatpush1.msra.mxu0 %v1424_v32  ;;  %v1286_v31 = vld [vmem:[%s10319_s5 + $0x1898] sm:$0xff]  ;;  %v1671_v32 = vld [vmem:[%s10319_s5 + $0x24a0] sm:$0xff] }
 0x1a4   :  { %2592 = vmatpush1.msra.mxu1 %v1038_v33  ;;  %2242 = vmatprep.subr.mxu0 %v1412_v34  ;;  %v1285_v33 = vld [vmem:[%s10319_s5 + $0x1890] sm:$0xff]  ;;  %v1659_v34 = vld [vmem:[%s10319_s5 + $0x2440] sm:$0xff] }
 0x1a5   :  { %2593 = vmatprep.subr.mxu1 %v1026_v35  ;;  %2243 = vmatpush1.msra.mxu0 %v1411_v36  ;;  %v1273_v35 = vld [vmem:[%s10319_s5 + $0x1830] sm:$0xff]  ;;  %v1658_v36 = vld [vmem:[%s10319_s5 + $0x2438] sm:$0xff] }
 0x1a6   :  { %2594 = vmatpush1.msra.mxu1 %v1025_v37  ;;  %2244 = vmatprep.subr.mxu0 %v1399_v38  ;;  %v1272_v37 = vld [vmem:[%s10319_s5 + $0x1828] sm:$0xff]  ;;  %v1646_v38 = vld [vmem:[%s10319_s5 + $0x23d8] sm:$0xff] }
 0x1a7   :  { %2595 = vmatprep.subr.mxu1 %v1013_v29  ;;  %2245 = vmatpush1.msra.mxu0 %v1398_v39  ;;  %v1260_v29 = vld [vmem:[%s10319_s5 + $0x17c8] sm:$0xff]  ;;  %v1645_v39 = vld [vmem:[%s10319_s5 + $0x23d0] sm:$0xff] }
 0x1a8   :  { %2596 = vmatpush1.msra.mxu1 %v1012_v40  ;;  %2246 = vmatprep.subr.mxu0 %v1386_v41  ;;  %v1259_v40 = vld [vmem:[%s10319_s5 + $0x17c0] sm:$0xff]  ;;  %v1633_v41 = vld [vmem:[%s10319_s5 + $0x2370] sm:$0xff] }
 0x1a9   :  { %2597 = vmatprep.subr.mxu1 %v1000_v42  ;;  %2247 = vmatpush1.msra.mxu0 %v1385_v43  ;;  %v1247_v42 = vld [vmem:[%s10319_s5 + $0x1760] sm:$0xff]  ;;  %v1632_v43 = vld [vmem:[%s10319_s5 + $0x2368] sm:$0xff] }
 0x1aa   :  { %2598 = vmatpush1.msra.mxu1 %v999_v44  ;;  %2248 = vmatprep.subr.mxu0 %v1373_v45  ;;  %v1246_v44 = vld [vmem:[%s10319_s5 + $0x1758] sm:$0xff]  ;;  %v1620_v45 = vld [vmem:[%s10319_s5 + $0x2308] sm:$0xff] }
 0x1ab   :  { %2599 = vmatprep.subr.mxu1 %v987_v46  ;;  %2249 = vmatpush1.msra.mxu0 %v1372_v47  ;;  %v1234_v46 = vld [vmem:[%s10319_s5 + $0x16f8] sm:$0xff]  ;;  %v1619_v47 = vld [vmem:[%s10319_s5 + $0x2300] sm:$0xff] }
 0x1ac   :  { %2600 = vmatpush1.msra.mxu1 %v986_v48  ;;  %2250 = vmatprep.subr.mxu0 %v1360_v49  ;;  %v1233_v48 = vld [vmem:[%s10319_s5 + $0x16f0] sm:$0xff]  ;;  %v1607_v49 = vld [vmem:[%s10319_s5 + $0x22a0] sm:$0xff] }
 0x1ad   :  { %2601 = vmatprep.subr.mxu1 %v974_v50  ;;  %2251 = vmatpush1.msra.mxu0 %v1359_v51  ;;  %v1221_v50 = vld [vmem:[%s10319_s5 + $0x1690] sm:$0xff] }
 0x1ae   :  { %2602 = vmatpush1.msra.mxu1 %v973_v53  ;;  %2252 = vmatprep.subr.mxu0 %v1347_v54  ;;  %v1606_v53 = vld [vmem:[%s10319_s5 + $0x2298] sm:$0xff]  ;;  %v1220_v54 = vld [vmem:[%s10319_s5 + $0x1688] sm:$0xff] }
 0x1af   :  { %2603 = vmatprep.subr.mxu1 %v961_v55  ;;  %2253 = vmatpush1.msra.mxu0 %v1346_v56  ;;  %v1594_v55 = vld [vmem:[%s10319_s5 + $0x2238] sm:$0xff]  ;;  %v1208_v56 = vld [vmem:[%s10319_s5 + $0x1628] sm:$0xff] }
 0x1b0   :  { %2604 = vmatpush1.msra.mxu1 %v960_v57  ;;  %2254 = vmatprep.subr.mxu0 %v1334_v58  ;;  %v1593_v58 = vld [vmem:[%s10319_s5 + $0x2230] sm:$0xff] }
 0x1b1   :  { %2605 = vmatprep.subr.mxu1 %v948_v59  ;;  %2255 = vmatpush1.msra.mxu0 %v1333_v61  ;;  %v1207_v59 = vld [vmem:[%s10319_s5 + $0x1620] sm:$0xff] }
 0x1b2   :  { %2606 = vmatpush1.msra.mxu1 %v947_v62  ;;  %2256 = vmatprep.subr.mxu0 %v1737_v63  ;;  %v4596_v62 = vld [vmem:[%s10318_s4] ss:$0 sm:$0xff]  ;;  %v1581_v63 = vld [vmem:[%s10319_s5 + $0x21d0] sm:$0xff] }
 0x1b3   :  { %2607 = vmatprep.subr.mxu1 %v935_v0  ;;  %2257 = vmatpush2.msra.mxu0 %v1736_v1  ;;  %v1195_v0 = vld [vmem:[%s10319_s5 + $0x15c0] sm:$0xff]  ;;  %v1580_v1 = vld [vmem:[%s10319_s5 + $0x21c8] sm:$0xff] }
 0x1b4   :  { %2608 = vmatpush1.msra.mxu1 %v934_v2  ;;  %2258 = vmatprep.subr.mxu0 %v1724_v3  ;;  %v1194_v2 = vld [vmem:[%s10319_s5 + $0x15b8] sm:$0xff]  ;;  %v1568_v3 = vld [vmem:[%s10319_s5 + $0x2168] sm:$0xff] }
 0x1b5   :  { %2609 = vmatprep.subr.mxu1 %v922_v4  ;;  %2259 = vmatpush2.msra.mxu0 %v1723_v6  ;;  %v1182_v4 = vld [vmem:[%s10319_s5 + $0x1558] sm:$0xff] }
 0x1b6   :  { %2610 = vmatpush1.msra.mxu1 %v921_v10  ;;  %2260 = vmatprep.subr.mxu0 %v1711_v11  ;;  %v1567_v10 = vld [vmem:[%s10319_s5 + $0x2160] sm:$0xff]  ;;  %v1181_v11 = vld [vmem:[%s10319_s5 + $0x1550] sm:$0xff] }
 0x1b7   :  { %2611 = vmatprep.subr.mxu1 %v1325_v14  ;;  %2261 = vmatpush2.msra.mxu0 %v1710_v15  ;;  %v1555_v14 = vld [vmem:[%s10319_s5 + $0x2100] sm:$0xff]  ;;  %v1169_v15 = vld [vmem:[%s10319_s5 + $0x14f0] sm:$0xff] }
 0x1b8   :  { %2612 = vmatpush2.msra.mxu1 %v1324_v16  ;;  %2262 = vmatprep.subr.mxu0 %v1698_v18  ;;  %v1554_v16 = vld [vmem:[%s10319_s5 + $0x20f8] sm:$0xff]  ;;  %v1168_v18 = vld [vmem:[%s10319_s5 + $0x14e8] sm:$0xff] }
 0x1b9   :  { %2613 = vmatprep.subr.mxu1 %v1312_v19  ;;  %2263 = vmatpush2.msra.mxu0 %v1697_v20  ;;  %v1542_v20 = vld [vmem:[%s10319_s5 + $0x2098] sm:$0xff] }
 0x1ba   :  { %2614 = vmatpush2.msra.mxu1 %v1311_v21  ;;  %2264 = vmatprep.subr.mxu0 %v1685_v22  ;;  %v1156_v21 = vld [vmem:[%s10319_s5 + $0x1488] sm:$0xff] }
 0x1bb   :  { %2615 = vmatprep.subr.mxu1 %v1299_v23  ;;  %2265 = vmatpush2.msra.mxu0 %v1684_v26  ;;  %v1541_v23 = vld [vmem:[%s10319_s5 + $0x2090] sm:$0xff]  ;;  %v1155_v26 = vld [vmem:[%s10319_s5 + $0x1480] sm:$0xff] }
 0x1bc   :  { %2616 = vmatpush2.msra.mxu1 %v1298_v27  ;;  %2266 = vmatprep.subr.mxu0 %v1672_v30  ;;  %v1115_v30 = vld [vmem:[%s10319_s5 + $0x1340] sm:$0xff] }
 0x1bd   :  { %2617 = vmatprep.subr.mxu1 %v1286_v31  ;;  %2267 = vmatpush2.msra.mxu0 %v1671_v32  ;;  %v1143_v31 = vld [vmem:[%s10319_s5 + $0x1420] sm:$0xff]  ;;  %v1114_v32 = vld [vmem:[%s10319_s5 + $0x1338] sm:$0xff] }
 0x1be   :  { %2618 = vmatpush2.msra.mxu1 %v1285_v33  ;;  %2268 = vmatprep.subr.mxu0 %v1659_v34  ;;  %v1142_v33 = vld [vmem:[%s10319_s5 + $0x1418] sm:$0xff] }
 0x1bf   :  { %2619 = vmatprep.subr.mxu1 %v1273_v35  ;;  %2269 = vmatpush2.msra.mxu0 %v1658_v36  ;;  %v1102_v34 = vld [vmem:[%s10319_s5 + $0x12d8] sm:$0xff]  ;;  %v1101_v36 = vld [vmem:[%s10319_s5 + $0x12d0] sm:$0xff] }
 0x1c0   :  { %2620 = vmatpush2.msra.mxu1 %v1272_v37  ;;  %2270 = vmatprep.subr.mxu0 %v1646_v38  ;;  %v1130_v35 = vld [vmem:[%s10319_s5 + $0x13b8] sm:$0xff]  ;;  %v1129_v37 = vld [vmem:[%s10319_s5 + $0x13b0] sm:$0xff] }
 0x1c1   :  { %2621 = vmatprep.subr.mxu1 %v1260_v29  ;;  %2271 = vmatpush2.msra.mxu0 %v1645_v39  ;;  %v1089_v38 = vld [vmem:[%s10319_s5 + $0x1270] sm:$0xff]  ;;  %v703_v29 = vld [vmem:[%s10319_s5 + $0x660] sm:$0xff]  ;;  %v1088_v39 = vld [vmem:[%s10319_s5 + $0x1268] sm:$0xff] }
 0x1c2   :  { %2622 = vmatpush2.msra.mxu1 %v1259_v40  ;;  %2272 = vmatprep.subr.mxu0 %v1633_v41  ;;  %v702_v40 = vld [vmem:[%s10319_s5 + $0x658] sm:$0xff]  ;;  %v1076_v41 = vld [vmem:[%s10319_s5 + $0x1208] sm:$0xff] }
 0x1c3   :  { %2623 = vmatprep.subr.mxu1 %v1247_v42  ;;  %2273 = vmatpush2.msra.mxu0 %v1632_v43  ;;  %v690_v42 = vld [vmem:[%s10319_s5 + $0x5f8] sm:$0xff]  ;;  %v1075_v43 = vld [vmem:[%s10319_s5 + $0x1200] sm:$0xff] }
 0x1c4   :  { %2624 = vmatpush2.msra.mxu1 %v1246_v44  ;;  %v4642_v51 = vpop.f32.mrf.mxu0  ;;  %2274 = vmatprep.subr.mxu0 %v1620_v45  ;;  %v689_v44 = vld [vmem:[%s10319_s5 + $0x5f0] sm:$0xff]  ;;  %v1063_v45 = vld [vmem:[%s10319_s5 + $0x11a0] sm:$0xff] }
 0x1c5   :  { %2625 = vmatprep.subr.mxu1 %v1234_v46  ;;  %2275 = vmatpush2.msra.mxu0 %v1619_v47  ;;  %v677_v46 = vld [vmem:[%s10319_s5 + $0x590] sm:$0xff]  ;;  %v1062_v47 = vld [vmem:[%s10319_s5 + $0x1198] sm:$0xff] }
 0x1c6   :  { %2626 = vmatpush2.msra.mxu1 %v1233_v48  ;;  %v4643_v57 = vpop.f32.mrf.mxu0  ;;  %2276 = vmatprep.subr.mxu0 %v1607_v49  ;;  %v676_v48 = vld [vmem:[%s10319_s5 + $0x588] sm:$0xff]  ;;  %v1050_v49 = vld [vmem:[%s10319_s5 + $0x1138] sm:$0xff] }
 0x1c7   :  { %2627 = vmatprep.subr.mxu1 %v1221_v50  ;;  %v4644_v61 = vadd.f32 %v4643_v57, %v4642_v51  ;;  %2277 = vmatpush2.msra.mxu0 %v1606_v53  ;;  %v664_v50 = vld [vmem:[%s10319_s5 + $0x528] sm:$0xff]  ;;  %v1049_v51 = vld [vmem:[%s10319_s5 + $0x1130] sm:$0xff]  ;;  %v663_v53 = vld [vmem:[%s10319_s5 + $0x520] sm:$0xff] }
 0x1c8   :  { %2628 = vmatpush2.msra.mxu1 %v1220_v54  ;;  %2278 = vmatprep.subr.mxu0 %v1594_v55  ;;  %v1037_v54 = vld [vmem:[%s10319_s5 + $0x10d0] sm:$0xff]  ;;  %v651_v55 = vld [vmem:[%s10319_s5 + $0x4c0] sm:$0xff]  ;;  %v650_v57 = vld [vmem:[%s10319_s5 + $0x4b8] sm:$0xff] }
 0x1c9   :  { %2629 = vmatprep.subr.mxu1 %v1208_v56  ;;  %2279 = vmatpush2.msra.mxu0 %v1593_v58  ;;  %v425_v6 = vadd.f32 %v4644_v61, %v4596_v62  ;;  %v1036_v56 = vld [vmem:[%s10319_s5 + $0x10c8] sm:$0xff]  ;;  %v1023_v61 = vld [vmem:[%s10319_s5 + $0x1060] sm:$0xff]  ;;  %v637_v62 = vld [vmem:[%s10319_s5 + $0x450] sm:$0xff] }
 0x1ca   :  { %2630 = vmatpush2.msra.mxu1 %v1207_v59  ;;  %2280 = vmatprep.subr.mxu0 %v1581_v63  ;;  %v1024_v58 = vld [vmem:[%s10319_s5 + $0x1068] sm:$0xff]  ;;  %v638_v59 = vld [vmem:[%s10319_s5 + $0x458] sm:$0xff]  ;;  %v1011_v63 = vld [vmem:[%s10319_s5 + $0x1000] sm:$0xff] }
 0x1cb   :  { %2631 = vmatprep.subr.mxu1 %v1195_v0  ;;  %2281 = vmatpush2.msra.mxu0 %v1580_v1  ;;  %v625_v0 = vld [vmem:[%s10319_s5 + $0x3f0] sm:$0xff]  ;;  %v1010_v1 = vld [vmem:[%s10319_s5 + $0xff8] sm:$0xff] }
 0x1cc   :  { %2632 = vmatpush2.msra.mxu1 %v1194_v2  ;;  %2282 = vmatprep.subr.mxu0 %v1568_v3  ;;  %v494_v19 = vpop.f32.mrf.mxu0  ;;  %v624_v2 = vld [vmem:[%s10319_s5 + $0x3e8] sm:$0xff]  ;;  %v998_v3 = vld [vmem:[%s10319_s5 + $0xf98] sm:$0xff] }
 0x1cd   :  { %2633 = vmatprep.subr.mxu1 %v1182_v4  ;;  %2283 = vmatpush2.msra.mxu0 %v1567_v10  ;;  %v7421_v22 = vadd.f32 %v494_v19, %v425_v6  ;;  %v612_v4 = vld [vmem:[%s10319_s5 + $0x388] sm:$0xff]  ;;  %v997_v6 = vld [vmem:[%s10319_s5 + $0xf90] sm:$0xff]  ;;  %v611_v10 = vld [vmem:[%s10319_s5 + $0x380] sm:$0xff] }
 0x1ce   :  { %2634 = vmatpush2.msra.mxu1 %v1181_v11  ;;  %2284 = vmatprep.subr.mxu0 %v1555_v14  ;;  %v5013_v27 = vpop.f32.mrf.mxu0  ;;  %v985_v11 = vld [vmem:[%s10319_s5 + $0xf30] sm:$0xff]  ;;  %v599_v14 = vld [vmem:[%s10319_s5 + $0x320] sm:$0xff]  ;;  %v586_v19 = vld [vmem:[%s10319_s5 + $0x2b8] sm:$0xff] }
 0x1cf   :  { %2635 = vmatprep.subr.mxu1 %v1169_v15  ;;  %2285 = vmatpush2.msra.mxu0 %v1554_v16  ;;  %v984_v15 = vld [vmem:[%s10319_s5 + $0xf28] sm:$0xff]  ;;  %v598_v16 = vld [vmem:[%s10319_s5 + $0x318] sm:$0xff] }
 0x1d0   :  { %2636 = vmatpush2.msra.mxu1 %v1168_v18  ;;  %2286 = vmatprep.subr.mxu0 %v1542_v20  ;;  %v972_v18 = vld [vmem:[%s10319_s5 + $0xec8] sm:$0xff]  ;;  %v971_v20 = vld [vmem:[%s10319_s5 + $0xec0] sm:$0xff]  ;;  %v958_v27 = vld [vmem:[%s10319_s5 + $0xe58] sm:$0xff] }
 0x1d1   :  { %2637 = vmatprep.subr.mxu1 %v1156_v21  ;;  %2287 = vmatpush2.msra.mxu0 %v1541_v23  ;;  %v585_v21 = vld [vmem:[%s10319_s5 + $0x2b0] sm:$0xff]  ;;  %v959_v23 = vld [vmem:[%s10319_s5 + $0xe60] sm:$0xff] }
 0x1d2   :  { %2638 = vmatpush2.msra.mxu1 %v1155_v26  ;;  %2289 = vmatmul.mubr.f32.vlgmr.msra.gmra.mxu0 %v6039_v25  ;;  %v573_v26 = vld [vmem:[%s10319_s5 + $0x250] sm:$0xff] }
 0x1d3   :  { %2366 = vmatprep.subr.mxu0 %v1115_v30  ;;  %2639 = vmatprep.subr.mxu1 %v1143_v31  ;;  %v572_v30 = vld [vmem:[%s10319_s5 + $0x248] sm:$0xff]  ;;  %v946_v31 = vld [vmem:[%s10319_s5 + $0xdf8] sm:$0xff] }
 0x1d4   :  { %2367 = vmatpush1.msra.mxu0 %v1114_v32  ;;  %2430 = vmatprep.mubr.f32.mxu0 %v6047_v17  ;;  %v560_v32 = vld [vmem:[%s10319_s5 + $0x1e8] sm:$0xff] }
 0x1d5   :  { %2640 = vmatpush2.msra.mxu1 %v1142_v33  ;;  %2368 = vmatprep.subr.mxu0 %v1102_v34  ;;  %v945_v33 = vld [vmem:[%s10319_s5 + $0xdf0] sm:$0xff]  ;;  %v559_v34 = vld [vmem:[%s10319_s5 + $0x1e0] sm:$0xff] }
 0x1d6   :  { %2641 = vmatprep.subr.mxu1 %v1130_v35  ;;  %2369 = vmatpush1.msra.mxu0 %v1101_v36  ;;  %v933_v35 = vld [vmem:[%s10319_s5 + $0xd90] sm:$0xff]  ;;  %v547_v36 = vld [vmem:[%s10319_s5 + $0x180] sm:$0xff] }
 0x1d7   :  { %2642 = vmatpush2.msra.mxu1 %v1129_v37  ;;  %2370 = vmatprep.subr.mxu0 %v1089_v38  ;;  %v932_v37 = vld [vmem:[%s10319_s5 + $0xd88] sm:$0xff]  ;;  %v546_v38 = vld [vmem:[%s10319_s5 + $0x178] sm:$0xff] }
 0x1d8   :  { %2644 = vmatmul.mubr.f32.vlgmr.msra.gmra.mxu1 %v5953_v52  ;;  %2721 = vmatprep.subr.mxu1 %v703_v29  ;;  %v920_v29 = vld [vmem:[%s10319_s5 + $0xd28] sm:$0xff] }
 0x1d9   :  { %2371 = vmatpush1.msra.mxu0 %v1088_v39  ;;  %2722 = vmatpush1.msra.mxu1 %v702_v40  ;;  %v534_v39 = vld [vmem:[%s10319_s5 + $0x118] sm:$0xff]  ;;  %v919_v40 = vld [vmem:[%s10319_s5 + $0xd20] sm:$0xff] }
 0x1da   :  { %2785 = vmatprep.mubr.f32.mxu1 %v5827_v8  ;;  %2372 = vmatprep.subr.mxu0 %v1076_v41  ;;  %v533_v41 = vld [vmem:[%s10319_s5 + $0x110] sm:$0xff] }
 0x1db   :  { %2723 = vmatprep.subr.mxu1 %v690_v42  ;;  %2373 = vmatpush1.msra.mxu0 %v1075_v43  ;;  %v1323_v42 = vld [vmem:[%s10319_s5 + $0x19c0] sm:$0xff]  ;;  %v521_v43 = vld [vmem:[%s10319_s5 + $0xb0] sm:$0xff] }
 0x1dc   :  { %2724 = vmatpush1.msra.mxu1 %v689_v44  ;;  %2374 = vmatprep.subr.mxu0 %v1063_v45  ;;  %v1322_v44 = vld [vmem:[%s10319_s5 + $0x19b8] sm:$0xff]  ;;  %v520_v45 = vld [vmem:[%s10319_s5 + $0xa8] sm:$0xff] }
 0x1dd   :  { %2725 = vmatprep.subr.mxu1 %v677_v46  ;;  %2375 = vmatpush1.msra.mxu0 %v1062_v47  ;;  %v1310_v46 = vld [vmem:[%s10319_s5 + $0x1958] sm:$0xff]  ;;  %v508_v47 = vld [vmem:[%s10319_s5 + $0x48] sm:$0xff] }
 0x1de   :  { %2726 = vmatpush1.msra.mxu1 %v676_v48  ;;  %2376 = vmatprep.subr.mxu0 %v1050_v49  ;;  %v1309_v48 = vld [vmem:[%s10319_s5 + $0x1950] sm:$0xff]  ;;  %v507_v49 = vld [vmem:[%s10319_s5 + $0x40] sm:$0xff] }
 0x1df   :  { %2727 = vmatprep.subr.mxu1 %v664_v50  ;;  %2377 = vmatpush1.msra.mxu0 %v1049_v51  ;;  %v1297_v50 = vld [vmem:[%s10319_s5 + $0x18f0] sm:$0xff]  ;;  %v911_v51 = vld [vmem:[%s10319_s5 + $0xce0] sm:$0xff] }
 0x1e0   :  { %2728 = vmatpush1.msra.mxu1 %v663_v53  ;;  %2378 = vmatprep.subr.mxu0 %v1037_v54  ;;  %v1296_v53 = vld [vmem:[%s10319_s5 + $0x18e8] sm:$0xff]  ;;  %v910_v54 = vld [vmem:[%s10319_s5 + $0xcd8] sm:$0xff] }
 0x1e1   :  { %2729 = vmatprep.subr.mxu1 %v651_v55  ;;  %2379 = vmatpush1.msra.mxu0 %v1036_v56  ;;  %v1284_v55 = vld [vmem:[%s10319_s5 + $0x1888] sm:$0xff]  ;;  %v898_v56 = vld [vmem:[%s10319_s5 + $0xc78] sm:$0xff] }
 0x1e2   :  { %2730 = vmatpush1.msra.mxu1 %v650_v57  ;;  %2380 = vmatprep.subr.mxu0 %v1024_v58  ;;  %v1283_v57 = vld [vmem:[%s10319_s5 + $0x1880] sm:$0xff]  ;;  %v897_v58 = vld [vmem:[%s10319_s5 + $0xc70] sm:$0xff] }
 0x1e3   :  { %2731 = vmatprep.subr.mxu1 %v638_v59  ;;  %2381 = vmatpush1.msra.mxu0 %v1023_v61  ;;  %v1271_v59 = vld [vmem:[%s10319_s5 + $0x1820] sm:$0xff]  ;;  %v885_v61 = vld [vmem:[%s10319_s5 + $0xc10] sm:$0xff] }
 0x1e4   :  { %2732 = vmatpush1.msra.mxu1 %v637_v62  ;;  %2382 = vmatprep.subr.mxu0 %v1011_v63  ;;  %v1270_v62 = vld [vmem:[%s10319_s5 + $0x1818] sm:$0xff]  ;;  %v884_v63 = vld [vmem:[%s10319_s5 + $0xc08] sm:$0xff] }
 0x1e5   :  { %2733 = vmatprep.subr.mxu1 %v625_v0  ;;  %2383 = vmatpush1.msra.mxu0 %v1010_v1  ;;  %v1258_v0 = vld [vmem:[%s10319_s5 + $0x17b8] sm:$0xff]  ;;  %v872_v1 = vld [vmem:[%s10319_s5 + $0xba8] sm:$0xff] }
 0x1e6   :  { %2734 = vmatpush1.msra.mxu1 %v624_v2  ;;  %2384 = vmatprep.subr.mxu0 %v998_v3  ;;  %v1257_v2 = vld [vmem:[%s10319_s5 + $0x17b0] sm:$0xff]  ;;  %v871_v3 = vld [vmem:[%s10319_s5 + $0xba0] sm:$0xff] }
 0x1e7   :  { %2735 = vmatprep.subr.mxu1 %v612_v4  ;;  %2385 = vmatpush1.msra.mxu0 %v997_v6  ;;  %v1245_v4 = vld [vmem:[%s10319_s5 + $0x1750] sm:$0xff]  ;;  %v859_v6 = vld [vmem:[%s10319_s5 + $0xb40] sm:$0xff] }
 0x1e8   :  { %2736 = vmatpush1.msra.mxu1 %v611_v10  ;;  %2386 = vmatprep.subr.mxu0 %v985_v11  ;;  %v1244_v10 = vld [vmem:[%s10319_s5 + $0x1748] sm:$0xff]  ;;  %v858_v11 = vld [vmem:[%s10319_s5 + $0xb38] sm:$0xff] }
 0x1e9   :  { %2737 = vmatprep.subr.mxu1 %v599_v14  ;;  %2387 = vmatpush1.msra.mxu0 %v984_v15  ;;  %v1232_v14 = vld [vmem:[%s10319_s5 + $0x16e8] sm:$0xff]  ;;  %v846_v15 = vld [vmem:[%s10319_s5 + $0xad8] sm:$0xff] }
 0x1ea   :  { %2738 = vmatpush1.msra.mxu1 %v598_v16  ;;  %2388 = vmatprep.subr.mxu0 %v972_v18  ;;  %v1231_v16 = vld [vmem:[%s10319_s5 + $0x16e0] sm:$0xff]  ;;  %v845_v18 = vld [vmem:[%s10319_s5 + $0xad0] sm:$0xff] }
 0x1eb   :  { %2739 = vmatprep.subr.mxu1 %v586_v19  ;;  %2389 = vmatpush1.msra.mxu0 %v971_v20  ;;  %v1219_v19 = vld [vmem:[%s10319_s5 + $0x1680] sm:$0xff]  ;;  %v833_v20 = vld [vmem:[%s10319_s5 + $0xa70] sm:$0xff] }
 0x1ec   :  { %2740 = vmatpush1.msra.mxu1 %v585_v21  ;;  %2390 = vmatprep.subr.mxu0 %v959_v23  ;;  %v1218_v21 = vld [vmem:[%s10319_s5 + $0x1678] sm:$0xff]  ;;  %v832_v23 = vld [vmem:[%s10319_s5 + $0xa68] sm:$0xff] }
 0x1ed   :  { %2741 = vmatprep.subr.mxu1 %v573_v26  ;;  %2391 = vmatpush1.msra.mxu0 %v958_v27  ;;  %v1206_v26 = vld [vmem:[%s10319_s5 + $0x1618] sm:$0xff]  ;;  %v820_v27 = vld [vmem:[%s10319_s5 + $0xa08] sm:$0xff] }
 0x1ee   :  { %2742 = vmatpush1.msra.mxu1 %v572_v30  ;;  %2392 = vmatprep.subr.mxu0 %v946_v31  ;;  %v1205_v30 = vld [vmem:[%s10319_s5 + $0x1610] sm:$0xff]  ;;  %v819_v31 = vld [vmem:[%s10319_s5 + $0xa00] sm:$0xff] }
 0x1ef   :  { %2743 = vmatprep.subr.mxu1 %v560_v32  ;;  %2393 = vmatpush1.msra.mxu0 %v945_v33  ;;  %v1193_v32 = vld [vmem:[%s10319_s5 + $0x15b0] sm:$0xff]  ;;  %v807_v33 = vld [vmem:[%s10319_s5 + $0x9a0] sm:$0xff] }
 0x1f0   :  { %2744 = vmatpush1.msra.mxu1 %v559_v34  ;;  %2394 = vmatprep.subr.mxu0 %v933_v35  ;;  %v1747_v34 = vld [vmem:[%s10320_s6] sm:$0xff]  ;;  %v1192_v35 = vld [vmem:[%s10319_s5 + $0x15a8] sm:$0xff] }
 0x1f1   :  { %2745 = vmatprep.subr.mxu1 %v547_v36  ;;  %2395 = vmatpush1.msra.mxu0 %v932_v37  ;;  %v806_v36 = vld [vmem:[%s10319_s5 + $0x998] sm:$0xff]  ;;  %v1180_v37 = vld [vmem:[%s10319_s5 + $0x1548] sm:$0xff] }
 0x1f2   :  { %2746 = vmatpush1.msra.mxu1 %v546_v38  ;;  %2396 = vmatprep.subr.mxu0 %v920_v29  ;;  %v794_v38 = vld [vmem:[%s10319_s5 + $0x938] sm:$0xff]  ;;  %v1179_v29 = vld [vmem:[%s10319_s5 + $0x1540] sm:$0xff] }
 0x1f3   :  { %2747 = vmatprep.subr.mxu1 %v534_v39  ;;  %2397 = vmatpush1.msra.mxu0 %v919_v40  ;;  %v793_v39 = vld [vmem:[%s10319_s5 + $0x930] sm:$0xff]  ;;  %v1754_v40 = vrot.slane %v1747_v34, %v6172_v7 }
 0x1f4   :  { %2748 = vmatpush1.msra.mxu1 %v533_v41  ;;  %2398 = vmatprep.subr.mxu0 %v1323_v42  ;;  %v1167_v41 = vld [vmem:[%s10319_s5 + $0x14e0] sm:$0xff]  ;;  %v781_v42 = vld [vmem:[%s10319_s5 + $0x8d0] sm:$0xff] }
 0x1f5   :  { %2749 = vmatprep.subr.mxu1 %v521_v43  ;;  %2399 = vmatpush2.msra.mxu0 %v1322_v44  ;;  %v1935_v43 = vpop.f32.mrf.mxu1  ;;  %v1166_v44 = vld [vmem:[%s10319_s5 + $0x14d8] sm:$0xff] }
 0x1f6   :  { %2750 = vmatpush1.msra.mxu1 %v520_v45  ;;  %2400 = vmatprep.subr.mxu0 %v1310_v46  ;;  %v780_v45 = vld [vmem:[%s10319_s5 + $0x8c8] sm:$0xff]  ;;  %v1758_v46 = vrot.slane %v1747_v34, %v6181_v13 }
 0x1f7   :  { %2751 = vmatprep.subr.mxu1 %v508_v47  ;;  %2401 = vmatpush2.msra.mxu0 %v1309_v48  ;;  %v1154_v47 = vld [vmem:[%s10319_s5 + $0x1478] sm:$0xff]  ;;  %v768_v48 = vld [vmem:[%s10319_s5 + $0x868] sm:$0xff] }
 0x1f8   :  { %2752 = vmatpush1.msra.mxu1 %v507_v49  ;;  %2402 = vmatprep.subr.mxu0 %v1297_v50  ;;  %v1153_v49 = vld [vmem:[%s10319_s5 + $0x1470] sm:$0xff]  ;;  %v767_v50 = vld [vmem:[%s10319_s5 + $0x860] sm:$0xff]  ;;  %v648_v34 = vld [vmem:[%s10319_s5 + $0x4a8] sm:$0xff] }
 0x1f9   :  { %2753 = vmatprep.subr.mxu1 %v911_v51  ;;  %2403 = vmatpush2.msra.mxu0 %v1296_v53  ;;  %v1936_v51 = vadd.f32 %v1935_v43, %v1754_v40  ;;  %v1141_v53 = vld [vmem:[%s10319_s5 + $0x1410] sm:$0xff]  ;;  %v1483_v40 = vld [vmem:[%s10319_s5 + $0x1ec0] sm:$0xff]  ;;  %v610_v43 = vld [vmem:[%s10319_s5 + $0x378] sm:$0xff] }
 0x1fa   :  { %2754 = vmatpush2.msra.mxu1 %v910_v54  ;;  %2404 = vmatprep.subr.mxu0 %v1284_v55  ;;  %v755_v54 = vld [vmem:[%s10319_s5 + $0x800] sm:$0xff]  ;;  %v1937_v55 = vpop.f32.mrf.mxu1 }
 0x1fb   :  { %2755 = vmatprep.subr.mxu1 %v898_v56  ;;  %2405 = vmatpush2.msra.mxu0 %v1283_v57  ;;  %v1140_v56 = vld [vmem:[%s10319_s5 + $0x1408] sm:$0xff]  ;;  %v754_v57 = vld [vmem:[%s10319_s5 + $0x7f8] sm:$0xff] }
 0x1fc   :  { %2756 = vmatpush2.msra.mxu1 %v897_v58  ;;  %2406 = vmatprep.subr.mxu0 %v1271_v59  ;;  %v1938_v59 = vadd.f32 %v1937_v55, %v1758_v46  ;;  %v1469_v46 = vld [vmem:[%s10319_s5 + $0x1e50] sm:$0xff]  ;;  %v1443_v55 = vld [vmem:[%s10319_s5 + $0x1d80] sm:$0xff] }
 0x1fd   :  { %2757 = vmatprep.subr.mxu1 %v885_v61  ;;  %2407 = vmatpush2.msra.mxu0 %v1270_v62  ;;  %v1128_v61 = vld [vmem:[%s10319_s5 + $0x13a8] sm:$0xff]  ;;  %v742_v62 = vld [vmem:[%s10319_s5 + $0x798] sm:$0xff] }
 0x1fe   :  { %2758 = vmatpush2.msra.mxu1 %v884_v63  ;;  %2408 = vmatprep.subr.mxu0 %v1258_v0  ;;  %v1127_v0 = vld [vmem:[%s10319_s5 + $0x13a0] sm:$0xff] }
 0x1ff   :  { %2759 = vmatprep.subr.mxu1 %v872_v1  ;;  %2409 = vmatpush2.msra.mxu0 %v1257_v2  ;;  %v741_v1 = vld [vmem:[%s10319_s5 + $0x790] sm:$0xff] }
 0x200   :  { %2760 = vmatpush2.msra.mxu1 %v871_v3  ;;  %2410 = vmatprep.subr.mxu0 %v1245_v4  ;;  %v701_v3 = vld [vmem:[%s10319_s5 + $0x650] sm:$0xff] }
 0x201   :  { %2761 = vmatprep.subr.mxu1 %v859_v6  ;;  %2411 = vmatpush2.msra.mxu0 %v1244_v10  ;;  %v729_v6 = vld [vmem:[%s10319_s5 + $0x730] sm:$0xff]  ;;  %v700_v10 = vld [vmem:[%s10319_s5 + $0x648] sm:$0xff] }
 0x202   :  { %2762 = vmatpush2.msra.mxu1 %v858_v11  ;;  %2412 = vmatprep.subr.mxu0 %v1232_v14  ;;  %v728_v11 = vld [vmem:[%s10319_s5 + $0x728] sm:$0xff] }
 0x203   :  { %2763 = vmatprep.subr.mxu1 %v846_v15  ;;  %2413 = vmatpush2.msra.mxu0 %v1231_v16  ;;  %v688_v14 = vld [vmem:[%s10319_s5 + $0x5e8] sm:$0xff]  ;;  %v687_v16 = vld [vmem:[%s10319_s5 + $0x5e0] sm:$0xff] }
 0x204   :  { %2764 = vmatpush2.msra.mxu1 %v845_v18  ;;  %2414 = vmatprep.subr.mxu0 %v1219_v19  ;;  %v716_v15 = vld [vmem:[%s10319_s5 + $0x6c8] sm:$0xff]  ;;  %v715_v18 = vld [vmem:[%s10319_s5 + $0x6c0] sm:$0xff] }
 0x205   :  { %2765 = vmatprep.subr.mxu1 %v833_v20  ;;  %2415 = vmatpush2.msra.mxu0 %v1218_v21  ;;  %v675_v19 = vld [vmem:[%s10319_s5 + $0x580] sm:$0xff]  ;;  %v674_v21 = vld [vmem:[%s10319_s5 + $0x578] sm:$0xff] }
 0x206   :  { %2766 = vmatpush2.msra.mxu1 %v832_v23  ;;  %2416 = vmatprep.subr.mxu0 %v1206_v26  ;;  %v1535_v20 = vld [vmem:[%s10319_s5 + $0x2060] sm:$0xff]  ;;  %v1534_v23 = vld [vmem:[%s10319_s5 + $0x2058] sm:$0xff] }
 0x207   :  { %2767 = vmatprep.subr.mxu1 %v820_v27  ;;  %2417 = vmatpush2.msra.mxu0 %v1205_v30  ;;  %v662_v26 = vld [vmem:[%s10319_s5 + $0x518] sm:$0xff]  ;;  %v661_v30 = vld [vmem:[%s10319_s5 + $0x510] sm:$0xff] }
 0x208   :  { %2768 = vmatpush2.msra.mxu1 %v819_v31  ;;  %2418 = vmatprep.subr.mxu0 %v1193_v32  ;;  %v1522_v27 = vld [vmem:[%s10319_s5 + $0x1ff8] sm:$0xff]  ;;  %v1521_v31 = vld [vmem:[%s10319_s5 + $0x1ff0] sm:$0xff] }
 0x209   :  { %2769 = vmatprep.subr.mxu1 %v807_v33  ;;  %2419 = vmatpush2.msra.mxu0 %v1192_v35  ;;  %v649_v32 = vld [vmem:[%s10319_s5 + $0x4b0] sm:$0xff]  ;;  %v1508_v35 = vld [vmem:[%s10319_s5 + $0x1f88] sm:$0xff] }
 0x20a   :  { %2770 = vmatpush2.msra.mxu1 %v806_v36  ;;  %2420 = vmatprep.subr.mxu0 %v1180_v37  ;;  %v1509_v33 = vld [vmem:[%s10319_s5 + $0x1f90] sm:$0xff]  ;;  %v636_v36 = vld [vmem:[%s10319_s5 + $0x448] sm:$0xff] }
 0x20b   :  { %2771 = vmatprep.subr.mxu1 %v794_v38  ;;  %2421 = vmatpush2.msra.mxu0 %v1179_v29  ;;  %v1496_v37 = vld [vmem:[%s10319_s5 + $0x1f28] sm:$0xff]  ;;  %v635_v38 = vld [vmem:[%s10319_s5 + $0x440] sm:$0xff] }
 0x20c   :  { %2772 = vmatpush2.msra.mxu1 %v793_v39  ;;  %2422 = vmatprep.subr.mxu0 %v1167_v41  ;;  %v1495_v29 = vld [vmem:[%s10319_s5 + $0x1f20] sm:$0xff]  ;;  %v622_v41 = vld [vmem:[%s10319_s5 + $0x3d8] sm:$0xff] }
 0x20d   :  { %2773 = vmatprep.subr.mxu1 %v781_v42  ;;  %2423 = vmatpush2.msra.mxu0 %v1166_v44  ;;  %v623_v39 = vld [vmem:[%s10319_s5 + $0x3e0] sm:$0xff]  ;;  %v1482_v42 = vld [vmem:[%s10319_s5 + $0x1eb8] sm:$0xff] }
 0x20e   :  { %2774 = vmatpush2.msra.mxu1 %v780_v45  ;;  %2424 = vmatprep.subr.mxu0 %v1154_v47  ;;  %v2006_v58 = vpop.f32.mrf.mxu0  ;;  %v1470_v44 = vld [vmem:[%s10319_s5 + $0x1e58] sm:$0xff]  ;;  %v609_v45 = vld [vmem:[%s10319_s5 + $0x370] sm:$0xff] }
 0x20f   :  { %2775 = vmatprep.subr.mxu1 %v768_v48  ;;  %2425 = vmatpush2.msra.mxu0 %v1153_v49  ;;  %v7816_v63 = vadd.f32 %v2006_v58, %v1936_v51  ;;  %v597_v47 = vld [vmem:[%s10319_s5 + $0x310] sm:$0xff]  ;;  %v596_v49 = vld [vmem:[%s10319_s5 + $0x308] sm:$0xff]  ;;  %v570_v58 = vld [vmem:[%s10319_s5 + $0x238] sm:$0xff] }
 0x210   :  { %2776 = vmatpush2.msra.mxu1 %v767_v50  ;;  %2426 = vmatprep.subr.mxu0 %v1141_v53  ;;  %v2008_v2 = vpop.f32.mrf.mxu0  ;;  %v1457_v48 = vld [vmem:[%s10319_s5 + $0x1df0] sm:$0xff]  ;;  %v1456_v50 = vld [vmem:[%s10319_s5 + $0x1de8] sm:$0xff] }
 0x211   :  { %2777 = vmatprep.subr.mxu1 %v755_v54  ;;  %2427 = vmatpush2.msra.mxu0 %v1140_v56  ;;  %v7827_v4 = vadd.f32 %v2008_v2, %v1938_v59  ;;  %v584_v51 = vld [vmem:[%s10319_s5 + $0x2a8] sm:$0xff]  ;;  %v583_v54 = vld [vmem:[%s10319_s5 + $0x2a0] sm:$0xff]  ;;  %v1430_v59 = vld [vmem:[%s10319_s5 + $0x1d18] sm:$0xff] }
 0x212   :  { %2778 = vmatpush2.msra.mxu1 %v754_v57  ;;  %2428 = vmatprep.subr.mxu0 %v1128_v61  ;;  %v1444_v53 = vld [vmem:[%s10319_s5 + $0x1d88] sm:$0xff]  ;;  %v571_v56 = vld [vmem:[%s10319_s5 + $0x240] sm:$0xff]  ;;  %v558_v61 = vld [vmem:[%s10319_s5 + $0x1d8] sm:$0xff] }
 0x213   :  { %2779 = vmatprep.subr.mxu1 %v742_v62  ;;  %2429 = vmatpush2.msra.mxu0 %v1127_v0  ;;  %v1431_v57 = vld [vmem:[%s10319_s5 + $0x1d20] sm:$0xff]  ;;  %v1418_v62 = vld [vmem:[%s10319_s5 + $0x1cb8] sm:$0xff]  ;;  %v557_v0 = vld [vmem:[%s10319_s5 + $0x1d0] sm:$0xff] }
 0x214   :  { %2780 = vmatpush2.msra.mxu1 %v741_v1  ;;  %2431 = vmatmul.mubr.f32.vlgmr.msra.gmra.mxu0 %v5953_v52  ;;  %v1417_v1 = vld [vmem:[%s10319_s5 + $0x1cb0] sm:$0xff] }
 0x215   :  { %2508 = vmatprep.subr.mxu0 %v701_v3  ;;  %2781 = vmatprep.subr.mxu1 %v729_v6  ;;  %v545_v2 = vld [vmem:[%s10319_s5 + $0x170] sm:$0xff]  ;;  %v544_v6 = vld [vmem:[%s10319_s5 + $0x168] sm:$0xff] }
 0x216   :  { %2509 = vmatpush1.msra.mxu0 %v700_v10  ;;  %2572 = vmatprep.mubr.f32.mxu0 %v5827_v8  ;;  %v1405_v3 = vld [vmem:[%s10319_s5 + $0x1c50] sm:$0xff]  ;;  %v1404_v10 = vld [vmem:[%s10319_s5 + $0x1c48] sm:$0xff] }
 0x217   :  { %2782 = vmatpush2.msra.mxu1 %v728_v11  ;;  %2510 = vmatprep.subr.mxu0 %v688_v14  ;;  %v532_v11 = vld [vmem:[%s10319_s5 + $0x108] sm:$0xff] }
 0x218   :  { %2783 = vmatprep.subr.mxu1 %v716_v15  ;;  %2511 = vmatpush1.msra.mxu0 %v687_v16  ;;  %v1392_v14 = vld [vmem:[%s10319_s5 + $0x1be8] sm:$0xff]  ;;  %v531_v15 = vld [vmem:[%s10319_s5 + $0x100] sm:$0xff] }
 0x219   :  { %2784 = vmatpush2.msra.mxu1 %v715_v18  ;;  %2512 = vmatprep.subr.mxu0 %v675_v19  ;;  %v1391_v16 = vld [vmem:[%s10319_s5 + $0x1be0] sm:$0xff] }
 0x21a   :  { %2786 = vmatmul.mubr.f32.vlgmr.msra.gmra.mxu1 %v5834_v12  ;;  %2863 = vmatprep.subr.mxu1 %v1535_v20  ;;  %v519_v18 = vld [vmem:[%s10319_s5 + $0xa0] sm:$0xff]  ;;  %v518_v20 = vld [vmem:[%s10319_s5 + $0x98] sm:$0xff] }
 0x21b   :  { %2513 = vmatpush1.msra.mxu0 %v674_v21  ;;  %2864 = vmatpush1.msra.mxu1 %v1534_v23  ;;  %v1379_v19 = vld [vmem:[%s10319_s5 + $0x1b80] sm:$0xff]  ;;  %v1378_v21 = vld [vmem:[%s10319_s5 + $0x1b78] sm:$0xff] }
 0x21c   :  { %2927 = vmatprep.mubr.f32.mxu1 %v5968_v60  ;;  %2514 = vmatprep.subr.mxu0 %v662_v26  ;;  %v506_v23 = vld [vmem:[%s10319_s5 + $0x38] sm:$0xff] }
 0x21d   :  { %2865 = vmatprep.subr.mxu1 %v1522_v27  ;;  %2515 = vmatpush1.msra.mxu0 %v661_v30  ;;  %v1366_v26 = vld [vmem:[%s10319_s5 + $0x1b18] sm:$0xff]  ;;  %v505_v27 = vld [vmem:[%s10319_s5 + $0x30] sm:$0xff] }
 0x21e   :  { %2866 = vmatpush1.msra.mxu1 %v1521_v31  ;;  %2516 = vmatprep.subr.mxu0 %v649_v32  ;;  %v1365_v30 = vld [vmem:[%s10319_s5 + $0x1b10] sm:$0xff] }
 0x21f   :  { %2867 = vmatprep.subr.mxu1 %v1509_v33  ;;  %2517 = vmatpush1.msra.mxu0 %v648_v34  ;;  %v909_v31 = vld [vmem:[%s10319_s5 + $0xcd0] sm:$0xff]  ;;  %v908_v33 = vld [vmem:[%s10319_s5 + $0xcc8] sm:$0xff] }
 0x220   :  { %2868 = vmatpush1.msra.mxu1 %v1508_v35  ;;  %2518 = vmatprep.subr.mxu0 %v636_v36  ;;  %v1353_v32 = vld [vmem:[%s10319_s5 + $0x1ab0] sm:$0xff]  ;;  %v1352_v34 = vld [vmem:[%s10319_s5 + $0x1aa8] sm:$0xff] }
 0x221   :  { %2869 = vmatprep.subr.mxu1 %v1496_v37  ;;  %2519 = vmatpush1.msra.mxu0 %v635_v38  ;;  %v896_v35 = vld [vmem:[%s10319_s5 + $0xc68] sm:$0xff]  ;;  %v895_v37 = vld [vmem:[%s10319_s5 + $0xc60] sm:$0xff] }
 0x222   :  { %2870 = vmatpush1.msra.mxu1 %v1495_v29  ;;  %2520 = vmatprep.subr.mxu0 %v623_v39  ;;  %v1340_v36 = vld [vmem:[%s10319_s5 + $0x1a48] sm:$0xff]  ;;  %v1339_v38 = vld [vmem:[%s10319_s5 + $0x1a40] sm:$0xff] }
 0x223   :  { %2871 = vmatprep.subr.mxu1 %v1483_v40  ;;  %2521 = vmatpush1.msra.mxu0 %v622_v41  ;;  %v883_v29 = vld [vmem:[%s10319_s5 + $0xc00] sm:$0xff]  ;;  %v882_v40 = vld [vmem:[%s10319_s5 + $0xbf8] sm:$0xff] }
 0x224   :  { %2872 = vmatpush1.msra.mxu1 %v1482_v42  ;;  %2522 = vmatprep.subr.mxu0 %v610_v43  ;;  %v1743_v39 = vld [vmem:[%s10319_s5 + $0x26e0] sm:$0xff]  ;;  %v1742_v41 = vld [vmem:[%s10319_s5 + $0x26d8] sm:$0xff] }
 0x225   :  { %2873 = vmatprep.subr.mxu1 %v1470_v44  ;;  %2523 = vmatpush1.msra.mxu0 %v609_v45  ;;  %v870_v42 = vld [vmem:[%s10319_s5 + $0xb98] sm:$0xff]  ;;  %v869_v44 = vld [vmem:[%s10319_s5 + $0xb90] sm:$0xff] }
 0x226   :  { %2874 = vmatpush1.msra.mxu1 %v1469_v46  ;;  %2524 = vmatprep.subr.mxu0 %v597_v47  ;;  %v1730_v43 = vld [vmem:[%s10319_s5 + $0x2678] sm:$0xff]  ;;  %v1729_v45 = vld [vmem:[%s10319_s5 + $0x2670] sm:$0xff] }
 0x227   :  { %2875 = vmatprep.subr.mxu1 %v1457_v48  ;;  %2525 = vmatpush1.msra.mxu0 %v596_v49  ;;  %v857_v46 = vld [vmem:[%s10319_s5 + $0xb30] sm:$0xff]  ;;  %v856_v48 = vld [vmem:[%s10319_s5 + $0xb28] sm:$0xff] }
 0x228   :  { %2876 = vmatpush1.msra.mxu1 %v1456_v50  ;;  %2526 = vmatprep.subr.mxu0 %v584_v51  ;;  %v1717_v47 = vld [vmem:[%s10319_s5 + $0x2610] sm:$0xff]  ;;  %v1716_v49 = vld [vmem:[%s10319_s5 + $0x2608] sm:$0xff] }
 0x229   :  { %2877 = vmatprep.subr.mxu1 %v1444_v53  ;;  %2527 = vmatpush1.msra.mxu0 %v583_v54  ;;  %v844_v50 = vld [vmem:[%s10319_s5 + $0xac8] sm:$0xff]  ;;  %v843_v53 = vld [vmem:[%s10319_s5 + $0xac0] sm:$0xff] }
 0x22a   :  { %2878 = vmatpush1.msra.mxu1 %v1443_v55  ;;  %2528 = vmatprep.subr.mxu0 %v571_v56  ;;  %v1704_v51 = vld [vmem:[%s10319_s5 + $0x25a8] sm:$0xff]  ;;  %v1703_v54 = vld [vmem:[%s10319_s5 + $0x25a0] sm:$0xff] }
 0x22b   :  { %2879 = vmatprep.subr.mxu1 %v1431_v57  ;;  %2529 = vmatpush1.msra.mxu0 %v570_v58  ;;  %v831_v55 = vld [vmem:[%s10319_s5 + $0xa60] sm:$0xff]  ;;  %v830_v57 = vld [vmem:[%s10319_s5 + $0xa58] sm:$0xff] }
 0x22c   :  { %2880 = vmatpush1.msra.mxu1 %v1430_v59  ;;  %2530 = vmatprep.subr.mxu0 %v558_v61  ;;  %v1691_v56 = vld [vmem:[%s10319_s5 + $0x2540] sm:$0xff]  ;;  %v1690_v58 = vld [vmem:[%s10319_s5 + $0x2538] sm:$0xff] }
 0x22d   :  { %2881 = vmatprep.subr.mxu1 %v1418_v62  ;;  %2531 = vmatpush1.msra.mxu0 %v557_v0  ;;  %v818_v59 = vld [vmem:[%s10319_s5 + $0x9f8] sm:$0xff]  ;;  %v817_v62 = vld [vmem:[%s10319_s5 + $0x9f0] sm:$0xff] }
 0x22e   :  { %2882 = vmatpush1.msra.mxu1 %v1417_v1  ;;  %2532 = vmatprep.subr.mxu0 %v545_v2  ;;  %v1678_v61 = vld [vmem:[%s10319_s5 + $0x24d8] sm:$0xff]  ;;  %v1677_v0 = vld [vmem:[%s10319_s5 + $0x24d0] sm:$0xff] }
 0x22f   :  { %2883 = vmatprep.subr.mxu1 %v1405_v3  ;;  %2533 = vmatpush1.msra.mxu0 %v544_v6  ;;  %v805_v1 = vld [vmem:[%s10319_s5 + $0x990] sm:$0xff]  ;;  %v804_v3 = vld [vmem:[%s10319_s5 + $0x988] sm:$0xff] }
 0x230   :  { %2884 = vmatpush1.msra.mxu1 %v1404_v10  ;;  %2534 = vmatprep.subr.mxu0 %v532_v11  ;;  %v1665_v2 = vld [vmem:[%s10319_s5 + $0x2470] sm:$0xff]  ;;  %v1664_v6 = vld [vmem:[%s10319_s5 + $0x2468] sm:$0xff] }
 0x231   :  { %2885 = vmatprep.subr.mxu1 %v1392_v14  ;;  %2535 = vmatpush1.msra.mxu0 %v531_v15  ;;  %v792_v10 = vld [vmem:[%s10319_s5 + $0x928] sm:$0xff]  ;;  %v791_v14 = vld [vmem:[%s10319_s5 + $0x920] sm:$0xff] }
 0x232   :  { %2886 = vmatpush1.msra.mxu1 %v1391_v16  ;;  %2536 = vmatprep.subr.mxu0 %v519_v18  ;;  %v1652_v11 = vld [vmem:[%s10319_s5 + $0x2408] sm:$0xff]  ;;  %v1651_v15 = vld [vmem:[%s10319_s5 + $0x2400] sm:$0xff] }
 0x233   :  { %2887 = vmatprep.subr.mxu1 %v1379_v19  ;;  %2537 = vmatpush1.msra.mxu0 %v518_v20  ;;  %v779_v16 = vld [vmem:[%s10319_s5 + $0x8c0] sm:$0xff]  ;;  %v778_v19 = vld [vmem:[%s10319_s5 + $0x8b8] sm:$0xff] }
 0x234   :  { %2888 = vmatpush1.msra.mxu1 %v1378_v21  ;;  %2538 = vmatprep.subr.mxu0 %v506_v23  ;;  %v1639_v18 = vld [vmem:[%s10319_s5 + $0x23a0] sm:$0xff]  ;;  %v1638_v20 = vld [vmem:[%s10319_s5 + $0x2398] sm:$0xff] }
 0x235   :  { %2889 = vmatprep.subr.mxu1 %v1366_v26  ;;  %2539 = vmatpush1.msra.mxu0 %v505_v27  ;;  %v766_v21 = vld [vmem:[%s10319_s5 + $0x858] sm:$0xff]  ;;  %v765_v26 = vld [vmem:[%s10319_s5 + $0x850] sm:$0xff] }
 0x236   :  { %2890 = vmatpush1.msra.mxu1 %v1365_v30  ;;  %2540 = vmatprep.subr.mxu0 %v909_v31  ;;  %v1626_v23 = vld [vmem:[%s10319_s5 + $0x2338] sm:$0xff]  ;;  %v1625_v27 = vld [vmem:[%s10319_s5 + $0x2330] sm:$0xff] }
 0x237   :  { %2891 = vmatprep.subr.mxu1 %v1353_v32  ;;  %2541 = vmatpush2.msra.mxu0 %v908_v33  ;;  %v753_v30 = vld [vmem:[%s10319_s5 + $0x7f0] sm:$0xff]  ;;  %v752_v32 = vld [vmem:[%s10319_s5 + $0x7e8] sm:$0xff] }
 0x238   :  { %2892 = vmatpush1.msra.mxu1 %v1352_v34  ;;  %2542 = vmatprep.subr.mxu0 %v896_v35  ;;  %v1613_v31 = vld [vmem:[%s10319_s5 + $0x22d0] sm:$0xff]  ;;  %v1612_v33 = vld [vmem:[%s10319_s5 + $0x22c8] sm:$0xff] }
 0x239   :  { %2893 = vmatprep.subr.mxu1 %v1340_v36  ;;  %2543 = vmatpush2.msra.mxu0 %v895_v37  ;;  %v740_v34 = vld [vmem:[%s10319_s5 + $0x788] sm:$0xff]  ;;  %v739_v36 = vld [vmem:[%s10319_s5 + $0x780] sm:$0xff] }
 0x23a   :  { %2894 = vmatpush1.msra.mxu1 %v1339_v38  ;;  %2544 = vmatprep.subr.mxu0 %v883_v29  ;;  %v1600_v35 = vld [vmem:[%s10319_s5 + $0x2268] sm:$0xff]  ;;  %v1599_v37 = vld [vmem:[%s10319_s5 + $0x2260] sm:$0xff] }
 0x23b   :  { %2895 = vmatprep.subr.mxu1 %v1743_v39  ;;  %2545 = vmatpush2.msra.mxu0 %v882_v40  ;;  %v727_v38 = vld [vmem:[%s10319_s5 + $0x720] sm:$0xff]  ;;  %v726_v39 = vld [vmem:[%s10319_s5 + $0x718] sm:$0xff] }
 0x23c   :  { %2896 = vmatpush2.msra.mxu1 %v1742_v41  ;;  %2546 = vmatprep.subr.mxu0 %v870_v42  ;;  %v1587_v29 = vld [vmem:[%s10319_s5 + $0x2200] sm:$0xff]  ;;  %v1586_v40 = vld [vmem:[%s10319_s5 + $0x21f8] sm:$0xff] }
 0x23d   :  { %2897 = vmatprep.subr.mxu1 %v1730_v43  ;;  %2547 = vmatpush2.msra.mxu0 %v869_v44  ;;  %v714_v41 = vld [vmem:[%s10319_s5 + $0x6b8] sm:$0xff]  ;;  %v713_v43 = vld [vmem:[%s10319_s5 + $0x6b0] sm:$0xff] }
 0x23e   :  { %2898 = vmatpush2.msra.mxu1 %v1729_v45  ;;  %2548 = vmatprep.subr.mxu0 %v857_v46  ;;  %v1574_v42 = vld [vmem:[%s10319_s5 + $0x2198] sm:$0xff]  ;;  %v1573_v44 = vld [vmem:[%s10319_s5 + $0x2190] sm:$0xff] }
 0x23f   :  { %2899 = vmatprep.subr.mxu1 %v1717_v47  ;;  %2549 = vmatpush2.msra.mxu0 %v856_v48  ;;  %v1533_v45 = vld [vmem:[%s10319_s5 + $0x2050] sm:$0xff]  ;;  %v1532_v47 = vld [vmem:[%s10319_s5 + $0x2048] sm:$0xff] }
 0x240   :  { %2900 = vmatpush2.msra.mxu1 %v1716_v49  ;;  %2550 = vmatprep.subr.mxu0 %v844_v50  ;;  %v1561_v46 = vld [vmem:[%s10319_s5 + $0x2130] sm:$0xff]  ;;  %v1560_v48 = vld [vmem:[%s10319_s5 + $0x2128] sm:$0xff] }
 0x241   :  { %2901 = vmatprep.subr.mxu1 %v1704_v51  ;;  %2551 = vmatpush2.msra.mxu0 %v843_v53  ;;  %v1520_v49 = vld [vmem:[%s10319_s5 + $0x1fe8] sm:$0xff]  ;;  %v1519_v51 = vld [vmem:[%s10319_s5 + $0x1fe0] sm:$0xff] }
 0x242   :  { %2902 = vmatpush2.msra.mxu1 %v1703_v54  ;;  %2552 = vmatprep.subr.mxu0 %v831_v55  ;;  %v1548_v50 = vld [vmem:[%s10319_s5 + $0x20c8] sm:$0xff]  ;;  %v1547_v53 = vld [vmem:[%s10319_s5 + $0x20c0] sm:$0xff]  ;;  %v1121_v55 = vld [vmem:[%s10319_s5 + $0x1370] sm:$0xff] }
 0x243   :  { %2903 = vmatprep.subr.mxu1 %v1691_v56  ;;  %2553 = vmatpush2.msra.mxu0 %v830_v57  ;;  %v1507_v54 = vld [vmem:[%s10319_s5 + $0x1f80] sm:$0xff]  ;;  %v1506_v56 = vld [vmem:[%s10319_s5 + $0x1f78] sm:$0xff]  ;;  %v1120_v57 = vld [vmem:[%s10319_s5 + $0x1368] sm:$0xff] }
 0x244   :  { %2904 = vmatpush2.msra.mxu1 %v1690_v58  ;;  %2554 = vmatprep.subr.mxu0 %v818_v59  ;;  %v1494_v58 = vld [vmem:[%s10319_s5 + $0x1f18] sm:$0xff]  ;;  %v1108_v59 = vld [vmem:[%s10319_s5 + $0x1308] sm:$0xff] }
 0x245   :  { %2905 = vmatprep.subr.mxu1 %v1678_v61  ;;  %2555 = vmatpush2.msra.mxu0 %v817_v62  ;;  %v1493_v61 = vld [vmem:[%s10319_s5 + $0x1f10] sm:$0xff]  ;;  %v1107_v62 = vld [vmem:[%s10319_s5 + $0x1300] sm:$0xff] }
 0x246   :  { %2906 = vmatpush2.msra.mxu1 %v1677_v0  ;;  %2556 = vmatprep.subr.mxu0 %v805_v1  ;;  %v1481_v0 = vld [vmem:[%s10319_s5 + $0x1eb0] sm:$0xff]  ;;  %v1095_v1 = vld [vmem:[%s10319_s5 + $0x12a0] sm:$0xff] }
 0x247   :  { %2907 = vmatprep.subr.mxu1 %v1665_v2  ;;  %2557 = vmatpush2.msra.mxu0 %v804_v3  ;;  %v1480_v2 = vld [vmem:[%s10319_s5 + $0x1ea8] sm:$0xff]  ;;  %v1094_v3 = vld [vmem:[%s10319_s5 + $0x1298] sm:$0xff] }
 0x248   :  { %2908 = vmatpush2.msra.mxu1 %v1664_v6  ;;  %2558 = vmatprep.subr.mxu0 %v792_v10  ;;  %v1468_v6 = vld [vmem:[%s10319_s5 + $0x1e48] sm:$0xff]  ;;  %v1082_v10 = vld [vmem:[%s10319_s5 + $0x1238] sm:$0xff] }
 0x249   :  { %2909 = vmatprep.subr.mxu1 %v1652_v11  ;;  %2559 = vmatpush2.msra.mxu0 %v791_v14  ;;  %v1467_v11 = vld [vmem:[%s10319_s5 + $0x1e40] sm:$0xff]  ;;  %v1081_v14 = vld [vmem:[%s10319_s5 + $0x1230] sm:$0xff] }
 0x24a   :  { %2910 = vmatpush2.msra.mxu1 %v1651_v15  ;;  %2560 = vmatprep.subr.mxu0 %v779_v16  ;;  %v1455_v15 = vld [vmem:[%s10319_s5 + $0x1de0] sm:$0xff]  ;;  %v1069_v16 = vld [vmem:[%s10319_s5 + $0x11d0] sm:$0xff] }
 0x24b   :  { %2911 = vmatprep.subr.mxu1 %v1639_v18  ;;  %2561 = vmatpush2.msra.mxu0 %v778_v19  ;;  %v1454_v18 = vld [vmem:[%s10319_s5 + $0x1dd8] sm:$0xff]  ;;  %v1068_v19 = vld [vmem:[%s10319_s5 + $0x11c8] sm:$0xff] }
 0x24c   :  { %2912 = vmatpush2.msra.mxu1 %v1638_v20  ;;  %2562 = vmatprep.subr.mxu0 %v766_v21  ;;  %v1442_v20 = vld [vmem:[%s10319_s5 + $0x1d78] sm:$0xff]  ;;  %v1056_v21 = vld [vmem:[%s10319_s5 + $0x1168] sm:$0xff] }
 0x24d   :  { %2913 = vmatprep.subr.mxu1 %v1626_v23  ;;  %2563 = vmatpush2.msra.mxu0 %v765_v26  ;;  %v1441_v23 = vld [vmem:[%s10319_s5 + $0x1d70] sm:$0xff]  ;;  %v1055_v26 = vld [vmem:[%s10319_s5 + $0x1160] sm:$0xff] }
 0x24e   :  { %2914 = vmatpush2.msra.mxu1 %v1625_v27  ;;  %2564 = vmatprep.subr.mxu0 %v753_v30  ;;  %v1429_v27 = vld [vmem:[%s10319_s5 + $0x1d10] sm:$0xff]  ;;  %v1043_v30 = vld [vmem:[%s10319_s5 + $0x1100] sm:$0xff] }
 0x24f   :  { %2915 = vmatprep.subr.mxu1 %v1613_v31  ;;  %2565 = vmatpush2.msra.mxu0 %v752_v32  ;;  %v1428_v31 = vld [vmem:[%s10319_s5 + $0x1d08] sm:$0xff]  ;;  %v1042_v32 = vld [vmem:[%s10319_s5 + $0x10f8] sm:$0xff] }
 0x250   :  { %2916 = vmatpush2.msra.mxu1 %v1612_v33  ;;  %2566 = vmatprep.subr.mxu0 %v740_v34  ;;  %v1416_v33 = vld [vmem:[%s10319_s5 + $0x1ca8] sm:$0xff]  ;;  %v1030_v34 = vld [vmem:[%s10319_s5 + $0x1098] sm:$0xff] }
 0x251   :  { %2917 = vmatprep.subr.mxu1 %v1600_v35  ;;  %2567 = vmatpush2.msra.mxu0 %v739_v36  ;;  %v1415_v35 = vld [vmem:[%s10319_s5 + $0x1ca0] sm:$0xff]  ;;  %v1029_v36 = vld [vmem:[%s10319_s5 + $0x1090] sm:$0xff] }
 0x252   :  { %2918 = vmatpush2.msra.mxu1 %v1599_v37  ;;  %2568 = vmatprep.subr.mxu0 %v727_v38  ;;  %v1403_v37 = vld [vmem:[%s10319_s5 + $0x1c40] sm:$0xff]  ;;  %v1017_v38 = vld [vmem:[%s10319_s5 + $0x1030] sm:$0xff] }
 0x253   :  { %2919 = vmatprep.subr.mxu1 %v1587_v29  ;;  %2569 = vmatpush2.msra.mxu0 %v726_v39  ;;  %v1402_v29 = vld [vmem:[%s10319_s5 + $0x1c38] sm:$0xff]  ;;  %v1016_v39 = vld [vmem:[%s10319_s5 + $0x1028] sm:$0xff] }
 0x254   :  { %2920 = vmatpush2.msra.mxu1 %v1586_v40  ;;  %2570 = vmatprep.subr.mxu0 %v714_v41  ;;  %v1390_v40 = vld [vmem:[%s10319_s5 + $0x1bd8] sm:$0xff]  ;;  %v1004_v41 = vld [vmem:[%s10319_s5 + $0xfc8] sm:$0xff] }
 0x255   :  { %2921 = vmatprep.subr.mxu1 %v1574_v42  ;;  %2571 = vmatpush2.msra.mxu0 %v713_v43  ;;  %v1389_v42 = vld [vmem:[%s10319_s5 + $0x1bd0] sm:$0xff]  ;;  %v1003_v43 = vld [vmem:[%s10319_s5 + $0xfc0] sm:$0xff] }
 0x256   :  { %2922 = vmatpush2.msra.mxu1 %v1573_v44  ;;  %2573 = vmatmul.mubr.f32.vlgmr.msra.gmra.mxu0 %v5834_v12  ;;  %v1377_v44 = vld [vmem:[%s10319_s5 + $0x1b70] sm:$0xff] }
 0x257   :  { %2650 = vmatprep.subr.mxu0 %v1533_v45  ;;  %2923 = vmatprep.subr.mxu1 %v1561_v46  ;;  %v991_v45 = vld [vmem:[%s10319_s5 + $0xf60] sm:$0xff]  ;;  %v1376_v46 = vld [vmem:[%s10319_s5 + $0x1b68] sm:$0xff] }
 0x258   :  { %2651 = vmatpush1.msra.mxu0 %v1532_v47  ;;  %2714 = vmatprep.mubr.f32.mxu0 %v5968_v60  ;;  %v990_v47 = vld [vmem:[%s10319_s5 + $0xf58] sm:$0xff] }
 0x259   :  { %2924 = vmatpush2.msra.mxu1 %v1560_v48  ;;  %2652 = vmatprep.subr.mxu0 %v1520_v49  ;;  %v1364_v48 = vld [vmem:[%s10319_s5 + $0x1b08] sm:$0xff]  ;;  %v978_v49 = vld [vmem:[%s10319_s5 + $0xef8] sm:$0xff] }
 0x25a   :  { %2925 = vmatprep.subr.mxu1 %v1548_v50  ;;  %2653 = vmatpush1.msra.mxu0 %v1519_v51  ;;  %v1363_v50 = vld [vmem:[%s10319_s5 + $0x1b00] sm:$0xff]  ;;  %v977_v51 = vld [vmem:[%s10319_s5 + $0xef0] sm:$0xff] }
 0x25b   :  { %2926 = vmatpush2.msra.mxu1 %v1547_v53  ;;  %2654 = vmatprep.subr.mxu0 %v1507_v54  ;;  %v1351_v53 = vld [vmem:[%s10319_s5 + $0x1aa0] sm:$0xff]  ;;  %v965_v54 = vld [vmem:[%s10319_s5 + $0xe90] sm:$0xff] }
 0x25c   :  { %2928 = vmatmul.mubr.f32.vlgmr.msra.gmra.mxu1 %v6039_v25  ;;  %3005 = vmatprep.subr.mxu1 %v1121_v55  ;;  %v1350_v55 = vld [vmem:[%s10319_s5 + $0x1a98] sm:$0xff] }
 0x25d   :  { %2655 = vmatpush1.msra.mxu0 %v1506_v56  ;;  %3006 = vmatpush1.msra.mxu1 %v1120_v57  ;;  %v964_v56 = vld [vmem:[%s10319_s5 + $0xe88] sm:$0xff]  ;;  %v1338_v57 = vld [vmem:[%s10319_s5 + $0x1a38] sm:$0xff] }
 0x25e   :  { %3069 = vmatprep.mubr.f32.mxu1 %v6047_v17  ;;  %2656 = vmatprep.subr.mxu0 %v1494_v58  ;;  %v952_v58 = vld [vmem:[%s10319_s5 + $0xe28] sm:$0xff] }
 0x25f   :  { %3007 = vmatprep.subr.mxu1 %v1108_v59  ;;  %2657 = vmatpush1.msra.mxu0 %v1493_v61  ;;  %v1337_v59 = vld [vmem:[%s10319_s5 + $0x1a30] sm:$0xff]  ;;  %v951_v61 = vld [vmem:[%s10319_s5 + $0xe20] sm:$0xff] }
 0x260   :  { %3008 = vmatpush1.msra.mxu1 %v1107_v62  ;;  %2658 = vmatprep.subr.mxu0 %v1481_v0  ;;  %v1741_v62 = vld [vmem:[%s10319_s5 + $0x26d0] sm:$0xff]  ;;  %v939_v0 = vld [vmem:[%s10319_s5 + $0xdc0] sm:$0xff] }
 0x261   :  { %3009 = vmatprep.subr.mxu1 %v1095_v1  ;;  %2659 = vmatpush1.msra.mxu0 %v1480_v2  ;;  %v1740_v1 = vld [vmem:[%s10319_s5 + $0x26c8] sm:$0xff]  ;;  %v938_v2 = vld [vmem:[%s10319_s5 + $0xdb8] sm:$0xff] }
 0x262   :  { %3010 = vmatpush1.msra.mxu1 %v1094_v3  ;;  %2660 = vmatprep.subr.mxu0 %v1468_v6  ;;  %v1728_v3 = vld [vmem:[%s10319_s5 + $0x2668] sm:$0xff]  ;;  %v926_v6 = vld [vmem:[%s10319_s5 + $0xd58] sm:$0xff] }
 0x263   :  { %3011 = vmatprep.subr.mxu1 %v1082_v10  ;;  %2661 = vmatpush1.msra.mxu0 %v1467_v11  ;;  %v1727_v10 = vld [vmem:[%s10319_s5 + $0x2660] sm:$0xff]  ;;  %v925_v11 = vld [vmem:[%s10319_s5 + $0xd50] sm:$0xff] }
 0x264   :  { %3012 = vmatpush1.msra.mxu1 %v1081_v14  ;;  %2662 = vmatprep.subr.mxu0 %v1455_v15  ;;  %v1715_v14 = vld [vmem:[%s10319_s5 + $0x2600] sm:$0xff]  ;;  %v1329_v15 = vld [vmem:[%s10319_s5 + $0x19f0] sm:$0xff] }
 0x265   :  { %3013 = vmatprep.subr.mxu1 %v1069_v16  ;;  %2663 = vmatpush1.msra.mxu0 %v1454_v18  ;;  %v1714_v16 = vld [vmem:[%s10319_s5 + $0x25f8] sm:$0xff]  ;;  %v1328_v18 = vld [vmem:[%s10319_s5 + $0x19e8] sm:$0xff] }
 0x266   :  { %3014 = vmatpush1.msra.mxu1 %v1068_v19  ;;  %2664 = vmatprep.subr.mxu0 %v1442_v20  ;;  %v1702_v19 = vld [vmem:[%s10319_s5 + $0x2598] sm:$0xff]  ;;  %v1316_v20 = vld [vmem:[%s10319_s5 + $0x1988] sm:$0xff] }
 0x267   :  { %3015 = vmatprep.subr.mxu1 %v1056_v21  ;;  %2665 = vmatpush1.msra.mxu0 %v1441_v23  ;;  %v1701_v21 = vld [vmem:[%s10319_s5 + $0x2590] sm:$0xff]  ;;  %v1315_v23 = vld [vmem:[%s10319_s5 + $0x1980] sm:$0xff] }
 0x268   :  { %3016 = vmatpush1.msra.mxu1 %v1055_v26  ;;  %2666 = vmatprep.subr.mxu0 %v1429_v27  ;;  %v1689_v26 = vld [vmem:[%s10319_s5 + $0x2530] sm:$0xff]  ;;  %v1303_v27 = vld [vmem:[%s10319_s5 + $0x1920] sm:$0xff] }
 0x269   :  { %3017 = vmatprep.subr.mxu1 %v1043_v30  ;;  %2667 = vmatpush1.msra.mxu0 %v1428_v31  ;;  %v1688_v30 = vld [vmem:[%s10319_s5 + $0x2528] sm:$0xff]  ;;  %v1302_v31 = vld [vmem:[%s10319_s5 + $0x1918] sm:$0xff] }
 0x26a   :  { %3018 = vmatpush1.msra.mxu1 %v1042_v32  ;;  %2668 = vmatprep.subr.mxu0 %v1416_v33  ;;  %v1676_v32 = vld [vmem:[%s10319_s5 + $0x24c8] sm:$0xff]  ;;  %v1290_v33 = vld [vmem:[%s10319_s5 + $0x18b8] sm:$0xff] }
 0x26b   :  { %3019 = vmatprep.subr.mxu1 %v1030_v34  ;;  %2669 = vmatpush1.msra.mxu0 %v1415_v35  ;;  %v1675_v34 = vld [vmem:[%s10319_s5 + $0x24c0] sm:$0xff]  ;;  %v1289_v35 = vld [vmem:[%s10319_s5 + $0x18b0] sm:$0xff] }
 0x26c   :  { %3020 = vmatpush1.msra.mxu1 %v1029_v36  ;;  %2670 = vmatprep.subr.mxu0 %v1403_v37  ;;  %v1663_v36 = vld [vmem:[%s10319_s5 + $0x2460] sm:$0xff]  ;;  %v1277_v37 = vld [vmem:[%s10319_s5 + $0x1850] sm:$0xff] }
 0x26d   :  { %3021 = vmatprep.subr.mxu1 %v1017_v38  ;;  %2671 = vmatpush1.msra.mxu0 %v1402_v29  ;;  %v1662_v38 = vld [vmem:[%s10319_s5 + $0x2458] sm:$0xff]  ;;  %v1276_v29 = vld [vmem:[%s10319_s5 + $0x1848] sm:$0xff] }
 0x26e   :  { %3022 = vmatpush1.msra.mxu1 %v1016_v39  ;;  %2672 = vmatprep.subr.mxu0 %v1390_v40  ;;  %v1650_v39 = vld [vmem:[%s10319_s5 + $0x23f8] sm:$0xff]  ;;  %v1264_v40 = vld [vmem:[%s10319_s5 + $0x17e8] sm:$0xff] }
 0x26f   :  { %3023 = vmatprep.subr.mxu1 %v1004_v41  ;;  %2673 = vmatpush1.msra.mxu0 %v1389_v42  ;;  %v1649_v41 = vld [vmem:[%s10319_s5 + $0x23f0] sm:$0xff]  ;;  %v1263_v42 = vld [vmem:[%s10319_s5 + $0x17e0] sm:$0xff] }
 0x270   :  { %3024 = vmatpush1.msra.mxu1 %v1003_v43  ;;  %2674 = vmatprep.subr.mxu0 %v1377_v44  ;;  %v1637_v43 = vld [vmem:[%s10319_s5 + $0x2390] sm:$0xff]  ;;  %v1251_v44 = vld [vmem:[%s10319_s5 + $0x1780] sm:$0xff] }
 0x271   :  { %3025 = vmatprep.subr.mxu1 %v991_v45  ;;  %2675 = vmatpush1.msra.mxu0 %v1376_v46  ;;  %v1636_v45 = vld [vmem:[%s10319_s5 + $0x2388] sm:$0xff]  ;;  %v1250_v46 = vld [vmem:[%s10319_s5 + $0x1778] sm:$0xff] }
 0x272   :  { %3026 = vmatpush1.msra.mxu1 %v990_v47  ;;  %2676 = vmatprep.subr.mxu0 %v1364_v48  ;;  %v1624_v47 = vld [vmem:[%s10319_s5 + $0x2328] sm:$0xff]  ;;  %v1238_v48 = vld [vmem:[%s10319_s5 + $0x1718] sm:$0xff] }
 0x273   :  { %3027 = vmatprep.subr.mxu1 %v978_v49  ;;  %2677 = vmatpush1.msra.mxu0 %v1363_v50  ;;  %v1623_v49 = vld [vmem:[%s10319_s5 + $0x2320] sm:$0xff]  ;;  %v1237_v50 = vld [vmem:[%s10319_s5 + $0x1710] sm:$0xff] }
 0x274   :  { %3028 = vmatpush1.msra.mxu1 %v977_v51  ;;  %2678 = vmatprep.subr.mxu0 %v1351_v53  ;;  %v1611_v51 = vld [vmem:[%s10319_s5 + $0x22c0] sm:$0xff]  ;;  %v1225_v53 = vld [vmem:[%s10319_s5 + $0x16b0] sm:$0xff] }
 0x275   :  { %3029 = vmatprep.subr.mxu1 %v965_v54  ;;  %2679 = vmatpush1.msra.mxu0 %v1350_v55  ;;  %v1610_v54 = vld [vmem:[%s10319_s5 + $0x22b8] sm:$0xff]  ;;  %v1224_v55 = vld [vmem:[%s10319_s5 + $0x16a8] sm:$0xff] }
 0x276   :  { %3030 = vmatpush1.msra.mxu1 %v964_v56  ;;  %2680 = vmatprep.subr.mxu0 %v1338_v57  ;;  %v1598_v56 = vld [vmem:[%s10319_s5 + $0x2258] sm:$0xff]  ;;  %v1212_v57 = vld [vmem:[%s10319_s5 + $0x1648] sm:$0xff] }
 0x277   :  { %3031 = vmatprep.subr.mxu1 %v952_v58  ;;  %2681 = vmatpush1.msra.mxu0 %v1337_v59  ;;  %v1597_v58 = vld [vmem:[%s10319_s5 + $0x2250] sm:$0xff]  ;;  %v1211_v59 = vld [vmem:[%s10319_s5 + $0x1640] sm:$0xff] }
 0x278   :  { %3032 = vmatpush1.msra.mxu1 %v951_v61  ;;  %2682 = vmatprep.subr.mxu0 %v1741_v62  ;;  %v1585_v61 = vld [vmem:[%s10319_s5 + $0x21f0] sm:$0xff]  ;;  %v1199_v62 = vld [vmem:[%s10319_s5 + $0x15e0] sm:$0xff] }
 0x279   :  { %3033 = vmatprep.subr.mxu1 %v939_v0  ;;  %2683 = vmatpush2.msra.mxu0 %v1740_v1  ;;  %v1584_v0 = vld [vmem:[%s10319_s5 + $0x21e8] sm:$0xff]  ;;  %v1198_v1 = vld [vmem:[%s10319_s5 + $0x15d8] sm:$0xff] }
 0x27a   :  { %3034 = vmatpush1.msra.mxu1 %v938_v2  ;;  %2684 = vmatprep.subr.mxu0 %v1728_v3  ;;  %v1572_v2 = vld [vmem:[%s10319_s5 + $0x2188] sm:$0xff]  ;;  %v1186_v3 = vld [vmem:[%s10319_s5 + $0x1578] sm:$0xff] }
 0x27b   :  { %3035 = vmatprep.subr.mxu1 %v926_v6  ;;  %2685 = vmatpush2.msra.mxu0 %v1727_v10  ;;  %v1571_v6 = vld [vmem:[%s10319_s5 + $0x2180] sm:$0xff]  ;;  %v1185_v10 = vld [vmem:[%s10319_s5 + $0x1570] sm:$0xff] }
 0x27c   :  { %3036 = vmatpush1.msra.mxu1 %v925_v11  ;;  %2686 = vmatprep.subr.mxu0 %v1715_v14  ;;  %v1559_v11 = vld [vmem:[%s10319_s5 + $0x2120] sm:$0xff]  ;;  %v1173_v14 = vld [vmem:[%s10319_s5 + $0x1510] sm:$0xff] }
 0x27d   :  { %3037 = vmatprep.subr.mxu1 %v1329_v15  ;;  %2687 = vmatpush2.msra.mxu0 %v1714_v16  ;;  %v1558_v15 = vld [vmem:[%s10319_s5 + $0x2118] sm:$0xff]  ;;  %v1172_v16 = vld [vmem:[%s10319_s5 + $0x1508] sm:$0xff] }
 0x27e   :  { %3038 = vmatpush2.msra.mxu1 %v1328_v18  ;;  %2688 = vmatprep.subr.mxu0 %v1702_v19  ;;  %v1546_v18 = vld [vmem:[%s10319_s5 + $0x20b8] sm:$0xff]  ;;  %v1160_v19 = vld [vmem:[%s10319_s5 + $0x14a8] sm:$0xff] }
 0x27f   :  { %3039 = vmatprep.subr.mxu1 %v1316_v20  ;;  %2689 = vmatpush2.msra.mxu0 %v1701_v21  ;;  %v1545_v20 = vld [vmem:[%s10319_s5 + $0x20b0] sm:$0xff]  ;;  %v1159_v21 = vld [vmem:[%s10319_s5 + $0x14a0] sm:$0xff] }
 0x280   :  { %3040 = vmatpush2.msra.mxu1 %v1315_v23  ;;  %2690 = vmatprep.subr.mxu0 %v1689_v26  ;;  %v1119_v23 = vld [vmem:[%s10319_s5 + $0x1360] sm:$0xff] }
 0x281   :  { %3041 = vmatprep.subr.mxu1 %v1303_v27  ;;  %2691 = vmatpush2.msra.mxu0 %v1688_v30  ;;  %v1147_v26 = vld [vmem:[%s10319_s5 + $0x1440] sm:$0xff]  ;;  %v1118_v27 = vld [vmem:[%s10319_s5 + $0x1358] sm:$0xff] }
 0x282   :  { %3042 = vmatpush2.msra.mxu1 %v1302_v31  ;;  %2692 = vmatprep.subr.mxu0 %v1676_v32  ;;  %v1146_v30 = vld [vmem:[%s10319_s5 + $0x1438] sm:$0xff] }
 0x283   :  { %3043 = vmatprep.subr.mxu1 %v1290_v33  ;;  %2693 = vmatpush2.msra.mxu0 %v1675_v34  ;;  %v1106_v31 = vld [vmem:[%s10319_s5 + $0x12f8] sm:$0xff]  ;;  %v1105_v33 = vld [vmem:[%s10319_s5 + $0x12f0] sm:$0xff] }
 0x284   :  { %3044 = vmatpush2.msra.mxu1 %v1289_v35  ;;  %2694 = vmatprep.subr.mxu0 %v1663_v36  ;;  %v1134_v32 = vld [vmem:[%s10319_s5 + $0x13d8] sm:$0xff]  ;;  %v1133_v34 = vld [vmem:[%s10319_s5 + $0x13d0] sm:$0xff] }
 0x285   :  { %3045 = vmatprep.subr.mxu1 %v1277_v37  ;;  %2695 = vmatpush2.msra.mxu0 %v1662_v38  ;;  %v1093_v35 = vld [vmem:[%s10319_s5 + $0x1290] sm:$0xff]  ;;  %v914_v36 = vld [vmem:[%s10319_s5 + $0xcf8] sm:$0xff]  ;;  %v1092_v37 = vld [vmem:[%s10319_s5 + $0x1288] sm:$0xff] }
 0x286   :  { %3046 = vmatpush2.msra.mxu1 %v1276_v29  ;;  %2696 = vmatprep.subr.mxu0 %v1650_v39  ;;  %v706_v38 = vld [vmem:[%s10319_s5 + $0x678] sm:$0xff]  ;;  %v1080_v29 = vld [vmem:[%s10319_s5 + $0x1228] sm:$0xff]  ;;  %v901_v39 = vld [vmem:[%s10319_s5 + $0xc90] sm:$0xff] }
 0x287   :  { %3047 = vmatprep.subr.mxu1 %v1264_v40  ;;  %2697 = vmatpush2.msra.mxu0 %v1649_v41  ;;  %v1079_v40 = vld [vmem:[%s10319_s5 + $0x1220] sm:$0xff]  ;;  %v693_v41 = vld [vmem:[%s10319_s5 + $0x610] sm:$0xff] }
 0x288   :  { %3048 = vmatpush2.msra.mxu1 %v1263_v42  ;;  %2698 = vmatprep.subr.mxu0 %v1637_v43  ;;  %v1067_v42 = vld [vmem:[%s10319_s5 + $0x11c0] sm:$0xff]  ;;  %v888_v43 = vld [vmem:[%s10319_s5 + $0xc28] sm:$0xff] }
 0x289   :  { %3049 = vmatprep.subr.mxu1 %v1251_v44  ;;  %2699 = vmatpush2.msra.mxu0 %v1636_v45  ;;  %v1066_v44 = vld [vmem:[%s10319_s5 + $0x11b8] sm:$0xff]  ;;  %v680_v45 = vld [vmem:[%s10319_s5 + $0x5a8] sm:$0xff] }
 0x28a   :  { %3050 = vmatpush2.msra.mxu1 %v1250_v46  ;;  %2700 = vmatprep.subr.mxu0 %v1624_v47  ;;  %v1054_v46 = vld [vmem:[%s10319_s5 + $0x1158] sm:$0xff]  ;;  %v875_v47 = vld [vmem:[%s10319_s5 + $0xbc0] sm:$0xff] }
 0x28b   :  { %3051 = vmatprep.subr.mxu1 %v1238_v48  ;;  %2701 = vmatpush2.msra.mxu0 %v1623_v49  ;;  %v1053_v48 = vld [vmem:[%s10319_s5 + $0x1150] sm:$0xff]  ;;  %v667_v49 = vld [vmem:[%s10319_s5 + $0x540] sm:$0xff] }
 0x28c   :  { %3052 = vmatpush2.msra.mxu1 %v1237_v50  ;;  %2702 = vmatprep.subr.mxu0 %v1611_v51  ;;  %v1041_v50 = vld [vmem:[%s10319_s5 + $0x10f0] sm:$0xff]  ;;  %v862_v51 = vld [vmem:[%s10319_s5 + $0xb58] sm:$0xff] }
 0x28d   :  { %3053 = vmatprep.subr.mxu1 %v1225_v53  ;;  %2703 = vmatpush2.msra.mxu0 %v1610_v54  ;;  %v1040_v53 = vld [vmem:[%s10319_s5 + $0x10e8] sm:$0xff]  ;;  %v654_v54 = vld [vmem:[%s10319_s5 + $0x4d8] sm:$0xff] }
 0x28e   :  { %3054 = vmatpush2.msra.mxu1 %v1224_v55  ;;  %2704 = vmatprep.subr.mxu0 %v1598_v56  ;;  %v1028_v55 = vld [vmem:[%s10319_s5 + $0x1088] sm:$0xff]  ;;  %v849_v56 = vld [vmem:[%s10319_s5 + $0xaf0] sm:$0xff] }
 0x28f   :  { %3055 = vmatprep.subr.mxu1 %v1212_v57  ;;  %2705 = vmatpush2.msra.mxu0 %v1597_v58  ;;  %v1027_v57 = vld [vmem:[%s10319_s5 + $0x1080] sm:$0xff]  ;;  %v641_v58 = vld [vmem:[%s10319_s5 + $0x470] sm:$0xff] }
 0x290   :  { %3056 = vmatpush2.msra.mxu1 %v1211_v59  ;;  %2706 = vmatprep.subr.mxu0 %v1585_v61  ;;  %v1015_v59 = vld [vmem:[%s10319_s5 + $0x1020] sm:$0xff]  ;;  %v836_v61 = vld [vmem:[%s10319_s5 + $0xa88] sm:$0xff] }
 0x291   :  { %3057 = vmatprep.subr.mxu1 %v1199_v62  ;;  %2707 = vmatpush2.msra.mxu0 %v1584_v0  ;;  %v1014_v62 = vld [vmem:[%s10319_s5 + $0x1018] sm:$0xff]  ;;  %v628_v0 = vld [vmem:[%s10319_s5 + $0x408] sm:$0xff] }
 0x292   :  { %3058 = vmatpush2.msra.mxu1 %v1198_v1  ;;  %2708 = vmatprep.subr.mxu0 %v1572_v2  ;;  %v1002_v1 = vld [vmem:[%s10319_s5 + $0xfb8] sm:$0xff]  ;;  %v823_v2 = vld [vmem:[%s10319_s5 + $0xa20] sm:$0xff] }
 0x293   :  { %3059 = vmatprep.subr.mxu1 %v1186_v3  ;;  %2709 = vmatpush2.msra.mxu0 %v1571_v6  ;;  %v1001_v3 = vld [vmem:[%s10319_s5 + $0xfb0] sm:$0xff]  ;;  %v615_v6 = vld [vmem:[%s10319_s5 + $0x3a0] sm:$0xff] }
 0x294   :  { %3060 = vmatpush2.msra.mxu1 %v1185_v10  ;;  %2710 = vmatprep.subr.mxu0 %v1559_v11  ;;  %v989_v10 = vld [vmem:[%s10319_s5 + $0xf50] sm:$0xff]  ;;  %v810_v11 = vld [vmem:[%s10319_s5 + $0x9b8] sm:$0xff] }
 0x295   :  { %3061 = vmatprep.subr.mxu1 %v1173_v14  ;;  %2711 = vmatpush2.msra.mxu0 %v1558_v15  ;;  %v988_v14 = vld [vmem:[%s10319_s5 + $0xf48] sm:$0xff]  ;;  %v602_v15 = vld [vmem:[%s10319_s5 + $0x338] sm:$0xff] }
 0x296   :  { %3062 = vmatpush2.msra.mxu1 %v1172_v16  ;;  %2712 = vmatprep.subr.mxu0 %v1546_v18  ;;  %v976_v16 = vld [vmem:[%s10319_s5 + $0xee8] sm:$0xff]  ;;  %v797_v18 = vld [vmem:[%s10319_s5 + $0x950] sm:$0xff] }
 0x297   :  { %3063 = vmatprep.subr.mxu1 %v1160_v19  ;;  %2713 = vmatpush2.msra.mxu0 %v1545_v20  ;;  %v975_v19 = vld [vmem:[%s10319_s5 + $0xee0] sm:$0xff]  ;;  %v589_v20 = vld [vmem:[%s10319_s5 + $0x2d0] sm:$0xff] }
 0x298   :  { %3064 = vmatpush2.msra.mxu1 %v1159_v21  ;;  %2715 = vmatmul.mubr.f32.vlgmr.msra.gmra.mxu0 %v6039_v25  ;;  %v963_v21 = vld [vmem:[%s10319_s5 + $0xe80] sm:$0xff] }
 0x299   :  { %2792 = vmatprep.subr.mxu0 %v1119_v23  ;;  %3065 = vmatprep.subr.mxu1 %v1147_v26  ;;  %v784_v23 = vld [vmem:[%s10319_s5 + $0x8e8] sm:$0xff]  ;;  %v962_v26 = vld [vmem:[%s10319_s5 + $0xe78] sm:$0xff] }
 0x29a   :  { %2793 = vmatpush1.msra.mxu0 %v1118_v27  ;;  %2856 = vmatprep.mubr.f32.mxu0 %v6047_v17  ;;  %v576_v27 = vld [vmem:[%s10319_s5 + $0x268] sm:$0xff] }
 0x29b   :  { %3066 = vmatpush2.msra.mxu1 %v1146_v30  ;;  %2794 = vmatprep.subr.mxu0 %v1106_v31  ;;  %v950_v30 = vld [vmem:[%s10319_s5 + $0xe18] sm:$0xff]  ;;  %v771_v31 = vld [vmem:[%s10319_s5 + $0x880] sm:$0xff] }
 0x29c   :  { %3067 = vmatprep.subr.mxu1 %v1134_v32  ;;  %2795 = vmatpush1.msra.mxu0 %v1105_v33  ;;  %v949_v32 = vld [vmem:[%s10319_s5 + $0xe10] sm:$0xff]  ;;  %v563_v33 = vld [vmem:[%s10319_s5 + $0x200] sm:$0xff] }
 0x29d   :  { %3068 = vmatpush2.msra.mxu1 %v1133_v34  ;;  %2796 = vmatprep.subr.mxu0 %v1093_v35  ;;  %v937_v34 = vld [vmem:[%s10319_s5 + $0xdb0] sm:$0xff]  ;;  %v758_v35 = vld [vmem:[%s10319_s5 + $0x818] sm:$0xff] }
 0x29e   :  { %3070 = vmatmul.mubr.f32.vlgmr.msra.gmra.mxu1 %v5953_v52  ;;  %4650 = vmatprep.subr.mxu1 %v914_v36  ;;  %v936_v36 = vld [vmem:[%s10319_s5 + $0xda8] sm:$0xff] }
 0x29f   :  { %2797 = vmatpush1.msra.mxu0 %v1092_v37  ;;  %4651 = vmatpush3.msra.mxu1 %v706_v38  ;;  %v550_v37 = vld [vmem:[%s10319_s5 + $0x198] sm:$0xff]  ;;  %v924_v38 = vld [vmem:[%s10319_s5 + $0xd48] sm:$0xff] }
 0x2a0   :  { %3211 = vmatprep.mubr.f32.mxu1 %v5827_v8  ;;  %2798 = vmatprep.subr.mxu0 %v1080_v29  ;;  %v745_v29 = vld [vmem:[%s10319_s5 + $0x7b0] sm:$0xff] }
 0x2a1   :  { %4652 = vmatprep.subr.mxu1 %v901_v39  ;;  %2799 = vmatpush1.msra.mxu0 %v1079_v40  ;;  %v923_v39 = vld [vmem:[%s10319_s5 + $0xd40] sm:$0xff]  ;;  %v537_v40 = vld [vmem:[%s10319_s5 + $0x130] sm:$0xff] }
 0x2a2   :  { %4653 = vmatpush3.msra.mxu1 %v693_v41  ;;  %2800 = vmatprep.subr.mxu0 %v1067_v42  ;;  %v1327_v41 = vld [vmem:[%s10319_s5 + $0x19e0] sm:$0xff]  ;;  %v732_v42 = vld [vmem:[%s10319_s5 + $0x748] sm:$0xff] }
 0x2a3   :  { %4654 = vmatprep.subr.mxu1 %v888_v43  ;;  %2801 = vmatpush1.msra.mxu0 %v1066_v44  ;;  %v1326_v43 = vld [vmem:[%s10319_s5 + $0x19d8] sm:$0xff]  ;;  %v524_v44 = vld [vmem:[%s10319_s5 + $0xc8] sm:$0xff] }
 0x2a4   :  { %4655 = vmatpush3.msra.mxu1 %v680_v45  ;;  %2802 = vmatprep.subr.mxu0 %v1054_v46  ;;  %v1314_v45 = vld [vmem:[%s10319_s5 + $0x1978] sm:$0xff]  ;;  %v719_v46 = vld [vmem:[%s10319_s5 + $0x6e0] sm:$0xff] }
 0x2a5   :  { %4656 = vmatprep.subr.mxu1 %v875_v47  ;;  %2803 = vmatpush1.msra.mxu0 %v1053_v48  ;;  %v1313_v47 = vld [vmem:[%s10319_s5 + $0x1970] sm:$0xff]  ;;  %v511_v48 = vld [vmem:[%s10319_s5 + $0x60] sm:$0xff] }
 0x2a6   :  { %4657 = vmatpush3.msra.mxu1 %v667_v49  ;;  %2804 = vmatprep.subr.mxu0 %v1041_v50  ;;  %v1301_v49 = vld [vmem:[%s10319_s5 + $0x1910] sm:$0xff]  ;;  %v1746_v50 = vld [vmem:[%s10319_s5 + $0x26f8] sm:$0xff] }
 0x2a7   :  { %4658 = vmatprep.subr.mxu1 %v862_v51  ;;  %2805 = vmatpush1.msra.mxu0 %v1040_v53  ;;  %v1300_v51 = vld [vmem:[%s10319_s5 + $0x1908] sm:$0xff]  ;;  %v1538_v53 = vld [vmem:[%s10319_s5 + $0x2078] sm:$0xff] }
 0x2a8   :  { %4659 = vmatpush3.msra.mxu1 %v654_v54  ;;  %2806 = vmatprep.subr.mxu0 %v1028_v55  ;;  %v1288_v54 = vld [vmem:[%s10319_s5 + $0x18a8] sm:$0xff]  ;;  %v1733_v55 = vld [vmem:[%s10319_s5 + $0x2690] sm:$0xff] }
 0x2a9   :  { %4660 = vmatprep.subr.mxu1 %v849_v56  ;;  %2807 = vmatpush1.msra.mxu0 %v1027_v57  ;;  %v1287_v56 = vld [vmem:[%s10319_s5 + $0x18a0] sm:$0xff]  ;;  %v1525_v57 = vld [vmem:[%s10319_s5 + $0x2010] sm:$0xff] }
 0x2aa   :  { %4661 = vmatpush3.msra.mxu1 %v641_v58  ;;  %2808 = vmatprep.subr.mxu0 %v1015_v59  ;;  %v8847_v58 = vpop.f32.mrf.mxu1  ;;  %v1275_v59 = vld [vmem:[%s10319_s5 + $0x1840] sm:$0xff] }
 0x2ab   :  { %4662 = vmatprep.subr.mxu1 %v836_v61  ;;  %2809 = vmatpush1.msra.mxu0 %v1014_v62  ;;  %v1720_v61 = vld [vmem:[%s10319_s5 + $0x2628] sm:$0xff]  ;;  %v1274_v62 = vld [vmem:[%s10319_s5 + $0x1838] sm:$0xff] }
 0x2ac   :  { %4663 = vmatpush3.msra.mxu1 %v628_v0  ;;  %2810 = vmatprep.subr.mxu0 %v1002_v1  ;;  %v1512_v0 = vld [vmem:[%s10319_s5 + $0x1fa8] sm:$0xff]  ;;  %v1262_v1 = vld [vmem:[%s10319_s5 + $0x17d8] sm:$0xff] }
 0x2ad   :  { %4664 = vmatprep.subr.mxu1 %v823_v2  ;;  %2811 = vmatpush1.msra.mxu0 %v1001_v3  ;;  %v1707_v2 = vld [vmem:[%s10319_s5 + $0x25c0] sm:$0xff]  ;;  %v1261_v3 = vld [vmem:[%s10319_s5 + $0x17d0] sm:$0xff] }
 0x2ae   :  { %4665 = vmatpush3.msra.mxu1 %v615_v6  ;;  %2812 = vmatprep.subr.mxu0 %v989_v10  ;;  %v1499_v6 = vld [vmem:[%s10319_s5 + $0x1f40] sm:$0xff]  ;;  %v8874_v10 = vpop.f32.mrf.mxu1 }
 0x2af   :  { %4666 = vmatprep.subr.mxu1 %v810_v11  ;;  %2813 = vmatpush1.msra.mxu0 %v988_v14  ;;  %v1249_v11 = vld [vmem:[%s10319_s5 + $0x1770] sm:$0xff]  ;;  %v1694_v14 = vld [vmem:[%s10319_s5 + $0x2558] sm:$0xff] }
 0x2b0   :  { %4667 = vmatpush3.msra.mxu1 %v602_v15  ;;  %2814 = vmatprep.subr.mxu0 %v976_v16  ;;  %v1248_v15 = vld [vmem:[%s10319_s5 + $0x1768] sm:$0xff]  ;;  %v1486_v16 = vld [vmem:[%s10319_s5 + $0x1ed8] sm:$0xff] }
 0x2b1   :  { %4668 = vmatprep.subr.mxu1 %v797_v18  ;;  %2815 = vmatpush1.msra.mxu0 %v975_v19  ;;  %v1236_v18 = vld [vmem:[%s10319_s5 + $0x1708] sm:$0xff]  ;;  %v1681_v19 = vld [vmem:[%s10319_s5 + $0x24f0] sm:$0xff] }
 0x2b2   :  { %4669 = vmatpush3.msra.mxu1 %v589_v20  ;;  %2816 = vmatprep.subr.mxu0 %v963_v21  ;;  %v1235_v20 = vld [vmem:[%s10319_s5 + $0x1700] sm:$0xff]  ;;  %v1473_v21 = vld [vmem:[%s10319_s5 + $0x1e70] sm:$0xff] }
 0x2b3   :  { %4670 = vmatprep.subr.mxu1 %v784_v23  ;;  %2817 = vmatpush1.msra.mxu0 %v962_v26  ;;  %v8900_v23 = vpop.f32.mrf.mxu1  ;;  %v8902_v26 = vpop.f32.mrf.mxu0 }
 0x2b4   :  { %4671 = vmatpush3.msra.mxu1 %v576_v27  ;;  %2818 = vmatprep.subr.mxu0 %v950_v30  ;;  %v1223_v27 = vld [vmem:[%s10319_s5 + $0x16a0] sm:$0xff]  ;;  %v1668_v30 = vld [vmem:[%s10319_s5 + $0x2488] sm:$0xff] }
 0x2b5   :  { %4672 = vmatprep.subr.mxu1 %v771_v31  ;;  %2819 = vmatpush1.msra.mxu0 %v949_v32  ;;  %v1222_v31 = vld [vmem:[%s10319_s5 + $0x1698] sm:$0xff]  ;;  %v1460_v32 = vld [vmem:[%s10319_s5 + $0x1e08] sm:$0xff] }
 0x2b6   :  { %4673 = vmatpush3.msra.mxu1 %v563_v33  ;;  %2820 = vmatprep.subr.mxu0 %v937_v34  ;;  %v1210_v33 = vld [vmem:[%s10319_s5 + $0x1638] sm:$0xff]  ;;  %v1655_v34 = vld [vmem:[%s10319_s5 + $0x2420] sm:$0xff] }
 0x2b7   :  { %4674 = vmatprep.subr.mxu1 %v758_v35  ;;  %2821 = vmatpush1.msra.mxu0 %v936_v36  ;;  %v1769_v35 = vsub.s32 4, %v5269_v9  ;;  %v1209_v36 = vld [vmem:[%s10319_s5 + $0x1630] sm:$0xff] }
 0x2b8   :  { %4675 = vmatpush3.msra.mxu1 %v550_v37  ;;  %2822 = vmatprep.subr.mxu0 %v924_v38  ;;  %v1447_v37 = vld [vmem:[%s10319_s5 + $0x1da0] sm:$0xff]  ;;  %v8929_v38 = vpop.f32.mrf.mxu1 }
 0x2b9   :  { %4676 = vmatprep.subr.mxu1 %v745_v29  ;;  %2823 = vmatpush1.msra.mxu0 %v923_v39  ;;  %v2150_v29 = vpop.f32.mrf.mxu0  ;;  %v1197_v39 = vld [vmem:[%s10319_s5 + $0x15d0] sm:$0xff] }
 0x2ba   :  { %4677 = vmatpush3.msra.mxu1 %v537_v40  ;;  %2824 = vmatprep.subr.mxu0 %v1327_v41  ;;  %v1642_v40 = vld [vmem:[%s10319_s5 + $0x23b8] sm:$0xff]  ;;  %v1773_v41 = vsub.s32 5, %v5269_v9 }
 0x2bb   :  { %4678 = vmatprep.subr.mxu1 %v732_v42  ;;  %2825 = vmatpush2.msra.mxu0 %v1326_v43  ;;  %v1196_v42 = vld [vmem:[%s10319_s5 + $0x15c8] sm:$0xff]  ;;  %v1434_v43 = vld [vmem:[%s10319_s5 + $0x1d38] sm:$0xff] }
 0x2bc   :  { %4679 = vmatpush3.msra.mxu1 %v524_v44  ;;  %2826 = vmatprep.subr.mxu0 %v1314_v45  ;;  %v2361_v44 = vpop.f32.mrf.mxu1  ;;  %v1765_v45 = vsub.s32 3, %v5269_v9 }
 0x2bd   :  { %4680 = vmatprep.subr.mxu1 %v719_v46  ;;  %2827 = vmatpush2.msra.mxu0 %v1313_v47  ;;  %v8945_v46 = vpop.f32.mrf.mxu0  ;;  %v1184_v47 = vld [vmem:[%s10319_s5 + $0x1568] sm:$0xff] }
 0x2be   :  { %4681 = vmatpush3.msra.mxu1 %v511_v48  ;;  %2828 = vmatprep.subr.mxu0 %v1301_v49  ;;  %v1629_v48 = vld [vmem:[%s10319_s5 + $0x2350] sm:$0xff]  ;;  %v8956_v49 = vld [vmem:[%s10320_s6] sm:$0xff] }
 0x2bf   :  { %3212 = vmatmul.mubr.f32.vlgmr.msra.gmra.mxu1 %v5834_v12  ;;  %4720 = vmatprep.subr.mxu1 %v1746_v50  ;;  %v1770_v50 = vrot.slane %v8956_v49, %v1769_v35 }
 0x2c0   :  { %2829 = vmatpush2.msra.mxu0 %v1300_v51  ;;  %4721 = vmatpush3.msra.mxu1 %v1538_v53  ;;  %v1183_v51 = vld [vmem:[%s10319_s5 + $0x1560] sm:$0xff]  ;;  %v1421_v53 = vld [vmem:[%s10319_s5 + $0x1cd0] sm:$0xff] }
 0x2c1   :  { %3351 = vmatprep.mubr.f32.mxu1 %v5968_v60  ;;  %2830 = vmatprep.subr.mxu0 %v1288_v54  ;;  %v1171_v54 = vld [vmem:[%s10319_s5 + $0x1500] sm:$0xff] }
 0x2c2   :  { %4722 = vmatprep.subr.mxu1 %v1733_v55  ;;  %2831 = vmatpush2.msra.mxu0 %v1287_v56  ;;  %v1616_v55 = vld [vmem:[%s10319_s5 + $0x22e8] sm:$0xff]  ;;  %v1774_v56 = vrot.slane %v8956_v49, %v1773_v41 }
 0x2c3   :  { %4723 = vmatpush3.msra.mxu1 %v1525_v57  ;;  %2832 = vmatprep.subr.mxu0 %v1275_v59  ;;  %v1170_v57 = vld [vmem:[%s10319_s5 + $0x14f8] sm:$0xff]  ;;  %v1408_v59 = vld [vmem:[%s10319_s5 + $0x1c68] sm:$0xff] }
 0x2c4   :  { %4724 = vmatprep.subr.mxu1 %v1720_v61  ;;  %2833 = vmatpush2.msra.mxu0 %v1274_v62  ;;  %v2363_v61 = vpop.f32.mrf.mxu1  ;;  %v1766_v62 = vrot.slane %v8956_v49, %v1765_v45  ;;  %v1356_v41 = vld [vmem:[%s10319_s5 + $0x1ac8] sm:$0xff] }
 0x2c5   :  { %4725 = vmatpush3.msra.mxu1 %v1512_v0  ;;  %2834 = vmatprep.subr.mxu0 %v1262_v1  ;;  %v2292_v0 = vpop.f32.mrf.mxu0  ;;  %v1158_v1 = vld [vmem:[%s10319_s5 + $0x1498] sm:$0xff] }
 0x2c6   :  { %4726 = vmatprep.subr.mxu1 %v1707_v2  ;;  %2835 = vmatpush2.msra.mxu0 %v1261_v3  ;;  %v1603_v2 = vld [vmem:[%s10319_s5 + $0x2280] sm:$0xff]  ;;  %v2362_v3 = vadd.f32 %v2361_v44, %v1770_v50  ;;  %v3433_v50 = vld [vmem:[%s10321_s7 + $0x1f8] sm:$0xff] }
 0x2c7   :  { %4727 = vmatpush3.msra.mxu1 %v1499_v6  ;;  %2836 = vmatprep.subr.mxu0 %v1249_v11  ;;  %v1157_v6 = vld [vmem:[%s10319_s5 + $0x1490] sm:$0xff]  ;;  %v1395_v11 = vld [vmem:[%s10319_s5 + $0x1c00] sm:$0xff] }
 0x2c8   :  { %4728 = vmatprep.subr.mxu1 %v1694_v14  ;;  %2837 = vmatpush2.msra.mxu0 %v1248_v15  ;;  %v1145_v14 = vld [vmem:[%s10319_s5 + $0x1430] sm:$0xff]  ;;  %v1590_v15 = vld [vmem:[%s10319_s5 + $0x2218] sm:$0xff] }
 0x2c9   :  { %4729 = vmatpush3.msra.mxu1 %v1486_v16  ;;  %2838 = vmatprep.subr.mxu0 %v1236_v18  ;;  %v2364_v18 = vadd.f32 %v2363_v61, %v1774_v56  ;;  %v665_v56 = vld [vmem:[%s10319_s5 + $0x530] sm:$0xff]  ;;  %v3431_v61 = vld [vmem:[%s10321_s7 + $0x1e8] sm:$0xff] }
 0x2ca   :  { %4730 = vmatprep.subr.mxu1 %v1681_v19  ;;  %2839 = vmatpush2.msra.mxu0 %v1235_v20  ;;  %v1144_v19 = vld [vmem:[%s10319_s5 + $0x1428] sm:$0xff]  ;;  %v1382_v20 = vld [vmem:[%s10319_s5 + $0x1b98] sm:$0xff] }
 0x2cb   :  { %4731 = vmatpush3.msra.mxu1 %v1473_v21  ;;  %2840 = vmatprep.subr.mxu0 %v1223_v27  ;;  %v2151_v27 = vadd.f32 %v2150_v29, %v1766_v62  ;;  %v1564_v29 = vld [vmem:[%s10319_s5 + $0x2148] sm:$0xff] }
 0x2cc   :  { %4732 = vmatprep.subr.mxu1 %v1668_v30  ;;  %2841 = vmatpush2.msra.mxu0 %v1222_v31  ;;  %v1132_v30 = vld [vmem:[%s10319_s5 + $0x13c8] sm:$0xff]  ;;  %v1577_v31 = vld [vmem:[%s10319_s5 + $0x21b0] sm:$0xff] }
 0x2cd   :  { %4733 = vmatpush3.msra.mxu1 %v1460_v32  ;;  %2842 = vmatprep.subr.mxu0 %v1210_v33  ;;  %v1131_v33 = vld [vmem:[%s10319_s5 + $0x13c0] sm:$0xff]  ;;  %v652_v62 = vld [vmem:[%s10319_s5 + $0x4c8] sm:$0xff] }
 0x2ce   :  { %4734 = vmatprep.subr.mxu1 %v1655_v34  ;;  %2843 = vmatpush2.msra.mxu0 %v1209_v36  ;;  %v1369_v34 = vld [vmem:[%s10319_s5 + $0x1b30] sm:$0xff] }
 0x2cf   :  { %4735 = vmatpush3.msra.mxu1 %v1447_v37  ;;  %2844 = vmatprep.subr.mxu0 %v1197_v39  ;;  %v705_v37 = vld [vmem:[%s10319_s5 + $0x670] sm:$0xff]  ;;  %v704_v39 = vld [vmem:[%s10319_s5 + $0x668] sm:$0xff] }
 0x2d0   :  { %4736 = vmatprep.subr.mxu1 %v1642_v40  ;;  %2845 = vmatpush2.msra.mxu0 %v1196_v42  ;;  %v2222_v40 = vadd.f32 %v8929_v38, %v2151_v27  ;;  %v692_v42 = vld [vmem:[%s10319_s5 + $0x608] sm:$0xff]  ;;  %v691_v38 = vld [vmem:[%s10319_s5 + $0x600] sm:$0xff]  ;;  %v3412_v27 = vld [vmem:[%s10321_s7 + $0x150] sm:$0xff] }
 0x2d1   :  { %4737 = vmatpush3.msra.mxu1 %v1434_v43  ;;  %2846 = vmatprep.subr.mxu0 %v1184_v47  ;;  %v1551_v43 = vld [vmem:[%s10319_s5 + $0x20e0] sm:$0xff] }
 0x2d2   :  { %4738 = vmatprep.subr.mxu1 %v1629_v48  ;;  %2847 = vmatpush2.msra.mxu0 %v1183_v51  ;;  %v2293_v44 = vadd.f32 %v2292_v0, %v2222_v40  ;;  %v1343_v47 = vld [vmem:[%s10319_s5 + $0x1a60] sm:$0xff]  ;;  %v678_v51 = vld [vmem:[%s10319_s5 + $0x598] sm:$0xff]  ;;  %v3415_v0 = vld [vmem:[%s10321_s7 + $0x168] sm:$0xff] }
 0x2d3   :  { %4739 = vmatpush3.msra.mxu1 %v1421_v53  ;;  %2848 = vmatprep.subr.mxu0 %v1171_v54  ;;  %v679_v48 = vld [vmem:[%s10319_s5 + $0x5a0] sm:$0xff]  ;;  %v666_v54 = vld [vmem:[%s10319_s5 + $0x538] sm:$0xff] }
 0x2d4   :  { %4740 = vmatprep.subr.mxu1 %v1616_v55  ;;  %2849 = vmatpush2.msra.mxu0 %v1170_v57  ;;  %v2432_v16 = vpop.f32.mrf.mxu0  ;;  %v3360_v53 = vmax.f32 %v2293_v44, 0.0  ;;  %v3432_v55 = vld [vmem:[%s10321_s7 + $0x1f0] sm:$0xff]  ;;  %v575_v40 = vld [vmem:[%s10319_s5 + $0x260] sm:$0xff]  ;;  %v562_v44 = vld [vmem:[%s10319_s5 + $0x1f8] sm:$0xff] }
 0x2d5   :  { %4741 = vmatpush3.msra.mxu1 %v1408_v59  ;;  %2850 = vmatprep.subr.mxu0 %v1158_v1  ;;  %v9007_v21 = vadd.f32 %v2432_v16, %v2362_v3  ;;  %v3416_v57 = vld [vmem:[%s10321_s7 + $0x170] sm:$0xff]  ;;  %v640_v1 = vld [vmem:[%s10319_s5 + $0x468] sm:$0xff]  ;;  %v639_v3 = vld [vmem:[%s10319_s5 + $0x460] sm:$0xff] }
 0x2d6   :  { %4742 = vmatprep.subr.mxu1 %v1603_v2  ;;  %2851 = vmatpush2.msra.mxu0 %v1157_v6  ;;  %v2434_v32 = vpop.f32.mrf.mxu0  ;;  %v653_v59 = vld [vmem:[%s10319_s5 + $0x4d0] sm:$0xff]  ;;  %v3430_v2 = vld [vmem:[%s10321_s7 + $0x1e0] sm:$0xff]  ;;  %v3413_v16 = vld [vmem:[%s10321_s7 + $0x158] sm:$0xff] }
 0x2d7   :  { %4743 = vmatpush3.msra.mxu1 %v1395_v11  ;;  %2852 = vmatprep.subr.mxu0 %v1145_v14  ;;  %v9021_v36 = vadd.f32 %v2434_v32, %v2364_v18  ;;  %v3414_v6 = vld [vmem:[%s10321_s7 + $0x160] sm:$0xff]  ;;  %v3429_v14 = vld [vmem:[%s10321_s7 + $0x1d8] sm:$0xff]  ;;  %v600_v32 = vld [vmem:[%s10319_s5 + $0x328] sm:$0xff] }
 0x2d8   :  { %4744 = vmatprep.subr.mxu1 %v1590_v15  ;;  %2853 = vmatpush2.msra.mxu0 %v1144_v19  ;;  %v627_v11 = vld [vmem:[%s10319_s5 + $0x400] sm:$0xff]  ;;  %v626_v15 = vld [vmem:[%s10319_s5 + $0x3f8] sm:$0xff]  ;;  %v3428_v19 = vld [vmem:[%s10321_s7 + $0x1d0] sm:$0xff] }
 0x2d9   :  { %4745 = vmatpush3.msra.mxu1 %v1382_v20  ;;  %2854 = vmatprep.subr.mxu0 %v1132_v30  ;;  %v614_v18 = vld [vmem:[%s10319_s5 + $0x398] sm:$0xff]  ;;  %v613_v20 = vld [vmem:[%s10319_s5 + $0x390] sm:$0xff] }
 0x2da   :  { %4746 = vmatprep.subr.mxu1 %v1577_v31  ;;  %2855 = vmatpush2.msra.mxu0 %v1131_v33  ;;  %v601_v30 = vld [vmem:[%s10319_s5 + $0x330] sm:$0xff]  ;;  %v3427_v31 = vld [vmem:[%s10321_s7 + $0x1c8] sm:$0xff] }
 0x2db   :  { %4747 = vmatpush3.msra.mxu1 %v1369_v34  ;;  %2857 = vmatmul.mubr.f32.vlgmr.msra.gmra.mxu0 %v5953_v52  ;;  %v3411_v33 = vld [vmem:[%s10321_s7 + $0x148] sm:$0xff] }
 0x2dc   :  { %2934 = vmatprep.subr.mxu0 %v705_v37  ;;  %4748 = vmatprep.subr.mxu1 %v1564_v29  ;;  %v588_v34 = vld [vmem:[%s10319_s5 + $0x2c8] sm:$0xff]  ;;  %v3426_v37 = vld [vmem:[%s10321_s7 + $0x1c0] sm:$0xff] }
 0x2dd   :  { %2935 = vmatpush1.msra.mxu0 %v704_v39  ;;  %2998 = vmatprep.mubr.f32.mxu0 %v5827_v8  ;;  %v3417_v8 = vld [vmem:[%s10321_s7 + $0x178] sm:$0xff]  ;;  %v587_v29 = vld [vmem:[%s10319_s5 + $0x2c0] sm:$0xff] }
 0x2de   :  { %4749 = vmatpush3.msra.mxu1 %v1356_v41  ;;  %2936 = vmatprep.subr.mxu0 %v692_v42  ;;  %v3410_v39 = vld [vmem:[%s10321_s7 + $0x140] sm:$0xff]  ;;  %v3425_v41 = vld [vmem:[%s10321_s7 + $0x1b8] sm:$0xff] }
 0x2df   :  { %4750 = vmatprep.subr.mxu1 %v1551_v43  ;;  %2937 = vmatpush1.msra.mxu0 %v691_v38  ;;  %v574_v42 = vld [vmem:[%s10319_s5 + $0x258] sm:$0xff]  ;;  %v3424_v38 = vld [vmem:[%s10321_s7 + $0x1b0] sm:$0xff] }
 0x2e0   :  { %4751 = vmatpush3.msra.mxu1 %v1343_v47  ;;  %2938 = vmatprep.subr.mxu0 %v679_v48  ;;  %v3409_v43 = vld [vmem:[%s10321_s7 + $0x138] sm:$0xff]  ;;  %v1762_v47 = vrot.slane %v8956_v49, %v6204_v24  ;;  %v561_v48 = vld [vmem:[%s10319_s5 + $0x1f0] sm:$0xff] }
 0x2e1   :  { %3352 = vmatmul.mubr.f32.vlgmr.msra.gmra.mxu1 %v6039_v25  ;;  %4790 = vmatprep.subr.mxu1 %v3433_v50  ;;  %v3408_v50 = vld [vmem:[%s10321_s7 + $0x130] sm:$0xff] }
 0x2e2   :  { %2939 = vmatpush1.msra.mxu0 %v678_v51  ;;  %4791 = vmatpush3.msra.mxu1 %v3417_v8  ;;  %v549_v51 = vld [vmem:[%s10319_s5 + $0x190] sm:$0xff]  ;;  %v3423_v8 = vld [vmem:[%s10321_s7 + $0x1a8] sm:$0xff] }
 0x2e3   :  { %3710 = vmatprep.mubr.f32.mxu1 %v3360_v53  ;;  %2940 = vmatprep.subr.mxu0 %v666_v54  ;;  %v548_v53 = vld [vmem:[%s10319_s5 + $0x188] sm:$0xff] }
 0x2e4   :  { %4792 = vmatprep.subr.mxu1 %v3432_v55  ;;  %2941 = vmatpush1.msra.mxu0 %v665_v56  ;;  %v3407_v54 = vld [vmem:[%s10321_s7 + $0x128] sm:$0xff]  ;;  %v3422_v56 = vld [vmem:[%s10321_s7 + $0x1a0] sm:$0xff] }
 0x2e5   :  { %4793 = vmatpush3.msra.mxu1 %v3416_v57  ;;  %2942 = vmatprep.subr.mxu0 %v653_v59  ;;  %v536_v55 = vld [vmem:[%s10319_s5 + $0x128] sm:$0xff]  ;;  %v2149_v57 = vadd.f32 %v8902_v26, %v1762_v47  ;;  %v535_v59 = vld [vmem:[%s10319_s5 + $0x120] sm:$0xff]  ;;  %v3421_v26 = vld [vmem:[%s10321_s7 + $0x198] sm:$0xff] }
 0x2e6   :  { %4794 = vmatprep.subr.mxu1 %v3431_v61  ;;  %2943 = vmatpush1.msra.mxu0 %v652_v62  ;;  %v3406_v61 = vld [vmem:[%s10321_s7 + $0x120] sm:$0xff]  ;;  %v3479_v47 = vld [vmem:[%s10321_s7 + $0x368] sm:$0xff] }
 0x2e7   :  { %4795 = vmatpush3.msra.mxu1 %v3415_v0  ;;  %2944 = vmatprep.subr.mxu0 %v640_v1  ;;  %v523_v62 = vld [vmem:[%s10319_s5 + $0xc0] sm:$0xff]  ;;  %v522_v0 = vld [vmem:[%s10319_s5 + $0xb8] sm:$0xff] }
 0x2e8   :  { %4796 = vmatprep.subr.mxu1 %v3430_v2  ;;  %2945 = vmatpush1.msra.mxu0 %v639_v3  ;;  %v3405_v1 = vld [vmem:[%s10321_s7 + $0x118] sm:$0xff]  ;;  %v3420_v3 = vld [vmem:[%s10321_s7 + $0x190] sm:$0xff] }
 0x2e9   :  { %4797 = vmatpush3.msra.mxu1 %v3414_v6  ;;  %2946 = vmatprep.subr.mxu0 %v627_v11  ;;  %v510_v2 = vld [vmem:[%s10319_s5 + $0x58] sm:$0xff]  ;;  %v2220_v6 = vadd.f32 %v8900_v23, %v2149_v57  ;;  %v509_v11 = vld [vmem:[%s10319_s5 + $0x50] sm:$0xff]  ;;  %v3419_v23 = vld [vmem:[%s10321_s7 + $0x188] sm:$0xff] }
 0x2ea   :  { %4798 = vmatprep.subr.mxu1 %v3429_v14  ;;  %2947 = vmatpush1.msra.mxu0 %v626_v15  ;;  %v3404_v14 = vld [vmem:[%s10321_s7 + $0x110] sm:$0xff] }
 0x2eb   :  { %4799 = vmatpush3.msra.mxu1 %v3413_v16  ;;  %2948 = vmatprep.subr.mxu0 %v614_v18  ;;  %v913_v15 = vld [vmem:[%s10319_s5 + $0xcf0] sm:$0xff]  ;;  %v2291_v16 = vadd.f32 %v8945_v46, %v2220_v6  ;;  %v912_v18 = vld [vmem:[%s10319_s5 + $0xce8] sm:$0xff]  ;;  %v3418_v46 = vld [vmem:[%s10321_s7 + $0x180] sm:$0xff] }
 0x2ec   :  { %4800 = vmatprep.subr.mxu1 %v3428_v19  ;;  %2949 = vmatpush1.msra.mxu0 %v613_v20  ;;  %v3403_v19 = vld [vmem:[%s10321_s7 + $0x108] sm:$0xff]  ;;  %v821_v57 = vld [vmem:[%s10319_s5 + $0xa10] sm:$0xff]  ;;  %v3490_v6 = vld [vmem:[%s10321_s7 + $0x3c0] sm:$0xff] }
 0x2ed   :  { %4801 = vmatpush3.msra.mxu1 %v3412_v27  ;;  %2950 = vmatprep.subr.mxu0 %v601_v30  ;;  %v900_v20 = vld [vmem:[%s10319_s5 + $0xc88] sm:$0xff]  ;;  %v899_v27 = vld [vmem:[%s10319_s5 + $0xc80] sm:$0xff] }
 0x2ee   :  { %4802 = vmatprep.subr.mxu1 %v3427_v31  ;;  %2951 = vmatpush1.msra.mxu0 %v600_v32  ;;  %v3402_v30 = vld [vmem:[%s10321_s7 + $0x100] sm:$0xff]  ;;  %v3359_v32 = vmax.f32 %v2291_v16, 0.0  ;;  %v770_v16 = vld [vmem:[%s10319_s5 + $0x878] sm:$0xff] }
 0x2ef   :  { %4803 = vmatpush3.msra.mxu1 %v3411_v33  ;;  %2952 = vmatprep.subr.mxu0 %v588_v34  ;;  %v887_v31 = vld [vmem:[%s10319_s5 + $0xc20] sm:$0xff]  ;;  %v886_v33 = vld [vmem:[%s10319_s5 + $0xc18] sm:$0xff] }
 0x2f0   :  { %4804 = vmatprep.subr.mxu1 %v3426_v37  ;;  %2953 = vmatpush1.msra.mxu0 %v587_v29  ;;  %v3497_v34 = vld [vmem:[%s10321_s7 + $0x3f8] sm:$0xff] }
 0x2f1   :  { %4805 = vmatpush3.msra.mxu1 %v3410_v39  ;;  %2954 = vmatprep.subr.mxu0 %v575_v40  ;;  %v874_v37 = vld [vmem:[%s10319_s5 + $0xbb8] sm:$0xff]  ;;  %v873_v39 = vld [vmem:[%s10319_s5 + $0xbb0] sm:$0xff] }
 0x2f2   :  { %4806 = vmatprep.subr.mxu1 %v3425_v41  ;;  %2955 = vmatpush1.msra.mxu0 %v574_v42  ;;  %v3481_v29 = vld [vmem:[%s10321_s7 + $0x378] sm:$0xff]  ;;  %v3496_v40 = vld [vmem:[%s10321_s7 + $0x3f0] sm:$0xff] }
 0x2f3   :  { %4807 = vmatpush3.msra.mxu1 %v3409_v43  ;;  %2956 = vmatprep.subr.mxu0 %v562_v44  ;;  %v861_v41 = vld [vmem:[%s10319_s5 + $0xb50] sm:$0xff]  ;;  %v860_v43 = vld [vmem:[%s10319_s5 + $0xb48] sm:$0xff] }
 0x2f4   :  { %4808 = vmatprep.subr.mxu1 %v3424_v38  ;;  %2957 = vmatpush1.msra.mxu0 %v561_v48  ;;  %v3480_v42 = vld [vmem:[%s10321_s7 + $0x370] sm:$0xff]  ;;  %v3495_v44 = vld [vmem:[%s10321_s7 + $0x3e8] sm:$0xff]  ;;  %v847_v48 = vld [vmem:[%s10319_s5 + $0xae0] sm:$0xff] }
 0x2f5   :  { %4809 = vmatpush3.msra.mxu1 %v3408_v50  ;;  %2958 = vmatprep.subr.mxu0 %v549_v51  ;;  %v848_v38 = vld [vmem:[%s10319_s5 + $0xae8] sm:$0xff]  ;;  %v3494_v50 = vld [vmem:[%s10321_s7 + $0x3e0] sm:$0xff] }
 0x2f6   :  { %4810 = vmatprep.subr.mxu1 %v3423_v8  ;;  %2959 = vmatpush1.msra.mxu0 %v548_v53  ;;  %v835_v51 = vld [vmem:[%s10319_s5 + $0xa80] sm:$0xff]  ;;  %v834_v53 = vld [vmem:[%s10319_s5 + $0xa78] sm:$0xff] }
 0x2f7   :  { %4811 = vmatpush3.msra.mxu1 %v3407_v54  ;;  %2960 = vmatprep.subr.mxu0 %v536_v55  ;;  %v3478_v8 = vld [vmem:[%s10321_s7 + $0x360] sm:$0xff]  ;;  %v3493_v54 = vld [vmem:[%s10321_s7 + $0x3d8] sm:$0xff] }
 0x2f8   :  { %4812 = vmatprep.subr.mxu1 %v3422_v56  ;;  %2961 = vmatpush1.msra.mxu0 %v535_v59  ;;  %v822_v55 = vld [vmem:[%s10319_s5 + $0xa18] sm:$0xff]  ;;  %v3492_v59 = vld [vmem:[%s10321_s7 + $0x3d0] sm:$0xff] }
 0x2f9   :  { %4813 = vmatpush3.msra.mxu1 %v3406_v61  ;;  %2962 = vmatprep.subr.mxu0 %v523_v62  ;;  %v3477_v56 = vld [vmem:[%s10321_s7 + $0x358] sm:$0xff]  ;;  %v809_v61 = vld [vmem:[%s10319_s5 + $0x9b0] sm:$0xff] }
 0x2fa   :  { %4814 = vmatprep.subr.mxu1 %v3421_v26  ;;  %2963 = vmatpush1.msra.mxu0 %v522_v0  ;;  %v3476_v62 = vld [vmem:[%s10321_s7 + $0x350] sm:$0xff]  ;;  %v808_v26 = vld [vmem:[%s10319_s5 + $0x9a8] sm:$0xff] }
 0x2fb   :  { %4815 = vmatpush3.msra.mxu1 %v3405_v1  ;;  %2964 = vmatprep.subr.mxu0 %v510_v2  ;;  %v3491_v0 = vld [vmem:[%s10321_s7 + $0x3c8] sm:$0xff] }
 0x2fc   :  { %4816 = vmatprep.subr.mxu1 %v3420_v3  ;;  %2965 = vmatpush1.msra.mxu0 %v509_v11  ;;  %v796_v1 = vld [vmem:[%s10319_s5 + $0x948] sm:$0xff]  ;;  %v795_v3 = vld [vmem:[%s10319_s5 + $0x940] sm:$0xff] }
 0x2fd   :  { %4817 = vmatpush3.msra.mxu1 %v3404_v14  ;;  %2966 = vmatprep.subr.mxu0 %v913_v15  ;;  %v3475_v2 = vld [vmem:[%s10321_s7 + $0x348] sm:$0xff]  ;;  %v783_v11 = vld [vmem:[%s10319_s5 + $0x8e0] sm:$0xff]  ;;  %v782_v15 = vld [vmem:[%s10319_s5 + $0x8d8] sm:$0xff] }
 0x2fe   :  { %4818 = vmatprep.subr.mxu1 %v3419_v23  ;;  %2967 = vmatpush2.msra.mxu0 %v912_v18  ;;  %v3474_v14 = vld [vmem:[%s10321_s7 + $0x340] sm:$0xff]  ;;  %v3489_v23 = vld [vmem:[%s10321_s7 + $0x3b8] sm:$0xff] }
 0x2ff   :  { %4819 = vmatpush3.msra.mxu1 %v3403_v19  ;;  %2968 = vmatprep.subr.mxu0 %v900_v20  ;;  %v3473_v18 = vld [vmem:[%s10321_s7 + $0x338] sm:$0xff]  ;;  %v769_v19 = vld [vmem:[%s10319_s5 + $0x870] sm:$0xff] }
 0x300   :  { %4820 = vmatprep.subr.mxu1 %v3418_v46  ;;  %2969 = vmatpush2.msra.mxu0 %v899_v27  ;;  %v3488_v20 = vld [vmem:[%s10321_s7 + $0x3b0] sm:$0xff] }
 0x301   :  { %4821 = vmatpush3.msra.mxu1 %v3402_v30  ;;  %2970 = vmatprep.subr.mxu0 %v887_v31  ;;  %v757_v46 = vld [vmem:[%s10319_s5 + $0x810] sm:$0xff]  ;;  %v756_v30 = vld [vmem:[%s10319_s5 + $0x808] sm:$0xff] }
 0x302   :  { %3711 = vmatmul.mubr.f32.vlgmr.msra.gmra.mxu1 %v3359_v32  ;;  %2971 = vmatpush2.msra.mxu0 %v886_v33  ;;  %v3472_v27 = vld [vmem:[%s10321_s7 + $0x330] sm:$0xff]  ;;  %v3487_v31 = vld [vmem:[%s10321_s7 + $0x3a8] sm:$0xff] }
 0x303   :  { %4860 = vmatprep.subr.mxu1 %v3497_v34  ;;  %2972 = vmatprep.subr.mxu0 %v874_v37  ;;  %v744_v32 = vld [vmem:[%s10319_s5 + $0x7a8] sm:$0xff]  ;;  %v743_v34 = vld [vmem:[%s10319_s5 + $0x7a0] sm:$0xff] }
 0x304   :  { %4861 = vmatpush3.msra.mxu1 %v3481_v29  ;;  %2973 = vmatpush2.msra.mxu0 %v873_v39  ;;  %v3471_v33 = vld [vmem:[%s10321_s7 + $0x328] sm:$0xff]  ;;  %v3486_v37 = vld [vmem:[%s10321_s7 + $0x3a0] sm:$0xff] }
 0x305   :  { %4862 = vmatprep.subr.mxu1 %v3496_v40  ;;  %2974 = vmatprep.subr.mxu0 %v861_v41  ;;  %v731_v29 = vld [vmem:[%s10319_s5 + $0x740] sm:$0xff]  ;;  %v730_v40 = vld [vmem:[%s10319_s5 + $0x738] sm:$0xff] }
 0x306   :  { %4863 = vmatpush3.msra.mxu1 %v3480_v42  ;;  %2975 = vmatpush2.msra.mxu0 %v860_v43  ;;  %v3470_v39 = vld [vmem:[%s10321_s7 + $0x320] sm:$0xff]  ;;  %v3485_v41 = vld [vmem:[%s10321_s7 + $0x398] sm:$0xff] }
 0x307   :  { %4864 = vmatprep.subr.mxu1 %v3495_v44  ;;  %2976 = vmatprep.subr.mxu0 %v848_v38  ;;  %v718_v42 = vld [vmem:[%s10319_s5 + $0x6d8] sm:$0xff]  ;;  %v717_v44 = vld [vmem:[%s10319_s5 + $0x6d0] sm:$0xff] }
 0x308   :  { %4865 = vmatpush3.msra.mxu1 %v3479_v47  ;;  %2977 = vmatpush2.msra.mxu0 %v847_v48  ;;  %v3469_v43 = vld [vmem:[%s10321_s7 + $0x318] sm:$0xff]  ;;  %v3484_v38 = vld [vmem:[%s10321_s7 + $0x390] sm:$0xff]  ;;  %v1536_v48 = vld [vmem:[%s10319_s5 + $0x2068] sm:$0xff] }
 0x309   :  { %4866 = vmatprep.subr.mxu1 %v3494_v50  ;;  %2978 = vmatprep.subr.mxu0 %v835_v51  ;;  %v1537_v47 = vld [vmem:[%s10319_s5 + $0x2070] sm:$0xff]  ;;  %v1524_v50 = vld [vmem:[%s10319_s5 + $0x2008] sm:$0xff] }
 0x30a   :  { %4867 = vmatpush3.msra.mxu1 %v3478_v8  ;;  %2979 = vmatpush2.msra.mxu0 %v834_v53  ;;  %v3468_v51 = vld [vmem:[%s10321_s7 + $0x310] sm:$0xff]  ;;  %v1523_v8 = vld [vmem:[%s10319_s5 + $0x2000] sm:$0xff]  ;;  %v3483_v53 = vld [vmem:[%s10321_s7 + $0x388] sm:$0xff] }
 0x30b   :  { %4868 = vmatprep.subr.mxu1 %v3493_v54  ;;  %2980 = vmatprep.subr.mxu0 %v822_v55  ;;  %v1511_v54 = vld [vmem:[%s10319_s5 + $0x1fa0] sm:$0xff]  ;;  %v1510_v55 = vld [vmem:[%s10319_s5 + $0x1f98] sm:$0xff] }
 0x30c   :  { %4869 = vmatpush3.msra.mxu1 %v3477_v56  ;;  %2981 = vmatpush2.msra.mxu0 %v821_v57  ;;  %v3482_v56 = vld [vmem:[%s10321_s7 + $0x380] sm:$0xff] }
 0x30d   :  { %4870 = vmatprep.subr.mxu1 %v3492_v59  ;;  %2982 = vmatprep.subr.mxu0 %v809_v61  ;;  %v3466_v57 = vld [vmem:[%s10321_s7 + $0x300] sm:$0xff]  ;;  %v1497_v59 = vld [vmem:[%s10319_s5 + $0x1f30] sm:$0xff] }
 0x30e   :  { %4871 = vmatpush3.msra.mxu1 %v3476_v62  ;;  %2983 = vmatpush2.msra.mxu0 %v808_v26  ;;  %v1485_v61 = vld [vmem:[%s10319_s5 + $0x1ed0] sm:$0xff]  ;;  %v1484_v62 = vld [vmem:[%s10319_s5 + $0x1ec8] sm:$0xff] }
 0x30f   :  { %4872 = vmatprep.subr.mxu1 %v3491_v0  ;;  %2984 = vmatprep.subr.mxu0 %v796_v1  ;;  %v1472_v26 = vld [vmem:[%s10319_s5 + $0x1e68] sm:$0xff]  ;;  %v1471_v0 = vld [vmem:[%s10319_s5 + $0x1e60] sm:$0xff] }
 0x310   :  { %4873 = vmatpush3.msra.mxu1 %v3475_v2  ;;  %2985 = vmatpush2.msra.mxu0 %v795_v3  ;;  %v1459_v1 = vld [vmem:[%s10319_s5 + $0x1e00] sm:$0xff]  ;;  %v1458_v2 = vld [vmem:[%s10319_s5 + $0x1df8] sm:$0xff] }
 0x311   :  { %4874 = vmatprep.subr.mxu1 %v3490_v6  ;;  %2986 = vmatprep.subr.mxu0 %v783_v11  ;;  %v1446_v3 = vld [vmem:[%s10319_s5 + $0x1d98] sm:$0xff]  ;;  %v1445_v6 = vld [vmem:[%s10319_s5 + $0x1d90] sm:$0xff] }
 0x312   :  { %4875 = vmatpush3.msra.mxu1 %v3474_v14  ;;  %2987 = vmatpush2.msra.mxu0 %v782_v15  ;;  %v1433_v11 = vld [vmem:[%s10319_s5 + $0x1d30] sm:$0xff]  ;;  %v1432_v14 = vld [vmem:[%s10319_s5 + $0x1d28] sm:$0xff] }
 0x313   :  { %4876 = vmatprep.subr.mxu1 %v3489_v23  ;;  %2988 = vmatprep.subr.mxu0 %v770_v16  ;;  %v1420_v15 = vld [vmem:[%s10319_s5 + $0x1cc8] sm:$0xff]  ;;  %v1419_v23 = vld [vmem:[%s10319_s5 + $0x1cc0] sm:$0xff] }
 0x314   :  { %4877 = vmatpush3.msra.mxu1 %v3473_v18  ;;  %2989 = vmatpush2.msra.mxu0 %v769_v19  ;;  %v1407_v16 = vld [vmem:[%s10319_s5 + $0x1c60] sm:$0xff]  ;;  %v1406_v18 = vld [vmem:[%s10319_s5 + $0x1c58] sm:$0xff] }
 0x315   :  { %4878 = vmatprep.subr.mxu1 %v3488_v20  ;;  %2990 = vmatprep.subr.mxu0 %v757_v46  ;;  %v1394_v19 = vld [vmem:[%s10319_s5 + $0x1bf8] sm:$0xff]  ;;  %v1393_v20 = vld [vmem:[%s10319_s5 + $0x1bf0] sm:$0xff] }
 0x316   :  { %4879 = vmatpush3.msra.mxu1 %v3472_v27  ;;  %2991 = vmatpush2.msra.mxu0 %v756_v30  ;;  %v1381_v46 = vld [vmem:[%s10319_s5 + $0x1b90] sm:$0xff]  ;;  %v1380_v27 = vld [vmem:[%s10319_s5 + $0x1b88] sm:$0xff] }
 0x317   :  { %4880 = vmatprep.subr.mxu1 %v3487_v31  ;;  %2992 = vmatprep.subr.mxu0 %v744_v32  ;;  %v1368_v30 = vld [vmem:[%s10319_s5 + $0x1b28] sm:$0xff]  ;;  %v1367_v31 = vld [vmem:[%s10319_s5 + $0x1b20] sm:$0xff] }
 0x318   :  { %4881 = vmatpush3.msra.mxu1 %v3471_v33  ;;  %2993 = vmatpush2.msra.mxu0 %v743_v34  ;;  %v1355_v32 = vld [vmem:[%s10319_s5 + $0x1ac0] sm:$0xff]  ;;  %v1354_v33 = vld [vmem:[%s10319_s5 + $0x1ab8] sm:$0xff] }
 0x319   :  { %4882 = vmatprep.subr.mxu1 %v3486_v37  ;;  %2994 = vmatprep.subr.mxu0 %v731_v29  ;;  %v1342_v34 = vld [vmem:[%s10319_s5 + $0x1a58] sm:$0xff]  ;;  %v1341_v37 = vld [vmem:[%s10319_s5 + $0x1a50] sm:$0xff] }
 0x31a   :  { %4883 = vmatpush3.msra.mxu1 %v3470_v39  ;;  %2995 = vmatpush2.msra.mxu0 %v730_v40  ;;  %v1745_v29 = vld [vmem:[%s10319_s5 + $0x26f0] sm:$0xff]  ;;  %v1744_v39 = vld [vmem:[%s10319_s5 + $0x26e8] sm:$0xff] }
 0x31b   :  { %4884 = vmatprep.subr.mxu1 %v3485_v41  ;;  %2996 = vmatprep.subr.mxu0 %v718_v42  ;;  %v1732_v40 = vld [vmem:[%s10319_s5 + $0x2688] sm:$0xff]  ;;  %v1731_v41 = vld [vmem:[%s10319_s5 + $0x2680] sm:$0xff] }
 0x31c   :  { %4885 = vmatpush3.msra.mxu1 %v3469_v43  ;;  %2997 = vmatpush2.msra.mxu0 %v717_v44  ;;  %v1719_v42 = vld [vmem:[%s10319_s5 + $0x2620] sm:$0xff]  ;;  %v1718_v43 = vld [vmem:[%s10319_s5 + $0x2618] sm:$0xff] }
 0x31d   :  { %4886 = vmatprep.subr.mxu1 %v3484_v38  ;;  %2999 = vmatmul.mubr.f32.vlgmr.msra.gmra.mxu0 %v5834_v12  ;;  %v3467_v12 = vld [vmem:[%s10321_s7 + $0x308] sm:$0xff]  ;;  %v1706_v44 = vld [vmem:[%s10319_s5 + $0x25b8] sm:$0xff]  ;;  %v1705_v38 = vld [vmem:[%s10319_s5 + $0x25b0] sm:$0xff] }
 0x31e   :  { %3076 = vmatprep.subr.mxu0 %v1537_v47  ;;  %3140 = vmatprep.mubr.f32.mxu0 %v5968_v60  ;;  %v1498_v60 = vld [vmem:[%s10319_s5 + $0x1f38] sm:$0xff]  ;;  %v1693_v47 = vld [vmem:[%s10319_s5 + $0x2550] sm:$0xff] }
 0x31f   :  { %3077 = vmatpush1.msra.mxu0 %v1536_v48  ;;  %4887 = vmatpush3.msra.mxu1 %v3468_v51  ;;  %v1692_v48 = vld [vmem:[%s10319_s5 + $0x2548] sm:$0xff]  ;;  %v1679_v51 = vld [vmem:[%s10319_s5 + $0x24e0] sm:$0xff] }
 0x320   :  { %3078 = vmatprep.subr.mxu0 %v1524_v50  ;;  %4888 = vmatprep.subr.mxu1 %v3483_v53  ;;  %v1680_v50 = vld [vmem:[%s10319_s5 + $0x24e8] sm:$0xff]  ;;  %v1666_v53 = vld [vmem:[%s10319_s5 + $0x2478] sm:$0xff] }
 0x321   :  { %3079 = vmatpush1.msra.mxu0 %v1523_v8  ;;  %4889 = vmatpush3.msra.mxu1 %v3467_v12  ;;  %v1667_v8 = vld [vmem:[%s10319_s5 + $0x2480] sm:$0xff]  ;;  %v1653_v12 = vld [vmem:[%s10319_s5 + $0x2410] sm:$0xff] }
 0x322   :  { %3080 = vmatprep.subr.mxu0 %v1511_v54  ;;  %4890 = vmatprep.subr.mxu1 %v3482_v56  ;;  %v1654_v54 = vld [vmem:[%s10319_s5 + $0x2418] sm:$0xff]  ;;  %v1640_v56 = vld [vmem:[%s10319_s5 + $0x23a8] sm:$0xff] }
 0x323   :  { %3081 = vmatpush1.msra.mxu0 %v1510_v55  ;;  %4891 = vmatpush3.msra.mxu1 %v3466_v57  ;;  %v1641_v55 = vld [vmem:[%s10319_s5 + $0x23b0] sm:$0xff]  ;;  %v1628_v57 = vld [vmem:[%s10319_s5 + $0x2348] sm:$0xff] }
 0x324   :  { %3082 = vmatprep.subr.mxu0 %v1498_v60  ;;  %v1777_v60 = vsub.s32 6, %v5269_v9 }
 0x325   :  { %3083 = vmatpush1.msra.mxu0 %v1497_v59  ;;  %v1781_v59 = vsub.s32 7, %v5269_v9  ;;  %v4068_v9 = vld [vmem:[%s10323_s9 + $0x8] sm:$0xff] }
 0x326   :  { %3084 = vmatprep.subr.mxu0 %v1485_v61  ;;  %v1627_v61 = vld [vmem:[%s10319_s5 + $0x2340] sm:$0xff] }
 0x327   :  { %3085 = vmatpush1.msra.mxu0 %v1484_v62  ;;  %v9588_v62 = vpop.f32.mrf.mxu1 }
 0x328   :  { %3086 = vmatprep.subr.mxu0 %v1472_v26  ;;  %v2574_v26 = vpop.f32.mrf.mxu0 }
 0x329   :  { %3087 = vmatpush1.msra.mxu0 %v1471_v0  ;;  %v1615_v0 = vld [vmem:[%s10319_s5 + $0x22e0] sm:$0xff] }
 0x32a   :  { %3088 = vmatprep.subr.mxu0 %v1459_v1  ;;  %v1614_v1 = vld [vmem:[%s10319_s5 + $0x22d8] sm:$0xff] }
 0x32b   :  { %3089 = vmatpush1.msra.mxu0 %v1458_v2  ;;  %v1778_v2 = vrot.slane %v8956_v49, %v1777_v60  ;;  %v3543_v60 = vld [vmem:[%s10321_s7 + $0x568] sm:$0xff] }
 0x32c   :  { %3090 = vmatprep.subr.mxu0 %v1446_v3  ;;  %v1602_v3 = vld [vmem:[%s10319_s5 + $0x2278] sm:$0xff] }
 0x32d   :  { %3091 = vmatpush1.msra.mxu0 %v1445_v6  ;;  %v1782_v6 = vrot.slane %v8956_v49, %v1781_v59  ;;  %v2575_v49 = vadd.f32 %v2574_v26, %v1778_v2  ;;  %v3558_v59 = vld [vmem:[%s10321_s7 + $0x5e0] sm:$0xff]  ;;  %v1044_v2 = vld [vmem:[%s10319_s5 + $0x1108] sm:$0xff] }
 0x32e   :  { %3092 = vmatprep.subr.mxu0 %v1433_v11  ;;  %v1601_v11 = vld [vmem:[%s10319_s5 + $0x2270] sm:$0xff]  ;;  %v3542_v26 = vld [vmem:[%s10321_s7 + $0x560] sm:$0xff] }
 0x32f   :  { %3093 = vmatpush1.msra.mxu0 %v1432_v14  ;;  %v9604_v14 = vpop.f32.mrf.mxu1 }
 0x330   :  { %3094 = vmatprep.subr.mxu0 %v1420_v15  ;;  %v2576_v15 = vpop.f32.mrf.mxu0 }
 0x331   :  { %3095 = vmatpush1.msra.mxu0 %v1419_v23  ;;  %v1589_v23 = vld [vmem:[%s10319_s5 + $0x2210] sm:$0xff] }
 0x332   :  { %3096 = vmatprep.subr.mxu0 %v1407_v16  ;;  %v1588_v16 = vld [vmem:[%s10319_s5 + $0x2208] sm:$0xff] }
 0x333   :  { %3097 = vmatpush1.msra.mxu0 %v1406_v18  ;;  %v2645_v18 = vpop.f32.mrf.mxu1 }
 0x334   :  { %3098 = vmatprep.subr.mxu0 %v1394_v19  ;;  %v1576_v19 = vld [vmem:[%s10319_s5 + $0x21a8] sm:$0xff] }
 0x335   :  { %3099 = vmatpush1.msra.mxu0 %v1393_v20  ;;  %v2577_v20 = vadd.f32 %v2576_v15, %v1782_v6  ;;  %v1239_v6 = vld [vmem:[%s10319_s5 + $0x1720] sm:$0xff] }
 0x336   :  { %3100 = vmatprep.subr.mxu0 %v1381_v46  ;;  %v1575_v46 = vld [vmem:[%s10319_s5 + $0x21a0] sm:$0xff] }
 0x337   :  { %3101 = vmatpush1.msra.mxu0 %v1380_v27  ;;  %v1563_v27 = vld [vmem:[%s10319_s5 + $0x2140] sm:$0xff] }
 0x338   :  { %3102 = vmatprep.subr.mxu0 %v1368_v30  ;;  %v1562_v30 = vld [vmem:[%s10319_s5 + $0x2138] sm:$0xff]  ;;  %v1031_v15 = vld [vmem:[%s10319_s5 + $0x10a0] sm:$0xff] }
 0x339   :  { %3103 = vmatpush1.msra.mxu0 %v1367_v31  ;;  %v2647_v31 = vpop.f32.mrf.mxu1 }
 0x33a   :  { %3104 = vmatprep.subr.mxu0 %v1355_v32  ;;  %v1550_v32 = vld [vmem:[%s10319_s5 + $0x20d8] sm:$0xff] }
 0x33b   :  { %3105 = vmatpush1.msra.mxu0 %v1354_v33  ;;  %v2646_v33 = vadd.f32 %v2645_v18, %v2575_v49  ;;  %v3555_v18 = vld [vmem:[%s10321_s7 + $0x5c8] sm:$0xff]  ;;  %v1018_v49 = vld [vmem:[%s10319_s5 + $0x1038] sm:$0xff] }
 0x33c   :  { %3106 = vmatprep.subr.mxu0 %v1342_v34 }
 0x33d   :  { %3107 = vmatpush1.msra.mxu0 %v1341_v37  ;;  %v1549_v37 = vld [vmem:[%s10319_s5 + $0x20d0] sm:$0xff] }
 0x33e   :  { %3108 = vmatprep.subr.mxu0 %v1745_v29  ;;  %v2648_v29 = vadd.f32 %v2647_v31, %v2577_v20  ;;  %v1213_v20 = vld [vmem:[%s10319_s5 + $0x1650] sm:$0xff]  ;;  %v1200_v31 = vld [vmem:[%s10319_s5 + $0x15e8] sm:$0xff] }
 0x33f   :  { %3109 = vmatpush2.msra.mxu0 %v1744_v39 }
 0x340   :  { %3110 = vmatprep.subr.mxu0 %v1732_v40  ;;  %v1330_v40 = vld [vmem:[%s10319_s5 + $0x19f8] sm:$0xff] }
 0x341   :  { %3111 = vmatpush2.msra.mxu0 %v1731_v41 }
 0x342   :  { %3112 = vmatprep.subr.mxu0 %v1719_v42  ;;  %v1122_v42 = vld [vmem:[%s10319_s5 + $0x1378] sm:$0xff] }
 0x343   :  { %3113 = vmatpush2.msra.mxu0 %v1718_v43 }
 0x344   :  { %3114 = vmatprep.subr.mxu0 %v1706_v44  ;;  %v1317_v44 = vld [vmem:[%s10319_s5 + $0x1990] sm:$0xff] }
 0x345   :  { %3115 = vmatpush2.msra.mxu0 %v1705_v38 }
 0x346   :  { %3116 = vmatprep.subr.mxu0 %v1693_v47  ;;  %v1109_v47 = vld [vmem:[%s10319_s5 + $0x1310] sm:$0xff] }
 0x347   :  { %3117 = vmatpush2.msra.mxu0 %v1692_v48  ;;  %v1304_v48 = vld [vmem:[%s10319_s5 + $0x1928] sm:$0xff] }
 0x348   :  { %3118 = vmatprep.subr.mxu0 %v1680_v50  ;;  %v1096_v50 = vld [vmem:[%s10319_s5 + $0x12a8] sm:$0xff] }
 0x349   :  { %3119 = vmatpush2.msra.mxu0 %v1679_v51  ;;  %v3545_v51 = vld [vmem:[%s10321_s7 + $0x578] sm:$0xff] }
 0x34a   :  { %3120 = vmatprep.subr.mxu0 %v1667_v8  ;;  %v3560_v8 = vld [vmem:[%s10321_s7 + $0x5f0] sm:$0xff] }
 0x34b   :  { %3121 = vmatpush2.msra.mxu0 %v1666_v53  ;;  %v1083_v53 = vld [vmem:[%s10319_s5 + $0x1240] sm:$0xff] }
 0x34c   :  { %3122 = vmatprep.subr.mxu0 %v1654_v54  ;;  %v3544_v54 = vld [vmem:[%s10321_s7 + $0x570] sm:$0xff] }
 0x34d   :  { %3123 = vmatpush2.msra.mxu0 %v1653_v12  ;;  %v1278_v12 = vld [vmem:[%s10319_s5 + $0x1858] sm:$0xff] }
 0x34e   :  { %3124 = vmatprep.subr.mxu0 %v1641_v55  ;;  %v3559_v55 = vld [vmem:[%s10321_s7 + $0x5e8] sm:$0xff] }
 0x34f   :  { %3125 = vmatpush2.msra.mxu0 %v1640_v56  ;;  %v1070_v56 = vld [vmem:[%s10319_s5 + $0x11d8] sm:$0xff] }
 0x350   :  { %3126 = vmatprep.subr.mxu0 %v1628_v57  ;;  %v1265_v57 = vld [vmem:[%s10319_s5 + $0x17f0] sm:$0xff] }
 0x351   :  { %3127 = vmatpush2.msra.mxu0 %v1627_v61  ;;  %v1057_v61 = vld [vmem:[%s10319_s5 + $0x1170] sm:$0xff] }
 0x352   :  { %3128 = vmatprep.subr.mxu0 %v1615_v0  ;;  %v1252_v0 = vld [vmem:[%s10319_s5 + $0x1788] sm:$0xff] }
 0x353   :  { %3129 = vmatpush2.msra.mxu0 %v1614_v1  ;;  %v3557_v1 = vld [vmem:[%s10321_s7 + $0x5d8] sm:$0xff] }
 0x354   :  { %3130 = vmatprep.subr.mxu0 %v1602_v3  ;;  %v3541_v3 = vld [vmem:[%s10321_s7 + $0x558] sm:$0xff] }
 0x355   :  { %3131 = vmatpush2.msra.mxu0 %v1601_v11  ;;  %v3556_v11 = vld [vmem:[%s10321_s7 + $0x5d0] sm:$0xff] }
 0x356   :  { %3132 = vmatprep.subr.mxu0 %v1589_v23  ;;  %v3540_v23 = vld [vmem:[%s10321_s7 + $0x550] sm:$0xff] }
 0x357   :  { %3133 = vmatpush2.msra.mxu0 %v1588_v16  ;;  %v1226_v16 = vld [vmem:[%s10319_s5 + $0x16b8] sm:$0xff] }
 0x358   :  { %3134 = vmatprep.subr.mxu0 %v1576_v19  ;;  %v2716_v34 = vpop.f32.mrf.mxu0  ;;  %v3539_v19 = vld [vmem:[%s10321_s7 + $0x548] sm:$0xff] }
 0x359   :  { %3135 = vmatpush2.msra.mxu0 %v1575_v46  ;;  %v2717_v39 = vadd.f32 %v2716_v34, %v2646_v33  ;;  %v3554_v46 = vld [vmem:[%s10321_s7 + $0x5c0] sm:$0xff]  ;;  %v992_v33 = vld [vmem:[%s10319_s5 + $0xf68] sm:$0xff]  ;;  %v3537_v34 = vld [vmem:[%s10321_s7 + $0x538] sm:$0xff] }
 0x35a   :  { %3136 = vmatprep.subr.mxu0 %v1563_v27  ;;  %v2718_v41 = vpop.f32.mrf.mxu0  ;;  %v1005_v27 = vld [vmem:[%s10319_s5 + $0xfd0] sm:$0xff] }
 0x35b   :  { %3137 = vmatpush2.msra.mxu0 %v1562_v30  ;;  %v2719_v43 = vadd.f32 %v2718_v41, %v2648_v29  ;;  %v3363_v28 = vmax.f32 %v2717_v39, 0.0  ;;  %v3538_v30 = vld [vmem:[%s10321_s7 + $0x540] sm:$0xff]  ;;  %v3552_v29 = vld [vmem:[%s10321_s7 + $0x5b0] sm:$0xff]  ;;  %v1174_v41 = vld [vmem:[%s10319_s5 + $0x1518] sm:$0xff] }
 0x35c   :  { %3138 = vmatprep.subr.mxu0 %v1550_v32  ;;  %v3553_v32 = vld [vmem:[%s10321_s7 + $0x5b8] sm:$0xff]  ;;  %v979_v39 = vld [vmem:[%s10319_s5 + $0xf00] sm:$0xff] }
 0x35d   :  { %3139 = vmatpush2.msra.mxu0 %v1549_v37  ;;  %v3364_v38 = vmax.f32 %v2719_v43, 0.0  ;;  %v1187_v37 = vld [vmem:[%s10319_s5 + $0x1580] sm:$0xff]  ;;  %v966_v43 = vld [vmem:[%s10319_s5 + $0xe98] sm:$0xff] }
 0x35e   :  { %3141 = vmatmul.mubr.f32.vlgmr.msra.gmra.mxu0 %v6039_v25  ;;  %4685 = vmatprep.subr.mxu0 %v1330_v40  ;;  %v1291_v25 = vld [vmem:[%s10319_s5 + $0x18c0] sm:$0xff]  ;;  %v3536_v40 = vld [vmem:[%s10321_s7 + $0x530] sm:$0xff] }
 0x35f   :  { %4686 = vmatpush3.msra.mxu0 %v1122_v42  ;;  %3281 = vmatprep.mubr.f32.mxu0 %v6047_v17  ;;  %v3561_v17 = vld [vmem:[%s10321_s7 + $0x5f8] sm:$0xff]  ;;  %v3551_v42 = vld [vmem:[%s10321_s7 + $0x5a8] sm:$0xff] }
 0x360   :  { %4687 = vmatprep.subr.mxu0 %v1317_v44  ;;  %3850 = vmatprep.mubr.f32.mxu1 %v3364_v38  ;;  %v3535_v44 = vld [vmem:[%s10321_s7 + $0x528] sm:$0xff]  ;;  %v1161_v38 = vld [vmem:[%s10319_s5 + $0x14b0] sm:$0xff] }
 0x361   :  { %4688 = vmatpush3.msra.mxu0 %v1109_v47  ;;  %3851 = vmatmul.mubr.f32.vlgmr.msra.gmra.mxu1 %v3363_v28  ;;  %v3550_v47 = vld [vmem:[%s10321_s7 + $0x5a0] sm:$0xff]  ;;  %v953_v28 = vld [vmem:[%s10319_s5 + $0xe30] sm:$0xff] }
 0x362   :  { %4689 = vmatprep.subr.mxu0 %v1304_v48  ;;  %4930 = vmatprep.subr.mxu1 %v3561_v17  ;;  %v3534_v48 = vld [vmem:[%s10321_s7 + $0x520] sm:$0xff]  ;;  %v2080_v17 = vadd.f32 %v8874_v10, %v7827_v4  ;;  %v3385_v4 = vld [vmem:[%s10321_s7 + $0x78] sm:$0xff] }
 0x363   :  { %4690 = vmatpush3.msra.mxu0 %v1096_v50  ;;  %4931 = vmatpush3.msra.mxu1 %v3545_v51  ;;  %v1148_v50 = vld [vmem:[%s10319_s5 + $0x1448] sm:$0xff]  ;;  %v1135_v51 = vld [vmem:[%s10319_s5 + $0x13e0] sm:$0xff] }
 0x364   :  { %4691 = vmatprep.subr.mxu0 %v1291_v25  ;;  %4932 = vmatprep.subr.mxu1 %v3560_v8  ;;  %v940_v25 = vld [vmem:[%s10319_s5 + $0xdc8] sm:$0xff]  ;;  %v927_v8 = vld [vmem:[%s10319_s5 + $0xd60] sm:$0xff]  ;;  %v3358_v10 = vmax.f32 %v2080_v17, 0.0  ;;  %v3461_v17 = vld [vmem:[%s10321_s7 + $0x2d8] sm:$0xff] }
 0x365   :  { %4692 = vmatpush3.msra.mxu0 %v1083_v53  ;;  %4933 = vmatpush3.msra.mxu1 %v3544_v54  ;;  %v3401_v53 = vld [vmem:[%s10321_s7 + $0xf8] sm:$0xff]  ;;  %v3400_v54 = vld [vmem:[%s10321_s7 + $0xf0] sm:$0xff] }
 0x366   :  { %4693 = vmatprep.subr.mxu0 %v1278_v12  ;;  %4934 = vmatprep.subr.mxu1 %v3559_v55  ;;  %v3384_v12 = vld [vmem:[%s10321_s7 + $0x70] sm:$0xff]  ;;  %v3399_v55 = vld [vmem:[%s10321_s7 + $0xe8] sm:$0xff] }
 0x367   :  { %4694 = vmatpush3.msra.mxu0 %v1070_v56  ;;  %4935 = vmatpush3.msra.mxu1 %v3543_v60  ;;  %v3383_v56 = vld [vmem:[%s10321_s7 + $0x68] sm:$0xff]  ;;  %v3382_v60 = vld [vmem:[%s10321_s7 + $0x60] sm:$0xff] }
 0x368   :  { %4695 = vmatprep.subr.mxu0 %v1265_v57  ;;  %4936 = vmatprep.subr.mxu1 %v3558_v59  ;;  %v3397_v57 = vld [vmem:[%s10321_s7 + $0xd8] sm:$0xff] }
 0x369   :  { %4696 = vmatpush3.msra.mxu0 %v1057_v61  ;;  %4937 = vmatpush3.msra.mxu1 %v3542_v26  ;;  %v3381_v59 = vld [vmem:[%s10321_s7 + $0x58] sm:$0xff]  ;;  %v3396_v61 = vld [vmem:[%s10321_s7 + $0xd0] sm:$0xff] }
 0x36a   :  { %4697 = vmatprep.subr.mxu0 %v1252_v0  ;;  %4938 = vmatprep.subr.mxu1 %v3557_v1  ;;  %v3380_v26 = vld [vmem:[%s10321_s7 + $0x50] sm:$0xff]  ;;  %v3395_v0 = vld [vmem:[%s10321_s7 + $0xc8] sm:$0xff] }
 0x36b   :  { %4698 = vmatpush3.msra.mxu0 %v1044_v2  ;;  %4939 = vmatpush3.msra.mxu1 %v3541_v3  ;;  %v3379_v1 = vld [vmem:[%s10321_s7 + $0x48] sm:$0xff]  ;;  %v3394_v2 = vld [vmem:[%s10321_s7 + $0xc0] sm:$0xff] }
 0x36c   :  { %4699 = vmatprep.subr.mxu0 %v1239_v6  ;;  %4940 = vmatprep.subr.mxu1 %v3556_v11  ;;  %v3378_v3 = vld [vmem:[%s10321_s7 + $0x40] sm:$0xff]  ;;  %v3393_v6 = vld [vmem:[%s10321_s7 + $0xb8] sm:$0xff] }
 0x36d   :  { %4700 = vmatpush3.msra.mxu0 %v1031_v15  ;;  %4941 = vmatpush3.msra.mxu1 %v3540_v23  ;;  %v3377_v11 = vld [vmem:[%s10321_s7 + $0x38] sm:$0xff]  ;;  %v3392_v15 = vld [vmem:[%s10321_s7 + $0xb0] sm:$0xff] }
 0x36e   :  { %4701 = vmatprep.subr.mxu0 %v1226_v16  ;;  %4942 = vmatprep.subr.mxu1 %v3555_v18  ;;  %v3376_v23 = vld [vmem:[%s10321_s7 + $0x30] sm:$0xff]  ;;  %v3391_v16 = vld [vmem:[%s10321_s7 + $0xa8] sm:$0xff] }
 0x36f   :  { %4702 = vmatpush3.msra.mxu0 %v1018_v49  ;;  %4943 = vmatpush3.msra.mxu1 %v3539_v19  ;;  %v3375_v18 = vld [vmem:[%s10321_s7 + $0x28] sm:$0xff]  ;;  %v3390_v49 = vld [vmem:[%s10321_s7 + $0xa0] sm:$0xff] }
 0x370   :  { %4703 = vmatprep.subr.mxu0 %v1213_v20  ;;  %4944 = vmatprep.subr.mxu1 %v3554_v46  ;;  %v3374_v19 = vld [vmem:[%s10321_s7 + $0x20] sm:$0xff]  ;;  %v3389_v20 = vld [vmem:[%s10321_s7 + $0x98] sm:$0xff] }
 0x371   :  { %4704 = vmatpush3.msra.mxu0 %v1005_v27  ;;  %4945 = vmatpush3.msra.mxu1 %v3538_v30  ;;  %v3373_v46 = vld [vmem:[%s10321_s7 + $0x18] sm:$0xff]  ;;  %v3388_v27 = vld [vmem:[%s10321_s7 + $0x90] sm:$0xff] }
 0x372   :  { %4705 = vmatprep.subr.mxu0 %v1200_v31  ;;  %4946 = vmatprep.subr.mxu1 %v3553_v32  ;;  %v3372_v30 = vld [vmem:[%s10321_s7 + $0x10] sm:$0xff]  ;;  %v3387_v31 = vld [vmem:[%s10321_s7 + $0x88] sm:$0xff]  ;;  %v2078_v32 = vadd.f32 %v8847_v58, %v7816_v63  ;;  %v3465_v63 = vld [vmem:[%s10321_s7 + $0x2f8] sm:$0xff] }
 0x373   :  { %4706 = vmatpush3.msra.mxu0 %v992_v33  ;;  %4947 = vmatpush3.msra.mxu1 %v3537_v34  ;;  %v3371_v33 = vld [vmem:[%s10321_s7 + $0x8] sm:$0xff]  ;;  %v2506_v34 = vadd.f32 %v9604_v14, %v9021_v36  ;;  %v3449_v36 = vld [vmem:[%s10321_s7 + $0x278] sm:$0xff] }
 0x374   :  { %4707 = vmatprep.subr.mxu0 %v1187_v37  ;;  %4948 = vmatprep.subr.mxu1 %v3552_v29  ;;  %v3386_v37 = vld [vmem:[%s10321_s7 + $0x80] sm:$0xff]  ;;  %v3357_v58 = vmax.f32 %v2078_v32, 0.0  ;;  %v3435_v32 = vld [vmem:[%s10321_s7 + $0x208] sm:$0xff] }
 0x375   :  { %4708 = vmatpush3.msra.mxu0 %v979_v39  ;;  %4949 = vmatpush3.msra.mxu1 %v3536_v40  ;;  %v3370_v29 = vld [vmem:[%s10321_s7] sm:$0xff]  ;;  %v3362_v14 = vmax.f32 %v2506_v34, 0.0  ;;  %v3464_v39 = vld [vmem:[%s10321_s7 + $0x2f0] sm:$0xff]  ;;  %v3549_v40 = vld [vmem:[%s10321_s7 + $0x598] sm:$0xff] }
 0x376   :  { %4709 = vmatprep.subr.mxu0 %v1174_v41  ;;  %4950 = vmatprep.subr.mxu1 %v3551_v42  ;;  %v3448_v41 = vld [vmem:[%s10321_s7 + $0x270] sm:$0xff]  ;;  %v3533_v42 = vld [vmem:[%s10321_s7 + $0x518] sm:$0xff]  ;;  %v3450_v34 = vld [vmem:[%s10321_s7 + $0x280] sm:$0xff] }
 0x377   :  { %4710 = vmatpush3.msra.mxu0 %v966_v43  ;;  %4951 = vmatpush3.msra.mxu1 %v3535_v44  ;;  %v3463_v43 = vld [vmem:[%s10321_s7 + $0x2e8] sm:$0xff]  ;;  %v3548_v44 = vld [vmem:[%s10321_s7 + $0x590] sm:$0xff] }
 0x378   :  { %4711 = vmatprep.subr.mxu0 %v1161_v38  ;;  %4952 = vmatprep.subr.mxu1 %v3550_v47  ;;  %v3447_v38 = vld [vmem:[%s10321_s7 + $0x268] sm:$0xff]  ;;  %v3532_v47 = vld [vmem:[%s10321_s7 + $0x510] sm:$0xff] }
 0x379   :  { %4712 = vmatpush3.msra.mxu0 %v953_v28  ;;  %4953 = vmatpush3.msra.mxu1 %v3534_v48  ;;  %v3462_v28 = vld [vmem:[%s10321_s7 + $0x2e0] sm:$0xff]  ;;  %v3547_v48 = vld [vmem:[%s10321_s7 + $0x588] sm:$0xff] }
 0x37a   :  { %4713 = vmatprep.subr.mxu0 %v1148_v50  ;;  %4954 = vmatprep.subr.mxu1 %v3549_v40  ;;  %v3446_v50 = vld [vmem:[%s10321_s7 + $0x260] sm:$0xff] }
 0x37b   :  { %4714 = vmatpush3.msra.mxu0 %v940_v25  ;;  %4955 = vmatpush3.msra.mxu1 %v3533_v42  ;;  %v3531_v25 = vld [vmem:[%s10321_s7 + $0x508] sm:$0xff]  ;;  %v3526_v40 = vld [vmem:[%s10321_s7 + $0x4e0] sm:$0xff]  ;;  %v3525_v42 = vld [vmem:[%s10321_s7 + $0x4d8] sm:$0xff] }
 0x37c   :  { %4715 = vmatprep.subr.mxu0 %v1135_v51  ;;  %4956 = vmatprep.subr.mxu1 %v3548_v44  ;;  %v3546_v51 = vld [vmem:[%s10321_s7 + $0x580] sm:$0xff]  ;;  %v3524_v44 = vld [vmem:[%s10321_s7 + $0x4d0] sm:$0xff] }
 0x37d   :  { %4716 = vmatpush3.msra.mxu0 %v927_v8  ;;  %4957 = vmatpush3.msra.mxu1 %v3532_v47  ;;  %v3445_v8 = vld [vmem:[%s10321_s7 + $0x258] sm:$0xff]  ;;  %v3523_v47 = vld [vmem:[%s10321_s7 + $0x4c8] sm:$0xff] }
 0x37e   :  { %3282 = vmatmul.mubr.f32.vlgmr.msra.gmra.mxu0 %v5953_v52  ;;  %4755 = vmatprep.subr.mxu0 %v3401_v53  ;;  %v3398_v52 = vld [vmem:[%s10321_s7 + $0xe0] sm:$0xff] }
 0x37f   :  { %4756 = vmatpush3.msra.mxu0 %v3385_v4  ;;  %3640 = vmatprep.mubr.f32.mxu0 %v3358_v10  ;;  %v3530_v53 = vld [vmem:[%s10321_s7 + $0x500] sm:$0xff]  ;;  %v3460_v4 = vld [vmem:[%s10321_s7 + $0x2d0] sm:$0xff] }
 0x380   :  { %4757 = vmatprep.subr.mxu0 %v3400_v54  ;;  %4958 = vmatprep.subr.mxu1 %v3547_v48  ;;  %v3444_v10 = vld [vmem:[%s10321_s7 + $0x250] sm:$0xff]  ;;  %v3459_v54 = vld [vmem:[%s10321_s7 + $0x2c8] sm:$0xff]  ;;  %v3522_v48 = vld [vmem:[%s10321_s7 + $0x4c0] sm:$0xff] }
 0x381   :  { %4758 = vmatpush3.msra.mxu0 %v3384_v12  ;;  %4959 = vmatpush3.msra.mxu1 %v3531_v25  ;;  %v3443_v12 = vld [vmem:[%s10321_s7 + $0x248] sm:$0xff]  ;;  %v3521_v25 = vld [vmem:[%s10321_s7 + $0x4b8] sm:$0xff] }
 0x382   :  { %4759 = vmatprep.subr.mxu0 %v3399_v55  ;;  %4960 = vmatprep.subr.mxu1 %v3546_v51  ;;  %v3458_v55 = vld [vmem:[%s10321_s7 + $0x2c0] sm:$0xff]  ;;  %v3520_v51 = vld [vmem:[%s10321_s7 + $0x4b0] sm:$0xff] }
 0x383   :  { %4760 = vmatpush3.msra.mxu0 %v3383_v56  ;;  %4961 = vmatpush3.msra.mxu1 %v3530_v53  ;;  %v3442_v56 = vld [vmem:[%s10321_s7 + $0x240] sm:$0xff]  ;;  %v3504_v53 = vld [vmem:[%s10321_s7 + $0x430] sm:$0xff] }
 0x384   :  { %4761 = vmatprep.subr.mxu0 %v3398_v52  ;;  %5034 = vmatprep.subr.mxu1 %v5147_v5  ;;  %v3457_v52 = vld [vmem:[%s10321_s7 + $0x2b8] sm:$0xff] }
 0x385   :  { %4762 = vmatpush3.msra.mxu0 %v3382_v60  ;;  %v9980_v60 = vpop.f32.mrf.mxu1 }
 0x386   :  { %4763 = vmatprep.subr.mxu0 %v3397_v57  ;;  %v3441_v57 = vld [vmem:[%s10321_s7 + $0x238] sm:$0xff] }
 0x387   :  { %4764 = vmatpush3.msra.mxu0 %v3381_v59  ;;  %v3456_v59 = vld [vmem:[%s10321_s7 + $0x2b0] sm:$0xff] }
 0x388   :  { %4765 = vmatprep.subr.mxu0 %v3396_v61  ;;  %v9991_v61 = vld [vmem:[%s10320_s6 + $0x8] sm:$0x1f] }
 0x389   :  { %4766 = vmatpush3.msra.mxu0 %v3380_v26 }
 0x38a   :  { %4767 = vmatprep.subr.mxu0 %v3395_v0  ;;  %v3440_v0 = vld [vmem:[%s10321_s7 + $0x230] sm:$0xff] }
 0x38b   :  { %4768 = vmatpush3.msra.mxu0 %v3379_v1  ;;  %v1790_v1 = vrot.slane %v9991_v61, %v6181_v13  ;;  %v3438_v13 = vld [vmem:[%s10321_s7 + $0x220] sm:$0xff] }
 0x38c   :  { %4769 = vmatprep.subr.mxu0 %v3394_v2  ;;  %v3455_v2 = vld [vmem:[%s10321_s7 + $0x2a8] sm:$0xff] }
 0x38d   :  { %4770 = vmatpush3.msra.mxu0 %v3378_v3  ;;  %v2789_v3 = vpop.f32.mrf.mxu1 }
 0x38e   :  { %4771 = vmatprep.subr.mxu0 %v3393_v6  ;;  %v3439_v6 = vld [vmem:[%s10321_s7 + $0x228] sm:$0xff] }
 0x38f   :  { %4772 = vmatpush3.msra.mxu0 %v3377_v11  ;;  %v3454_v11 = vld [vmem:[%s10321_s7 + $0x2a0] sm:$0xff] }
 0x390   :  { %4773 = vmatprep.subr.mxu0 %v3392_v15 }
 0x391   :  { %4774 = vmatpush3.msra.mxu0 %v3376_v23  ;;  %v2790_v23 = vadd.f32 %v2789_v3, %v1790_v1  ;;  %v3514_v1 = vld [vmem:[%s10321_s7 + $0x480] sm:$0xff] }
 0x392   :  { %4775 = vmatprep.subr.mxu0 %v3391_v16  ;;  %v3453_v16 = vld [vmem:[%s10321_s7 + $0x298] sm:$0xff] }
 0x393   :  { %4776 = vmatpush3.msra.mxu0 %v3375_v18  ;;  %v10015_v18 = vpop.f32.mrf.mxu1 }
 0x394   :  { %4777 = vmatprep.subr.mxu0 %v3390_v49  ;;  %v3437_v49 = vld [vmem:[%s10321_s7 + $0x218] sm:$0xff] }
 0x395   :  { %4778 = vmatpush3.msra.mxu0 %v3374_v19 }
 0x396   :  { %4779 = vmatprep.subr.mxu0 %v3389_v20  ;;  %v3452_v20 = vld [vmem:[%s10321_s7 + $0x290] sm:$0xff] }
 0x397   :  { %4780 = vmatpush3.msra.mxu0 %v3373_v46  ;;  %v3436_v46 = vld [vmem:[%s10321_s7 + $0x210] sm:$0xff] }
 0x398   :  { %4781 = vmatprep.subr.mxu0 %v3388_v27  ;;  %v3451_v27 = vld [vmem:[%s10321_s7 + $0x288] sm:$0xff] }
 0x399   :  { %4782 = vmatpush3.msra.mxu0 %v3372_v30  ;;  %v2504_v30 = vadd.f32 %v9588_v62, %v9007_v21  ;;  %v3529_v21 = vld [vmem:[%s10321_s7 + $0x4f8] sm:$0xff] }
 0x39a   :  { %4783 = vmatprep.subr.mxu0 %v3387_v31  ;;  %v2931_v31 = vpop.f32.mrf.mxu1 }
 0x39b   :  { %4784 = vmatpush3.msra.mxu0 %v3371_v33  ;;  %v9993_v26 = vpop.f32.mrf.mxu0  ;;  %v3361_v62 = vmax.f32 %v2504_v30, 0.0 }
 0x39c   :  { %4785 = vmatprep.subr.mxu0 %v3386_v37  ;;  %v3434_v37 = vld [vmem:[%s10321_s7 + $0x200] sm:$0xff] }
 0x39d   :  { %4786 = vmatpush3.msra.mxu0 %v3370_v29  ;;  %v2860_v15 = vpop.f32.mrf.mxu0  ;;  %v3513_v29 = vld [vmem:[%s10321_s7 + $0x478] sm:$0xff] }
 0x39e   :  { %3641 = vmatmul.mubr.f32.vlgmr.msra.gmra.mxu0 %v3357_v58  ;;  %4825 = vmatprep.subr.mxu0 %v3465_v63  ;;  %v2861_v19 = vadd.f32 %v2860_v15, %v2790_v23  ;;  %v3528_v58 = vld [vmem:[%s10321_s7 + $0x4f0] sm:$0xff]  ;;  %v3563_v15 = vld [vmem:[%s10321_s7 + $0x608] sm:$0xff] }
 0x39f   :  { %4826 = vmatpush3.msra.mxu0 %v3449_v36  ;;  %3780 = vmatprep.mubr.f32.mxu0 %v3362_v14  ;;  %v3512_v36 = vld [vmem:[%s10321_s7 + $0x470] sm:$0xff]  ;;  %v3527_v14 = vld [vmem:[%s10321_s7 + $0x4e8] sm:$0xff] }
 0x3a0   :  { %4827 = vmatprep.subr.mxu0 %v3464_v39  ;;  %v2932_v33 = vadd.f32 %v2931_v31, %v2861_v19  ;;  %v3511_v39 = vld [vmem:[%s10321_s7 + $0x468] sm:$0xff]  ;;  %v3071_v19 = vpop.f32.mrf.mxu1 }
 0x3a1   :  { %4828 = vmatpush3.msra.mxu0 %v3448_v41  ;;  %v3510_v41 = vld [vmem:[%s10321_s7 + $0x460] sm:$0xff] }
 0x3a2   :  { %4829 = vmatprep.subr.mxu0 %v3463_v43  ;;  %v3366_v63 = vmax.f32 %v2932_v33, 0.0  ;;  %v3509_v43 = vld [vmem:[%s10321_s7 + $0x458] sm:$0xff] }
 0x3a3   :  { %4830 = vmatpush3.msra.mxu0 %v3447_v38  ;;  %v3508_v38 = vld [vmem:[%s10321_s7 + $0x450] sm:$0xff] }
 0x3a4   :  { %4831 = vmatprep.subr.mxu0 %v3462_v28  ;;  %v3507_v28 = vld [vmem:[%s10321_s7 + $0x448] sm:$0xff] }
 0x3a5   :  { %4832 = vmatpush3.msra.mxu0 %v3446_v50  ;;  %v3506_v50 = vld [vmem:[%s10321_s7 + $0x440] sm:$0xff] }
 0x3a6   :  { %4833 = vmatprep.subr.mxu0 %v3461_v17  ;;  %v3505_v17 = vld [vmem:[%s10321_s7 + $0x438] sm:$0xff] }
 0x3a7   :  { %4834 = vmatpush3.msra.mxu0 %v3445_v8  ;;  %v1786_v8 = vrot.slane %v9991_v61, %v6172_v7  ;;  %v3518_v7 = vld [vmem:[%s10321_s7 + $0x4a0] sm:$0xff] }
 0x3a8   :  { %4835 = vmatprep.subr.mxu0 %v3460_v4  ;;  %v3519_v4 = vld [vmem:[%s10321_s7 + $0x4a8] sm:$0xff] }
 0x3a9   :  { %4836 = vmatpush3.msra.mxu0 %v3444_v10  ;;  %v3503_v10 = vld [vmem:[%s10321_s7 + $0x428] sm:$0xff] }
 0x3aa   :  { %4837 = vmatprep.subr.mxu0 %v3459_v54  ;;  %v2788_v54 = vadd.f32 %v9980_v60, %v1786_v8  ;;  %v3516_v60 = vld [vmem:[%s10321_s7 + $0x490] sm:$0xff]  ;;  %v4154_v8 = vld [vmem:[%s10325_s11 + $0x8] sm:$0xff] }
 0x3ab   :  { %4838 = vmatpush3.msra.mxu0 %v3443_v12  ;;  %v3502_v12 = vld [vmem:[%s10321_s7 + $0x420] sm:$0xff] }
 0x3ac   :  { %4839 = vmatprep.subr.mxu0 %v3458_v55  ;;  %v3517_v55 = vld [vmem:[%s10321_s7 + $0x498] sm:$0xff] }
 0x3ad   :  { %4840 = vmatpush3.msra.mxu0 %v3442_v56  ;;  %v2859_v56 = vadd.f32 %v9993_v26, %v2788_v54 }
 0x3ae   :  { %4841 = vmatprep.subr.mxu0 %v3457_v52  ;;  %v3501_v52 = vld [vmem:[%s10321_s7 + $0x418] sm:$0xff] }
 0x3af   :  { %4842 = vmatpush3.msra.mxu0 %v3441_v57  ;;  %v3500_v57 = vld [vmem:[%s10321_s7 + $0x410] sm:$0xff]  ;;  %v2930_v26 = vadd.f32 %v10015_v18, %v2859_v56  ;;  %v1798_v18 = vrot.slane %v9991_v61, %v1765_v45 }
 0x3b0   :  { %4843 = vmatprep.subr.mxu0 %v3456_v59  ;;  %v3515_v59 = vld [vmem:[%s10321_s7 + $0x488] sm:$0xff] }
 0x3b1   :  { %4844 = vmatpush3.msra.mxu0 %v3440_v0  ;;  %v3499_v0 = vld [vmem:[%s10321_s7 + $0x408] sm:$0xff]  ;;  %v3365_v3 = vmax.f32 %v2930_v26, 0.0 }
 0x3b2   :  { %4845 = vmatprep.subr.mxu0 %v3455_v2  ;;  %v3498_v2 = vld [vmem:[%s10321_s7 + $0x400] sm:$0xff] }
 0x3b3   :  { %4846 = vmatpush3.msra.mxu0 %v3439_v6  ;;  %v3565_v6 = vld [vmem:[%s10321_s7 + $0x618] sm:$0xff] }
 0x3b4   :  { %4847 = vmatprep.subr.mxu0 %v3454_v11  ;;  %v3564_v11 = vld [vmem:[%s10321_s7 + $0x610] sm:$0xff] }
 0x3b5   :  { %4848 = vmatpush3.msra.mxu0 %v3438_v13  ;;  %v3562_v13 = vld [vmem:[%s10321_s7 + $0x600] sm:$0xff] }
 0x3b6   :  { %4849 = vmatprep.subr.mxu0 %v3453_v16  ;;  %v1794_v16 = vrot.slane %v9991_v61, %v6204_v24 }
 0x3b7   :  { %4850 = vmatpush3.msra.mxu0 %v3437_v49 }
 0x3b8   :  { %4851 = vmatprep.subr.mxu0 %v3452_v20 }
 0x3b9   :  { %4852 = vmatpush3.msra.mxu0 %v3436_v46 }
 0x3ba   :  { %4853 = vmatprep.subr.mxu0 %v3451_v27  ;;  %v3073_v27 = vpop.f32.mrf.mxu1 }
 0x3bb   :  { %4854 = vmatpush3.msra.mxu0 %v3435_v32 }
 0x3bc   :  { %4855 = vmatprep.subr.mxu0 %v3450_v34  ;;  %v4682_v24 = vpop.f32.mrf.mxu1 }
 0x3bd   :  { %4856 = vmatpush3.msra.mxu0 %v3434_v37 }
 0x3be   :  { %3781 = vmatmul.mubr.f32.vlgmr.msra.gmra.mxu0 %v3361_v62  ;;  %4895 = vmatprep.subr.mxu0 %v3529_v21  ;;  %v4683_v45 = vpop.f32.mrf.mxu1 }
 0x3bf   :  { %4896 = vmatpush3.msra.mxu0 %v3513_v29  ;;  %3920 = vmatprep.mubr.f32.mxu0 %v3366_v63  ;;  %v1802_v63 = vrot.slane %v9991_v61, %v1769_v35  ;;  %v4067_v35 = vld [vmem:[%s10323_s9] sm:$0xff]  ;;  %v4078_v61 = vpop.permute.xlu0 %4077 }
 0x3c0   :  { %4897 = vmatprep.subr.mxu0 %v3528_v58  ;;  %v4752_v29 = vpop.f32.mrf.mxu1  ;;  %v4684_v58 = vadd.f32 %v4683_v45, %v4682_v24  ;;  %v4239_v24 = vld [vmem:[%s10327_s13 + $0x8] sm:$0xff]  ;;  %v4238_v45 = vld [vmem:[%s10327_s13] sm:$0xff] }
 0x3c1   :  { %4898 = vmatpush3.msra.mxu0 %v3512_v36 }
 0x3c2   :  { %4899 = vmatprep.subr.mxu0 %v3527_v14  ;;  %v4753_v14 = vpop.f32.mrf.mxu1 }
 0x3c3   :  { %4900 = vmatpush3.msra.mxu0 %v3511_v39 }
 0x3c4   :  { %4901 = vmatprep.subr.mxu0 %v3526_v40  ;;  %v3214_v40 = vadd.f32 %v4684_v58, %v1802_v63  ;;  %v4395_v63 = vld [vmem:[%s10329_s15 + $0x18] sm:$0xff]  ;;  %v4393_v58 = vld [vmem:[%s10329_s15 + $0x8] sm:$0xff] }
 0x3c5   :  { %4902 = vmatpush3.msra.mxu0 %v3510_v41 }
 0x3c6   :  { %4903 = vmatprep.subr.mxu0 %v3525_v42  ;;  %v4754_v42 = vadd.f32 %v4753_v14, %v4752_v29  ;;  %v498_v29 = vmax.f32 %v7421_v22, 0.0  ;;  %v4394_v22 = vld [vmem:[%s10329_s15 + $0x10] sm:$0xff]  ;;  %v4486_v14 = vld [vmem:[%s10331_s17 + $0x38] sm:$0xff] }
 0x3c7   :  { %4904 = vmatpush3.msra.mxu0 %v3509_v43 }
 0x3c8   :  { %4905 = vmatprep.subr.mxu0 %v3524_v44 }
 0x3c9   :  { %4906 = vmatpush3.msra.mxu0 %v3508_v38 }
 0x3ca   :  { %4907 = vmatprep.subr.mxu0 %v3523_v47  ;;  %v4069_v47 = vld [vmem:[%s10323_s9 + $0x10] sm:$0xff] }
 0x3cb   :  { %4908 = vmatpush3.msra.mxu0 %v3507_v28  ;;  %v4245_v28 = vld [vmem:[%s10328_s14 + $0x18] sm:$0xff] }
 0x3cc   :  { %4909 = vmatprep.subr.mxu0 %v3522_v48  ;;  %v4244_v48 = vld [vmem:[%s10328_s14 + $0x10] sm:$0xff] }
 0x3cd   :  { %4910 = vmatpush3.msra.mxu0 %v3506_v50  ;;  %v4156_v50 = vld [vmem:[%s10325_s11 + $0x18] sm:$0xff] }
 0x3ce   :  { %4911 = vmatprep.subr.mxu0 %v3521_v25  ;;  %v4243_v25 = vld [vmem:[%s10328_s14 + $0x8] sm:$0xff] }
 0x3cf   :  { %4912 = vmatpush3.msra.mxu0 %v3505_v17  ;;  %v4155_v17 = vld [vmem:[%s10325_s11 + $0x10] sm:$0xff] }
 0x3d0   :  { %4913 = vmatprep.subr.mxu0 %v3520_v51  ;;  %v4242_v51 = vld [vmem:[%s10328_s14] sm:$0xff] }
 0x3d1   :  { %4914 = vmatpush3.msra.mxu0 %v3504_v53  ;;  %v4153_v53 = vld [vmem:[%s10325_s11] sm:$0xff] }
 0x3d2   :  { %4915 = vmatprep.subr.mxu0 %v3519_v4 }
 0x3d3   :  { %4916 = vmatpush3.msra.mxu0 %v3503_v10  ;;  %v4822_v10 = vpop.f32.mrf.mxu1 }
 0x3d4   :  { %4917 = vmatprep.subr.mxu0 %v3518_v7 }
 0x3d5   :  { %4918 = vmatpush3.msra.mxu0 %v3502_v12  ;;  %v4823_v54 = vpop.f32.mrf.mxu1 }
 0x3d6   :  { %4919 = vmatprep.subr.mxu0 %v3517_v55 }
 0x3d7   :  { %4920 = vmatpush3.msra.mxu0 %v3501_v52  ;;  %v4598_v52 = vld [vmem:[%s10322_s8] ss:$0 sm:$0xff] }
 0x3d8   :  { %4921 = vmatprep.subr.mxu0 %v3516_v60 }
 0x3d9   :  { %4922 = vmatpush3.msra.mxu0 %v3500_v57 }
 0x3da   :  { %4923 = vmatprep.subr.mxu0 %v3515_v59 }
 0x3db   :  { %4924 = vmatpush3.msra.mxu0 %v3499_v0  ;;  %v4824_v0 = vadd.f32 %v4823_v54, %v4822_v10 }
 0x3dc   :  { %4925 = vmatprep.subr.mxu0 %v3514_v1 }
 0x3dd   :  { %4926 = vmatpush3.msra.mxu0 %v3498_v2  ;;  %v3000_v23 = vpop.f32.mrf.mxu0 }
 0x3de   :  { %3921 = vmatmul.mubr.f32.vlgmr.msra.gmra.mxu0 %v3365_v3  ;;  %5014 = vmatprep.subr.mxu0 %v5147_v5  ;;  %v3001_v20 = vadd.f32 %v3000_v23, %v1794_v16 }
 0x3df   :  { %5015 = vmatpush3.msra.mxu0 %v3565_v6  ;;  %5022 = vmatprep.mubr.msk.f32.mxu0 %vm5150_vm2, %v5147_v5  ;;  %v3002_v49 = vpop.f32.mrf.mxu0 }
 0x3e0   :  { %5016 = vmatprep.subr.mxu0 %v5147_v5  ;;  %v3003_v46 = vadd.f32 %v3002_v49, %v1798_v18  ;;  %v3072_v30 = vadd.f32 %v3071_v19, %v3001_v20 }
 0x3e1   :  { %5017 = vmatpush3.msra.mxu0 %v3564_v11 }
 0x3e2   :  { %5018 = vmatprep.subr.mxu0 %v5147_v5  ;;  %v3074_v32 = vadd.f32 %v3073_v27, %v3003_v46 }
 0x3e3   :  { %5019 = vmatpush3.msra.mxu0 %v3563_v15 }
 0x3e4   :  { %5020 = vmatprep.subr.mxu0 %v5147_v5 }
 0x3e5   :  { %5021 = vmatpush3.msra.mxu0 %v3562_v13 }
 0x3e6   :  { %5025 = vmatprep.subr.mxu0 %v5147_v5 }
 0x41e   :  { %v3142_v31 = vpop.f32.mrf.mxu0 }
 0x41f   :  { %v3143_v33 = vadd.f32 %v3142_v31, %v3072_v30  ;;  %v4600_v31 = vld [vmem:[%s10324_s10] ss:$0 sm:$0xff] }
 0x420   :  { %v3144_v34 = vpop.f32.mrf.mxu0 }
 0x421   :  { %v3145_v37 = vadd.f32 %v3144_v34, %v3074_v32  ;;  %v3367_v62 = vmax.f32 %v3143_v33, 0.0  ;;  %v4892_v56 = vpop.f32.mrf.mxu1 }
 0x423   :  { %v3368_v21 = vmax.f32 %v3145_v37, 0.0  ;;  %v4893_v59 = vpop.f32.mrf.mxu1 }
 0x424   :  { %v4894_v13 = vadd.f32 %v4893_v59, %v4892_v56 }
 0x425   :  { %3990 = vmatprep.mubr.f32.mxu1 %v3368_v21  ;;  %v4241_v21 = vld [vmem:[%s10327_s13 + $0x18] sm:$0xff] }
 0x426   :  { %3991 = vmatmul.mubr.f32.vlgmr.msra.gmra.mxu1 %v3367_v62  ;;  %v4240_v62 = vld [vmem:[%s10327_s13 + $0x10] sm:$0xff] }
 0x427   :  { %5042 = vmatprep.mubr.msk.f32.mxu1 %vm5150_vm2, %v5147_v5  ;;  %5035 = vmatpush3.msra.mxu1 %v4156_v50  ;;  %v4482_v50 = vld [vmem:[%s10331_s17 + $0x18] sm:$0xff] }
 0x428   :  { %5036 = vmatprep.subr.mxu1 %v5147_v5 }
 0x429   :  { %5037 = vmatpush3.msra.mxu1 %v4155_v17  ;;  %v4480_v17 = vld [vmem:[%s10331_s17 + $0x8] sm:$0xff] }
 0x42a   :  { %5038 = vmatprep.subr.mxu1 %v5147_v5 }
 0x42b   :  { %5039 = vmatpush3.msra.mxu1 %v4154_v8 }
 0x42c   :  { %5040 = vmatprep.subr.mxu1 %v5147_v5 }
 0x42d   :  { %5041 = vmatpush3.msra.mxu1 %v4153_v53  ;;  %v4607_v53 = vld [vmem:[%s10330_s16] ss:$0 sm:$0xff]  ;;  %s5152_s16 = smov [#allocation2]  }
 0x42e   :  { %5056 = vmatprep.subr.mxu1 %v5147_v5 }
 0x43e   :  { %v4717_v36 = vpop.f32.mrf.mxu0 }
 0x440   :  { %v4718_v39 = vpop.f32.mrf.mxu0 }
 0x441   :  { %v4719_v41 = vadd.f32 %v4718_v39, %v4717_v36  ;;  %v4392_v36 = vld [vmem:[%s10329_s15] sm:$0xff]  ;;  %v4485_v39 = vld [vmem:[%s10331_s17 + $0x30] sm:$0xff] }
 0x443   :  { %v3284_v43 = vadd.f32 %v4719_v41, %v3214_v40  ;;  %v4484_v40 = vld [vmem:[%s10331_s17 + $0x28] sm:$0xff]  ;;  %v4483_v41 = vld [vmem:[%s10331_s17 + $0x20] sm:$0xff] }
 0x445   :  { %v3354_v44 = vadd.f32 %v4754_v42, %v3284_v43 }
 0x447   :  { %v3369_v38 = vmax.f32 %v3354_v44, 0.0  ;;  %v4602_v44 = vld [vmem:[%s10326_s12] ss:$0 sm:$0xff] }
 0x449   :  { %5023 = vmatmul.mubr.msk.f32.vlgmr.msra.gmra.mxu0 %vm354_vm1, %v3369_v38 }
 0x44a   :  { %5026 = vmatpush3.msra.mxu0 %v4069_v47  ;;  %5031 = vmatprep.mubr.msk.f32.mxu0 %vm5150_vm2, %v5147_v5 }
 0x44b   :  { %5027 = vmatprep.subr.mxu0 %v5147_v5 }
 0x44c   :  { %5028 = vmatpush3.msra.mxu0 %v4068_v9 }
 0x44d   :  { %5029 = vmatprep.subr.mxu0 %v5147_v5 }
 0x44e   :  { %5030 = vmatpush3.msra.mxu0 %v4067_v35 }
 0x44f   :  { %5032 = vmatmul.mubr.msk.f32.vlgmr.msra.gmra.mxu0 %vm4079_vm3, %v4078_v61  ;;  %5045 = vmatprep.subr.mxu0 %v5147_v5 }
 0x450   :  { %5053 = vmatprep.mubr.msk.f32.mxu0 %vm5150_vm2, %v5147_v5  ;;  %5046 = vmatpush3.msra.mxu0 %v4245_v28 }
 0x451   :  { %5047 = vmatprep.subr.mxu0 %v5147_v5 }
 0x452   :  { %5048 = vmatpush3.msra.mxu0 %v4244_v48 }
 0x453   :  { %5049 = vmatprep.subr.mxu0 %v5147_v5 }
 0x454   :  { %5050 = vmatpush3.msra.mxu0 %v4243_v25  ;;  %v4481_v25 = vld [vmem:[%s10331_s17 + $0x10] sm:$0xff] }
 0x455   :  { %5051 = vmatprep.subr.mxu0 %v5147_v5 }
 0x456   :  { %5052 = vmatpush3.msra.mxu0 %v4242_v51  ;;  %v4479_v51 = vld [vmem:[%s10331_s17] sm:$0xff]  ;;  %s4586_s17 = sshll.u32 %s5152_s16, 4  ;;  %s4587_s17 = int_to_ptr.vmem [resolvable:$true] %s4586_s17 }
 0x457   :  { %5067 = vmatprep.subr.mxu0 %v5147_v5  ;;  %p5130_p1 = scmp.lt.s32.totalorder %s4587_s17, %s4587_s17 }
 0x45e   :  { %v4787_v4 = vpop.f32.mrf.mxu0 }
 0x460   :  { %v4788_v7 = vpop.f32.mrf.mxu0 }
 0x461   :  { %v4789_v55 = vadd.f32 %v4788_v7, %v4787_v4 }
 0x463   :  { %v3643_v57 = vadd.f32 %v4789_v55, %v4598_v52 }
 0x465   :  { %v3713_v3 = vadd.f32 %v4824_v0, %v3643_v57 }
 0x47e   :  { %v4857_v12 = vpop.f32.mrf.mxu0 }
 0x480   :  { %v4858_v60 = vpop.f32.mrf.mxu0 }
 0x481   :  { %v4859_v1 = vadd.f32 %v4858_v60, %v4857_v12  ;;  %v4608_v12 = vld [vmem:[%s10332_s18] ss:$0 sm:$0xff]  ;;  %s5125_s18 = scalar_lea.vmem %s4587_s17, 32 }
 0x482   :  { %p5126_p0 = scmp.ne.s32.totalorder %s4587_s17, %s5125_s18  ;;  %p5131_p2 = scmp.lt.s32.totalorder %s5125_s18, %s5125_s18 }
 0x483   :  { %v3783_v11 = vadd.f32 %v4859_v1, %v3713_v3 }
 0x484   :  { %p5132_p3 = por %p5131_p2, %p5130_p1 }
 0x485   :  { %v3853_v16 = vadd.f32 %v4894_v13, %v3783_v11 }
 0x486   :  { %p5133_p4 = pnand %p5132_p3, %p5126_p0 }
 0x49e   :  { %v4927_v26 = vpop.f32.mrf.mxu0 }
 0x4a0   :  { %v4928_v6 = vpop.f32.mrf.mxu0 }
 0x4a1   :  { %v4929_v23 = vadd.f32 %v4928_v6, %v4927_v26 }
 0x4a3   :  { %v3923_v49 = vadd.f32 %v4929_v23, %v3853_v16 }
 0x4e6   :  { %v4962_v2 = vpop.f32.mrf.mxu1 }
 0x4e8   :  { %v4963_v15 = vpop.f32.mrf.mxu1 }
 0x4e9   :  { %v4964_v18 = vadd.f32 %v4963_v15, %v4962_v2 }
 0x4eb   :  { %v3993_v19 = vadd.f32 %v4964_v18, %v3923_v49 }
 0x509   :  { %v4062_v20 = vpop.f32.mrf.mxu0 }
 0x50a   :  { %v4063_v46 = vadd.f32 %v4062_v20, %v3993_v19 }
 0x50b   :  { %v5024_v27 = vpop.f32.mrf.mxu0 }
 0x50c   :  { %v4066_v30 = vmax.f32 %v4063_v46, 0.0 }
 0x50e   :  { %5054 = vmatmul.mubr.msk.f32.vlgmr.msra.gmra.mxu0 %vm354_vm1, %v4066_v30 }
 0x50f   :  { %v4148_v32 = vpop.f32.mrf.mxu0  ;;  %5075 = vmatprep.mubr.msk.f32.mxu0 %vm5150_vm2, %v5147_v5  ;;  %5068 = vmatpush3.msra.mxu0 %v4395_v63 }
 0x510   :  { %v4149_v33 = vadd.f32 %v4600_v31, %v4148_v32  ;;  %5069 = vmatprep.subr.mxu0 %v5147_v5 }
 0x511   :  { %v5033_v34 = vpop.f32.mrf.mxu0  ;;  %5070 = vmatpush3.msra.mxu0 %v4394_v22 }
 0x512   :  { %v4152_v37 = vmax.f32 %v4149_v33, 0.0  ;;  %5071 = vmatprep.subr.mxu0 %v5147_v5 }
 0x513   :  { %5072 = vmatpush3.msra.mxu0 %v4393_v58 }
 0x514   :  { %5043 = vmatmul.mubr.msk.f32.vlgmr.msra.gmra.mxu1 %vm354_vm1, %v4152_v37  ;;  %5073 = vmatprep.subr.mxu0 %v5147_v5 }
 0x515   :  { %5057 = vmatpush3.msra.mxu1 %v4241_v21  ;;  %5064 = vmatprep.mubr.msk.f32.mxu1 %vm5150_vm2, %v5147_v5 }
 0x516   :  { %5058 = vmatprep.subr.mxu1 %v5147_v5  ;;  %5074 = vmatpush3.msra.mxu0 %v4392_v36 }
 0x517   :  { %5059 = vmatpush3.msra.mxu1 %v4240_v62 }
 0x518   :  { %5060 = vmatprep.subr.mxu1 %v5147_v5 }
 0x519   :  { %5061 = vmatpush3.msra.mxu1 %v4239_v24 }
 0x51a   :  { %5062 = vmatprep.subr.mxu1 %v5147_v5 }
 0x51b   :  { %5063 = vmatpush3.msra.mxu1 %v4238_v45 }
 0x51c   :  { %5065 = vmatmul.mubr.msk.f32.vlgmr.msra.gmra.mxu1 %vm354_vm1, %v498_v29  ;;  %5078 = vmatprep.subr.mxu1 %v5147_v5 }
 0x51d   :  { %5094 = vmatprep.mubr.msk.f32.mxu1 %vm5150_vm2, %v5147_v5  ;;  %5079 = vmatpush3.msra.mxu1 %v4486_v14 }
 0x51e   :  { %5080 = vmatprep.subr.mxu1 %v5147_v5 }
 0x51f   :  { %5081 = vmatpush3.msra.mxu1 %v4485_v39 }
 0x520   :  { %5082 = vmatprep.subr.mxu1 %v5147_v5 }
 0x521   :  { %5083 = vmatpush3.msra.mxu1 %v4484_v40 }
 0x522   :  { %5084 = vmatprep.subr.mxu1 %v5147_v5 }
 0x523   :  { %5085 = vmatpush3.msra.mxu1 %v4483_v41 }
 0x524   :  { %5086 = vmatprep.subr.mxu1 %v5147_v5 }
 0x525   :  { %5087 = vmatpush3.msra.mxu1 %v4482_v50 }
 0x526   :  { %5088 = vmatprep.subr.mxu1 %v5147_v5 }
 0x527   :  { %5089 = vmatpush3.msra.mxu1 %v4481_v25 }
 0x528   :  { %5090 = vmatprep.subr.mxu1 %v5147_v5 }
 0x529   :  { %5091 = vmatpush3.msra.mxu1 %v4480_v17 }
 0x52a   :  { %5092 = vmatprep.subr.mxu1 %v5147_v5 }
 0x52b   :  { %5093 = vmatpush3.msra.mxu1 %v4479_v51 }
 0x5ce   :  { %v4315_v42 = vpop.f32.mrf.mxu0 }
 0x5d0   :  { %v5055_v43 = vpop.f32.mrf.mxu0 }
 0x5d4   :  { %v4233_v38 = vpop.f32.mrf.mxu1 }
 0x5d5   :  { %v4234_v47 = vadd.f32 %v4602_v44, %v4233_v38 }
 0x5d6   :  { %v5044_v9 = vpop.f32.mrf.mxu1 }
 0x5d7   :  { %v4237_v35 = vmax.f32 %v4234_v47, 0.0 }
 0x5d9   :  { %5076 = vmatmul.mubr.msk.f32.vlgmr.msra.gmra.mxu0 %vm354_vm1, %v4237_v35 }
 0x5dc   :  { %v4388_v61 = vpop.f32.mrf.mxu1 }
 0x5dd   :  { %v4389_v28 = vadd.f32 %v4388_v61, %v4315_v42 }
 0x5de   :  { %v5066_v48 = vpop.f32.mrf.mxu1 }
 0x699   :  { %v4465_v8 = vpop.f32.mrf.mxu0 }
 0x69a   :  { %v4469_v4 = vadd.f32 %v4465_v8, %v4389_v28 }
 0x69b   :  { %v5077_v10 = vpop.f32.mrf.mxu0 }
 0x69c   :  { %v4477_v7 = vadd.f32 %v4607_v53, %v4469_v4 }
 0x69e   :  { %v4478_v54 = vmax.f32 %v4477_v7, 0.0 }
 0x6a0   :  { %5095 = vmatmul.mubr.msk.f32.vlgmr.msra.gmra.mxu1 %vm164_vm0, %v4478_v54 }
 0x760   :  { %v4563_v55 = vpop.f32.mrf.mxu1 }
 0x761   :  { %v4564_v56 = vadd.f32 %v4608_v12, %v4563_v55 }
 0x762   :  { %v5096_v5 = vpop.f32.mrf.mxu1 }
 0x763   :  { %v4568_v52 = vsel %vm4567_vm4, %v4564_v56, -inf }
 0x764   :  { %4569 = vmax.xlane.f32.xlu1 %v4568_v52 }
 0x7ed   :  { %v4570_v60 = vpop.xlane.xlu1 %4569 }
 0x7ee   :  { %v4571_v57 = vsub.f32 %v4564_v56, %v4570_v60 }
 0x7f0   :  { %v4572_v59 = vmul.f32 1.442695, %v4571_v57 }
 0x7f2   :  { %5120 = vpow2.f32 %v4572_v59 }
 0x7ff   :  { %v5121_v26 = vpop.eup %5120 }
 0x800   :  { %v4574_v0 = vsel %vm4567_vm4, %v5121_v26, 0.0 }
 0x801   :  { %4575 = vadd.xlane.f32.xlu0 %v4574_v0 }
 0x88a   :  { %v4576_v1 = vpop.xlane.xlu0 %4575 }
 0x88b   :  { %5122 = vrcp.f32 %v4576_v1 }
 0x898   :  { %v5123_v2 = vpop.eup %5122 }
 0x899   :  { %v4578_v3 = vmul.f32 %v5123_v2, %v5121_v26 }
 0x89b   :  { %4579 = vst.msk [vmem:[#allocation2] sm:$0x3] %vm4567_vm4, %v4578_v3 }
 0x89c   :  { %5136 = shalt.err (!%p5133_p4)
}
 0x89d   :  { %4589 = dma.vmem_to_hbm [thread:$0]  %s4587_s17, 32, %s10333_s19, [#allocation3]  }
 0x89e   :  { %5145 = dma.done.wait [#allocation3], 32  }
 0x89f   :  { %5146 = vsyncadd [#allocation3], 4294967264 }
 0x8a0   :  { %4593 = vsyncpa [#allocation3], 1 }

</bundles_post_ra>
